<compile_context>
chip_gen: v7x
topology: tpu7x:2x2x1
jax: 0.10.0
libtpu: 0.0.40
codegen_flags: <defaults>
</compile_context>

<pallas_src>
import jax
import jax.numpy as jnp
from jax import lax
from jax.experimental import pallas as pl
from jax.experimental.pallas import tpu as pltpu

F32 = jnp.float32
MXD = jnp.bfloat16      # matmul-operand dtype (f32 accumulation everywhere)

_LSTM_ORDER = (0, 1, 3, 2)   # torch gate rows [i, f, g, o] -> kernel cols [i, f, o, g]
_GRU_ORDER = (0, 1, 2)       # torch gate rows [r, z, n]    -> kernel cols [r, z, n]


# --------------------------------------------------------------------------
# Pallas kernels
# --------------------------------------------------------------------------
def _bilstm_kernel(gxm_ref, whh_ref, len_ref, o_ref, h_scr, c_scr):
    # gxm_ref : (T, Bb, 8H) pre-merged gate pre-activations (fwd cols from pos t,
    #                        rev cols from pos T-1-t), bias already folded in.
    # whh_ref : (2H, 8H)     block-diagonal recurrent weights, gate-major columns
    #                        [i_f i_r | f_f f_r | o_f o_r | g_f g_r]  (bf16)
    # len_ref : (Bb, 1)      valid sequence length per batch row (f32)
    # o_ref   : (T, Bb, 2H)  [:, :, :H] forward outputs, [:, :, H:] reverse outputs
    T = gxm_ref.shape[0]
    Bb = h_scr.shape[0]
    H2 = h_scr.shape[1]                      # 2H
    H = H2 // 2
    G = gxm_ref.shape[2]                     # 8H

    h_scr[...] = jnp.zeros_like(h_scr)
    c_scr[...] = jnp.zeros_like(c_scr)

    whh = whh_ref[...]
    # precompute everything the per-step mask needs (hoisted out of the loop)
    sig_lanes = lax.broadcasted_iota(jnp.int32, (1, G), 1) < 3 * H2    # i|f|o lanes
    half = lax.broadcasted_iota(jnp.int32, (Bb, H2), 1) < H            # fwd half
    L = jnp.broadcast_to(len_ref[...], (Bb, H2))
    sign = jnp.where(half, 1.0, -1.0)
    thresh = jnp.where(half, L, L - (T - 1))   # fwd: t < L ; rev: -t < L-(T-1)

    def step(t, carry):
        h_prev = h_scr[...]
        c_prev = c_scr[...]
        gates = gxm_ref[t] + jnp.dot(h_prev.astype(MXD), whh,
                                     preferred_element_type=jnp.float32)
        # full-128-lane activations + lane-mask blend (no slice before activation)
        act = jnp.where(sig_lanes, jax.nn.sigmoid(gates), jnp.tanh(gates))
        i = act[:, 0:H2]
        f = act[:, H2:2 * H2]
        o = act[:, 2 * H2:3 * H2]
        g = act[:, 3 * H2:4 * H2]
        c_new = f * c_prev + i * g
        h_new = o * jnp.tanh(c_new)

        # one broadcast-mul + one compare; independent of the carried state
        tf = lax.convert_element_type(t, jnp.float32)
        upd = (sign * tf) < thresh                                   # (Bb, 2H)
        c_scr[...] = jnp.where(upd, c_new, c_prev)
        h_scr[...] = jnp.where(upd, h_new, h_prev)
        h_out = jnp.where(upd, h_new, 0.0)                           # padded -> 0
        o_ref[t, :, 0:H] = h_out[:, 0:H]
        o_ref[T - 1 - t, :, H:H2] = h_out[:, H:H2]
        return carry

    lax.fori_loop(0, T, step, 0, unroll=True)


def _bigru_kernel(gxm_ref, whh_ref, bhh_ref, len_ref, o_ref, h_scr):
    # gxm_ref : (C, Nb, 6H) pre-merged gate pre-activations (bih folded in)
    # whh_ref : (2H, 6H)    block-diagonal recurrent weights (bf16)
    # bhh_ref : (1, 6H)
    # len_ref : (Nb, 1)     valid char length per word (f32)
    # o_ref   : (Nb, 2H)    bi-GRU output at char position C-1 only (the only
    #                       timestep the model consumes: out[:, -1, :])
    C = gxm_ref.shape[0]
    Nb = h_scr.shape[0]
    H2 = h_scr.shape[1]
    H = H2 // 2

    h_scr[...] = jnp.zeros_like(h_scr)
    whh = whh_ref[...]
    bhh = bhh_ref[...]
    half = lax.broadcasted_iota(jnp.int32, (Nb, H2), 1) < H
    L = jnp.broadcast_to(len_ref[...], (Nb, H2))
    sign = jnp.where(half, 1.0, -1.0)
    thresh = jnp.where(half, L, L - (C - 1))

    def step(t, carry):
        h_prev = h_scr[...]
        gx = gxm_ref[t]                                              # (Nb, 6H)
        hh = jnp.dot(h_prev.astype(MXD), whh,
                     preferred_element_type=jnp.float32) + bhh       # (Nb, 6H)
        s = jax.nn.sigmoid(gx + hh)       # full width; lanes >= 4H unused (free)
        r = s[:, 0:H2]
        z = s[:, H2:2 * H2]
        n = jnp.tanh(gx[:, 2 * H2:3 * H2] + r * hh[:, 2 * H2:3 * H2])
        h_new = (1.0 - z) * n + z * h_prev

        tf = lax.convert_element_type(t, jnp.float32)
        upd = (sign * tf) < thresh
        h_scr[...] = jnp.where(upd, h_new, h_prev)
        h_out = jnp.where(upd, h_new, 0.0)

        @pl.when(t == C - 1)        # forward output at the last char position
        def _():
            o_ref[:, 0:H] = h_out[:, 0:H]

        @pl.when(t == 0)            # reverse output at the last char position
        def _():
            o_ref[:, H:H2] = h_out[:, H:H2]

        return carry

    lax.fori_loop(0, C, step, 0, unroll=True)


def _epilogue_kernel(x1_ref, aw_ref, mask_ref, bn1s_ref, bn1b_ref, w1_ref, b1_ref,
                     nf_ref, bn2s_ref, bn2b_ref, w2_ref, b2_ref, o_ref):
    # Attention pool over time + eval-BN + Linear + Sigmoid (x2), fully fused,
    # gridded over batch; output padded to a 128-lane slab (sliced outside).
    x1 = x1_ref[...]                                                  # (T, Bb, 2H)
    eij = jnp.tanh(jnp.sum(x1 * aw_ref[...], axis=-1, keepdims=True))  # (T, Bb, 1)
    a = jnp.exp(eij) * mask_ref[...]
    # NOTE: division-then-+eps ordering matches the PyTorch Attention reference.
    a = a / jnp.sum(a, axis=0, keepdims=True) + 1e-10
    v = jnp.sum(x1 * a, axis=0)                                       # (Bb, 2H)

    v = v * bn1s_ref[...] + bn1b_ref[...]                             # eval BN1
    v = jax.nn.sigmoid(jnp.dot(v.astype(MXD), w1_ref[...],
                               preferred_element_type=jnp.float32) + b1_ref[...])
    v = jnp.concatenate([v, nf_ref[...]], axis=-1)                    # (Bb, 64+NF)
    v = v * bn2s_ref[...] + bn2b_ref[...]                             # eval BN2
    o_ref[...] = jax.nn.sigmoid(jnp.dot(v.astype(MXD), w2_ref[...],
                                preferred_element_type=jnp.float32) + b2_ref[...])


# --------------------------------------------------------------------------
# Weight packing (torch layout -> fused bidirectional, gate-major lane layout)
# --------------------------------------------------------------------------
def _pack_ih(wf, wr, H, order):
    cols = []
    for g in order:
        cols.append(wf[g * H:(g + 1) * H, :].T)
        cols.append(wr[g * H:(g + 1) * H, :].T)
    return jnp.concatenate(cols, axis=1).astype(MXD)          # (E, 2*n_g*H)


def _pack_hh(wf, wr, H, order):
    z = jnp.zeros((H, H), F32)
    cols = []
    for g in order:
        cols.append(jnp.concatenate([wf[g * H:(g + 1) * H, :].T, z], axis=0))
        cols.append(jnp.concatenate([z, wr[g * H:(g + 1) * H, :].T], axis=0))
    return jnp.concatenate(cols, axis=1).astype(MXD)          # (2H, 2*n_g*H)


def _pack_b(bf, br, H, order):
    segs = []
    for g in order:
        segs.append(bf[g * H:(g + 1) * H])
        segs.append(br[g * H:(g + 1) * H])
    return jnp.concatenate(segs)[None, :].astype(F32)         # (1, 2*n_g*H)


# --------------------------------------------------------------------------
# Block sizing / compiler params (generation-aware)
# --------------------------------------------------------------------------
def _pick_block(n, row_bytes, cap, budget_bytes):
    """Largest multiple-of-8 divisor of n (<= cap) whose per-block footprint fits
    the VMEM budget, preferring >=2 blocks so the "parallel" grid axis can shard
    across the two TensorCores on v7x (single-TC v5e/v6e: just maximizes size)."""
    if n <= 8 or n % 8 != 0:
        return n                     # tiny / non-8-divisible batch: single block
    best = None
    nb = min(cap, n)
    nb -= nb % 8
    while nb >= 8:
        if n % nb == 0 and nb * row_bytes <= budget_bytes:
            if best is None:
                best = nb
            if n // nb >= 2:
                return nb
        nb -= 8
    return best if best is not None else 8


def _mosaic_params(ws_bytes, semantics):
    # v5e's default scoped-VMEM limit is only 16 MiB (32 MiB on v6e/v7x); size it
    # from the actual working set, capped well under v7x's 64 MiB physical VMEM.
    limit = int(min(max(2 * ws_bytes + (8 << 20), 20 << 20), 56 << 20))
    return pltpu.CompilerParams(dimension_semantics=semantics,
                                vmem_limit_bytes=limit)


# --------------------------------------------------------------------------
# Kernel wrappers
# --------------------------------------------------------------------------
def bilstm_tm(x_tm, lengths, p, H):
    """Fused bidirectional LSTM over padded sequences (pack_padded semantics)."""
    T, B, E = x_tm.shape
    H2, G = 2 * H, 8 * H
    wih = _pack_ih(p["wih_f"], p["wih_r"], H, _LSTM_ORDER)             # (E, 8H)
    whh = _pack_hh(p["whh_f"], p["whh_r"], H, _LSTM_ORDER)             # (2H, 8H)
    bias = _pack_b(p["bih_f"] + p["bhh_f"], p["bih_r"] + p["bhh_r"], H, _LSTM_ORDER)

    # (#1) single fused input projection for ALL timesteps & both directions:
    # one (T*B, E)@(E, 8H) matmul (full MXU rows) instead of T tiny dots.
    gx = jnp.dot(x_tm.reshape(T * B, E).astype(MXD), wih,
                 preferred_element_type=F32).reshape(T, B, G) + bias.reshape(1, 1, G)
    # (#7) pre-merge fwd/rev gate columns: step t consumes fwd cols of position t
    # and rev cols of position T-1-t -> one where over the whole array.
    fwd_cols = (jnp.arange(G) % H2) < H
    gxm = jnp.where(fwd_cols[None, None, :], gx, gx[::-1])             # (T, B, 8H)
    lens = lengths.astype(F32).reshape(B, 1)

    # (#2,#3) grid over batch; per-block footprint sized for v7x's 64 MiB VMEM.
    row_bytes = 8 * T * (G + H2) + 16 * H2 + 1024
    Bb = _pick_block(B, row_bytes, cap=256, budget_bytes=14 << 20)
    ws = Bb * row_bytes + 2 * H2 * G + (1 << 20)
    return pl.pallas_call(
        _bilstm_kernel,
        out_shape=jax.ShapeDtypeStruct((T, B, H2), F32),
        grid=(B // Bb,),
        in_specs=[
            pl.BlockSpec((T, Bb, G), lambda j: (0, j, 0)),
            pl.BlockSpec((H2, G), lambda j: (0, 0)),
            pl.BlockSpec((Bb, 1), lambda j: (j, 0)),
        ],
        out_specs=pl.BlockSpec((T, Bb, H2), lambda j: (0, j, 0)),
        scratch_shapes=[pltpu.VMEM((Bb, H2), F32),
                        pltpu.VMEM((Bb, H2), F32)],
        compiler_params=_mosaic_params(ws, ("parallel",)),
    )(gxm, whh, lens)


def char_bigru(xc, char_len, p, H):
    """Fused bidirectional GRU over char positions; returns output at pos C-1."""
    C, N, Ce = xc.shape
    H2, G = 2 * H, 6 * H
    wih = _pack_ih(p["wih_f"], p["wih_r"], H, _GRU_ORDER)              # (Ce, 6H)
    whh = _pack_hh(p["whh_f"], p["whh_r"], H, _GRU_ORDER)              # (2H, 6H)
    bih = _pack_b(p["bih_f"], p["bih_r"], H, _GRU_ORDER)
    bhh = _pack_b(p["bhh_f"], p["bhh_r"], H, _GRU_ORDER)

    # (#1) single fused input projection for all char positions & both directions.
    gx = jnp.dot(xc.reshape(C * N, Ce).astype(MXD), wih,
                 preferred_element_type=F32).reshape(C, N, G) + bih.reshape(1, 1, G)
    fwd_cols = (jnp.arange(G) % H2) < H
    gxm = jnp.where(fwd_cols[None, None, :], gx, gx[::-1])             # (C, N, 6H)
    lens = char_len.astype(F32).reshape(N, 1)

    # (#5,#6) big word blocks (cap 2048), preferring >=2 blocks for v7x 2-TC split.
    row_bytes = 8 * C * G + 12 * H2 + 1024
    NB = _pick_block(N, row_bytes, cap=2048, budget_bytes=12 << 20)
    ws = NB * row_bytes + 2 * H2 * G + (1 << 20)
    return pl.pallas_call(
        _bigru_kernel,
        out_shape=jax.ShapeDtypeStruct((N, H2), F32),
        grid=(N // NB,),
        in_specs=[
            pl.BlockSpec((C, NB, G), lambda i: (0, i, 0)),
            pl.BlockSpec((H2, G), lambda i: (0, 0)),
            pl.BlockSpec((1, G), lambda i: (0, 0)),
            pl.BlockSpec((NB, 1), lambda i: (i, 0)),
        ],
        out_specs=pl.BlockSpec((NB, H2), lambda i: (i, 0)),
        scratch_shapes=[pltpu.VMEM((NB, H2), F32)],
        compiler_params=_mosaic_params(ws, ("parallel",)),
    )(gxm, whh, bhh, lens)


def fused_epilogue(x1_tm, mask_tm, num_feats, params):
    T, B, H2 = x1_tm.shape
    NF = num_feats.shape[1]
    Hm = params["mlp_w"].shape[0]                                      # 64
    n_out = params["mlp2_w"].shape[0]                                  # 50
    n_pad = ((n_out + 127) // 128) * 128                               # (#12) 128-lane out

    aw = params["attn_w"].reshape(1, 1, H2).astype(F32)
    w1 = params["mlp_w"].T.astype(MXD)                                 # (2H, 64)
    b1 = params["mlp_b"][None, :].astype(F32)
    w2t = params["mlp2_w"].T.astype(MXD)                               # (64+NF, 50)
    w2 = jnp.zeros((Hm + NF, n_pad), MXD).at[:, :n_out].set(w2t)
    b2 = jnp.zeros((1, n_pad), F32).at[:, :n_out].set(params["mlp2_b"][None, :])

    row_bytes = 8 * T * H2 + 1024 * T + 8 * (NF + n_pad) + 1024
    Bb = _pick_block(B, row_bytes, cap=512, budget_bytes=8 << 20)
    ws = Bb * row_bytes + 4 * (H2 * Hm + (Hm + NF) * n_pad) + (1 << 20)
    out = pl.pallas_call(
        _epilogue_kernel,
        out_shape=jax.ShapeDtypeStruct((B, n_pad), F32),
        grid=(B // Bb,),
        in_specs=[
            pl.BlockSpec((T, Bb, H2), lambda j: (0, j, 0)),
            pl.BlockSpec((1, 1, H2), lambda j: (0, 0, 0)),
            pl.BlockSpec((T, Bb, 1), lambda j: (0, j, 0)),
            pl.BlockSpec((1, H2), lambda j: (0, 0)),
            pl.BlockSpec((1, H2), lambda j: (0, 0)),
            pl.BlockSpec((H2, Hm), lambda j: (0, 0)),
            pl.BlockSpec((1, Hm), lambda j: (0, 0)),
            pl.BlockSpec((Bb, NF), lambda j: (j, 0)),
            pl.BlockSpec((1, Hm + NF), lambda j: (0, 0)),
            pl.BlockSpec((1, Hm + NF), lambda j: (0, 0)),
            pl.BlockSpec((Hm + NF, n_pad), lambda j: (0, 0)),
            pl.BlockSpec((1, n_pad), lambda j: (0, 0)),
        ],
        out_specs=pl.BlockSpec((Bb, n_pad), lambda j: (j, 0)),
        compiler_params=_mosaic_params(ws, ("parallel",)),
    )(x1_tm, aw, mask_tm, params["bn1_scale"], params["bn1_shift"], w1, b1,
      num_feats, params["bn2_scale"], params["bn2_shift"], w2, b2)
    return out[:, :n_out]


# --------------------------------------------------------------------------
# Model glue (plain JAX): embedding gathers, layout bookkeeping on int arrays
# --------------------------------------------------------------------------
def char_model_forward(char_ids, char_lens, params, H):
    """CharModel: char-embedding -> fused bi-GRU -> output at char position C-1."""
    B, T, C = char_ids.shape
    # gather char embeddings directly in (char-pos, word) major layout; only the
    # small int index arrays are transposed, never float activations.
    cid = jnp.transpose(char_ids, (2, 1, 0)).reshape(C, T * B)     # (C, T*B)
    clen = char_lens.T.reshape(T * B)                              # (T*B,)
    emb = params["char_embedding"][cid]                            # (C, T*B, Ce)
    state = char_bigru(emb, clen, params["char_gru"], H)           # (T*B, 2H)
    return state.reshape(T, B, 2 * H)


def spo_forward(params, X, pos_tags, mask_X, length, num_feats,
                char_ids, char_lens):
    H = params["lstm"]["whh_f"].shape[1]
    # embeddings gathered directly time-major
    x_word = params["word_embedding"][X.T]                         # (T, B, We)
    x_pos = params["pos_embedding"][pos_tags.T]                    # (T, B, Pd)
    x_char = char_model_forward(char_ids, char_lens, params, H)    # (T, B, 2H)
    x = jnp.concatenate([x_word, x_pos, x_char], axis=-1)          # (T, B, E)

    x1 = bilstm_tm(x, length, params["lstm"], H)                   # (T, B, 2H)

    mask_tm = mask_X.T[:, :, None].astype(F32)                     # (T, B, 1)
    return fused_epilogue(x1, mask_tm, num_feats, params)          # (B, 50)


# --------------------------------------------------------------------------
# Deterministic parameter initialization
# --------------------------------------------------------------------------
def init_params(key, *, vocab_size, char_vocab_size, word_embed_size,
                char_embed_size, pos_embed_size, pos_dim, encoder_size,
                dim_num_feat):
    keys = iter(jax.random.split(key, 64))

    def nrm(shape, scale=0.1):
        return (scale * jax.random.normal(next(keys), shape)).astype(F32)

    H = encoder_size
    E = word_embed_size + pos_dim + 2 * H

    word_emb = nrm((vocab_size, word_embed_size)).at[0].set(0.0)     # padding_idx=0
    pos_emb = nrm((pos_embed_size, pos_dim)).at[0].set(0.0)
    char_emb = nrm((char_vocab_size, char_embed_size)).at[0].set(0.0)

    char_gru = dict(
        wih_f=nrm((3 * H, char_embed_size)), whh_f=nrm((3 * H, H)),
        bih_f=nrm((3 * H,), 0.01), bhh_f=nrm((3 * H,), 0.01),
        wih_r=nrm((3 * H, char_embed_size)), whh_r=nrm((3 * H, H)),
        bih_r=nrm((3 * H,), 0.01), bhh_r=nrm((3 * H,), 0.01),
    )

    def lstm_bhh():  # forget-gate bias = 1.0
        return jnp.zeros((4 * H,), F32).at[H:2 * H].set(1.0)

    lstm = dict(
        wih_f=nrm((4 * H, E)), whh_f=nrm((4 * H, H)),
        bih_f=jnp.zeros((4 * H,), F32), bhh_f=lstm_bhh(),
        wih_r=nrm((4 * H, E)), whh_r=nrm((4 * H, H)),
        bih_r=jnp.zeros((4 * H,), F32), bhh_r=lstm_bhh(),
    )

    eps = 1e-5
    return dict(
        word_embedding=word_emb,
        pos_embedding=pos_emb,
        char_embedding=char_emb,
        char_gru=char_gru,
        lstm=lstm,
        attn_w=nrm((2 * H, 1)),
        mlp_w=nrm((64, 2 * H)), mlp_b=jnp.zeros((64,), F32),
        mlp2_w=nrm((50, 64 + dim_num_feat)), mlp2_b=jnp.zeros((50,), F32),
        bn1_scale=jnp.full((1, 2 * H), 1.0 / jnp.sqrt(1.0 + eps), F32),
        bn1_shift=jnp.zeros((1, 2 * H), F32),
        bn2_scale=jnp.full((1, 64 + dim_num_feat), 1.0 / jnp.sqrt(1.0 + eps), F32),
        bn2_shift=jnp.zeros((1, 64 + dim_num_feat), F32),
    )


# --------------------------------------------------------------------------
if __name__ == "__main__":
    B, T, C = 2, 8, 5
    vocab_size, char_vocab_size = 50, 40
    word_embed_size, char_embed_size = 32, 24
    pos_embed_size, pos_dim = 20, 8
    encoder_size = 16
    dim_num_feat = 4

    key = jax.random.PRNGKey(0)
    pkey, dkey = jax.random.split(key)
    params = init_params(
        pkey,
        vocab_size=vocab_size, char_vocab_size=char_vocab_size,
        word_embed_size=word_embed_size, char_embed_size=char_embed_size,
        pos_embed_size=pos_embed_size, pos_dim=pos_dim,
        encoder_size=encoder_size, dim_num_feat=dim_num_feat,
    )

    k1, k2, k3, k4 = jax.random.split(dkey, 4)
    length = jnp.array([T, T - 2], dtype=jnp.int32)
    mask_X = (jnp.arange(T)[None, :] < length[:, None]).astype(F32)

    X = jax.random.randint(k1, (B, T), 1, vocab_size).astype(jnp.int32)
    X = jnp.where(mask_X > 0, X, 0)
    pos_tags = jax.random.randint(k2, (B, T), 1, pos_embed_size).astype(jnp.int32)
    pos_tags = jnp.where(mask_X > 0, pos_tags, 0)
    num_feats = jax.random.normal(k3, (B, dim_num_feat)).astype(F32)

    char_ids = jax.random.randint(k4, (B, T, C), 1, char_vocab_size).astype(jnp.int32)
    char_lens = jnp.full((B, T), C, dtype=jnp.int32).at[0, 0].set(3)
    char_ids = jnp.where(jnp.arange(C)[None, None, :] < char_lens[:, :, None],
                         char_ids, 0)

    fwd = jax.jit(spo_forward)
    out = fwd(params, X, pos_tags, mask_X, length, num_feats, char_ids, char_lens)
    out = jax.block_until_ready(out)
    assert out.shape == (B, 50) and out.dtype == F32
    assert bool(jnp.all(jnp.isfinite(out)))
    print("KERNEL_OK")
</pallas_src>

<mosaic_0001>
module attributes {stable_mosaic.version = 11 : i64} {
  func.func @_bigru_kernel(%arg0: i32, %arg1: memref<5x8x96xf32, #tpu.memory_space<vmem>>, %arg2: memref<32x96xbf16, #tpu.memory_space<vmem>>, %arg3: memref<1x96xf32, #tpu.memory_space<vmem>>, %arg4: memref<8x1xf32, #tpu.memory_space<vmem>>, %arg5: memref<8x32xf32, #tpu.memory_space<vmem>>, %arg6: memref<8x32xf32, #tpu.memory_space<vmem>>) attributes {dimension_semantics = [#tpu.dimension_semantics<parallel>], iteration_bounds = array<i64: 2>, scalar_prefetch = 0 : i64, scratch_operands = 1 : i64, tpu.core_type = #tpu.core_type<tc>, window_params = [{transform_indices = @transform_0, window_bounds = array<i64: 5, 8, 96>}, {pipeline_mode = #tpu.pipeline_mode<synchronous>, transform_indices = @transform_1, window_bounds = array<i64: 32, 96>}, {pipeline_mode = #tpu.pipeline_mode<synchronous>, transform_indices = @transform_2, window_bounds = array<i64: 1, 96>}, {transform_indices = @transform_3, window_bounds = array<i64: 8, 1>}, {transform_indices = @transform_4, window_bounds = array<i64: 8, 32>}]} {
    %cst = arith.constant 0.000000e+00 : f32
    %0 = vector.broadcast %cst : f32 to vector<8x32xf32>
    %c0 = arith.constant 0 : index
    %c0_0 = arith.constant 0 : index
    %1 = vector.load %arg6[%c0, %c0_0] : memref<8x32xf32, #tpu.memory_space<vmem>>, vector<8x32xf32>
    tpu.vector_store %arg6[%c0, %c0_0], %0 {strides = array<i32>} : memref<8x32xf32, #tpu.memory_space<vmem>>, vector<8x32xf32>,
    %c0_1 = arith.constant 0 : index
    %c0_2 = arith.constant 0 : index
    %2 = vector.load %arg2[%c0_1, %c0_2] : memref<32x96xbf16, #tpu.memory_space<vmem>>, vector<32x96xbf16>
    %c0_3 = arith.constant 0 : index
    %c0_4 = arith.constant 0 : index
    %3 = vector.load %arg3[%c0_3, %c0_4] : memref<1x96xf32, #tpu.memory_space<vmem>>, vector<1x96xf32>
    %4 = tpu.iota {dimensions = array<i32: 1>} : vector<8x32xi32>
    %c16_i32 = arith.constant 16 : i32
    %5 = vector.broadcast %c16_i32 : i32 to vector<8x32xi32>
    %6 = arith.cmpi slt, %4, %5 : vector<8x32xi32>
    %c0_5 = arith.constant 0 : index
    %c0_6 = arith.constant 0 : index
    %7 = vector.load %arg4[%c0_5, %c0_6] : memref<8x1xf32, #tpu.memory_space<vmem>>, vector<8x1xf32>
    %8 = vector.shape_cast %7 : vector<8x1xf32> to vector<8x1xf32>
    %9 = vector.broadcast %8 : vector<8x1xf32> to vector<8x32xf32>
    %cst_7 = arith.constant 1.000000e+00 : f32
    %cst_8 = arith.constant -1.000000e+00 : f32
    %10 = vector.broadcast %cst_7 : f32 to vector<8x32xf32>
    %11 = vector.broadcast %cst_8 : f32 to vector<8x32xf32>
    %12 = arith.select %6, %10, %11 : vector<8x32xi1>, vector<8x32xf32>
    %cst_9 = arith.constant 4.000000e+00 : f32
    %13 = vector.broadcast %cst_9 : f32 to vector<8x32xf32>
    %14 = arith.subf %9, %13 : vector<8x32xf32>
    %15 = arith.select %6, %9, %14 : vector<8x32xi1>, vector<8x32xf32>
    %c0_i32 = arith.constant 0 : i32
    %c0_10 = arith.constant 0 : index
    %c0_11 = arith.constant 0 : index
    %16 = vector.load %arg6[%c0_10, %c0_11] : memref<8x32xf32, #tpu.memory_space<vmem>>, vector<8x32xf32>
    %17 = arith.index_cast %c0_i32 : i32 to index
    %c0_12 = arith.constant 0 : index
    %c0_13 = arith.constant 0 : index
    %18 = vector.load %arg1[%17, %c0_12, %c0_13] : memref<5x8x96xf32, #tpu.memory_space<vmem>>, vector<1x8x96xf32>
    %19 = vector.shape_cast %18 : vector<1x8x96xf32> to vector<8x96xf32>
    %20 = arith.truncf %16 : vector<8x32xf32> to vector<8x32xbf16>
    %cst_14 = arith.constant dense<0.000000e+00> : vector<8x96xf32>
    %21 = tpu.matmul %20, %2, %cst_14 {dimension_numbers = #tpu.dot_dimension_numbers<[1], [0], [0], [1], [0, 0, 1, 1], [], []>} : vector<8x32xbf16>, vector<32x96xbf16>, vector<8x96xf32> -> vector<8x96xf32>
    %22 = vector.broadcast %3 : vector<1x96xf32> to vector<8x96xf32>
    %23 = arith.addf %21, %22 : vector<8x96xf32>
    %24 = arith.addf %19, %23 : vector<8x96xf32>
    %25 = arith.negf %24 : vector<8x96xf32>
    %26 = math.exp %25 : vector<8x96xf32>
    %cst_15 = arith.constant 1.000000e+00 : f32
    %27 = vector.broadcast %cst_15 : f32 to vector<8x96xf32>
    %28 = arith.addf %27, %26 : vector<8x96xf32>
    %29 = arith.divf %27, %28 : vector<8x96xf32>
    %30 = vector.extract_strided_slice %29 {offsets = [0, 0], sizes = [8, 32], strides = [1, 1]} : vector<8x96xf32> to vector<8x32xf32>
    %31 = vector.extract_strided_slice %29 {offsets = [0, 32], sizes = [8, 32], strides = [1, 1]} : vector<8x96xf32> to vector<8x32xf32>
    %32 = vector.extract_strided_slice %19 {offsets = [0, 64], sizes = [8, 32], strides = [1, 1]} : vector<8x96xf32> to vector<8x32xf32>
    %33 = vector.extract_strided_slice %23 {offsets = [0, 64], sizes = [8, 32], strides = [1, 1]} : vector<8x96xf32> to vector<8x32xf32>
    %34 = arith.mulf %30, %33 : vector<8x32xf32>
    %35 = arith.addf %32, %34 : vector<8x32xf32>
    %36 = math.tanh %35 : vector<8x32xf32>
    %cst_16 = arith.constant 1.000000e+00 : f32
    %37 = vector.broadcast %cst_16 : f32 to vector<8x32xf32>
    %38 = arith.subf %37, %31 : vector<8x32xf32>
    %39 = arith.mulf %38, %36 : vector<8x32xf32>
    %40 = arith.mulf %31, %16 : vector<8x32xf32>
    %41 = arith.addf %39, %40 : vector<8x32xf32>
    %42 = arith.sitofp %c0_i32 : i32 to f32
    %43 = vector.broadcast %42 : f32 to vector<8x32xf32>
    %44 = arith.mulf %12, %43 : vector<8x32xf32>
    %45 = arith.cmpf olt, %44, %15 : vector<8x32xf32>
    %46 = arith.select %45, %41, %16 : vector<8x32xi1>, vector<8x32xf32>
    %c0_17 = arith.constant 0 : index
    %c0_18 = arith.constant 0 : index
    %47 = vector.load %arg6[%c0_17, %c0_18] : memref<8x32xf32, #tpu.memory_space<vmem>>, vector<8x32xf32>
    tpu.vector_store %arg6[%c0_17, %c0_18], %46 {strides = array<i32>} : memref<8x32xf32, #tpu.memory_space<vmem>>, vector<8x32xf32>,
    %cst_19 = arith.constant 0.000000e+00 : f32
    %48 = vector.broadcast %cst_19 : f32 to vector<8x32xf32>
    %49 = arith.select %45, %41, %48 : vector<8x32xi1>, vector<8x32xf32>
    %c4_i32 = arith.constant 4 : i32
    %50 = arith.cmpi eq, %c0_i32, %c4_i32 : i32
    %51 = arith.extui %50 : i1 to i32
    %c0_i32_20 = arith.constant 0 : i32
    %52 = arith.cmpi ne, %51, %c0_i32_20 : i32
    scf.if %52 {
      %216 = vector.extract_strided_slice %49 {offsets = [0, 0], sizes = [8, 16], strides = [1, 1]} : vector<8x32xf32> to vector<8x16xf32>
      %c0_80 = arith.constant 0 : index
      %c0_81 = arith.constant 0 : index
      %217 = vector.load %arg5[%c0_80, %c0_81] : memref<8x32xf32, #tpu.memory_space<vmem>>, vector<8x16xf32>
      tpu.vector_store %arg5[%c0_80, %c0_81], %216 {strides = array<i32>} : memref<8x32xf32, #tpu.memory_space<vmem>>, vector<8x16xf32>,
    } else {
    }
    %c0_i32_21 = arith.constant 0 : i32
    %53 = arith.cmpi eq, %c0_i32, %c0_i32_21 : i32
    %54 = arith.extui %53 : i1 to i32
    %c0_i32_22 = arith.constant 0 : i32
    %55 = arith.cmpi ne, %54, %c0_i32_22 : i32
    scf.if %55 {
      %216 = vector.extract_strided_slice %49 {offsets = [0, 16], sizes = [8, 16], strides = [1, 1]} : vector<8x32xf32> to vector<8x16xf32>
      %c0_80 = arith.constant 0 : index
      %c16 = arith.constant 16 : index
      %217 = vector.load %arg5[%c0_80, %c16] : memref<8x32xf32, #tpu.memory_space<vmem>>, vector<8x16xf32>
      tpu.vector_store %arg5[%c0_80, %c16], %216 {strides = array<i32>} : memref<8x32xf32, #tpu.memory_space<vmem>>, vector<8x16xf32>,
    } else {
    }
    %c1_i32 = arith.constant 1 : i32
    %c0_23 = arith.constant 0 : index
    %c0_24 = arith.constant 0 : index
    %56 = vector.load %arg6[%c0_23, %c0_24] : memref<8x32xf32, #tpu.memory_space<vmem>>, vector<8x32xf32>
    %57 = arith.index_cast %c1_i32 : i32 to index
    %c0_25 = arith.constant 0 : index
    %c0_26 = arith.constant 0 : index
    %58 = vector.load %arg1[%57, %c0_25, %c0_26] : memref<5x8x96xf32, #tpu.memory_space<vmem>>, vector<1x8x96xf32>
    %59 = vector.shape_cast %58 : vector<1x8x96xf32> to vector<8x96xf32>
    %60 = arith.truncf %56 : vector<8x32xf32> to vector<8x32xbf16>
    %cst_27 = arith.constant dense<0.000000e+00> : vector<8x96xf32>
    %61 = tpu.matmul %60, %2, %cst_27 {dimension_numbers = #tpu.dot_dimension_numbers<[1], [0], [0], [1], [0, 0, 1, 1], [], []>} : vector<8x32xbf16>, vector<32x96xbf16>, vector<8x96xf32> -> vector<8x96xf32>
    %62 = vector.broadcast %3 : vector<1x96xf32> to vector<8x96xf32>
    %63 = arith.addf %61, %62 : vector<8x96xf32>
    %64 = arith.addf %59, %63 : vector<8x96xf32>
    %65 = arith.negf %64 : vector<8x96xf32>
    %66 = math.exp %65 : vector<8x96xf32>
    %cst_28 = arith.constant 1.000000e+00 : f32
    %67 = vector.broadcast %cst_28 : f32 to vector<8x96xf32>
    %68 = arith.addf %67, %66 : vector<8x96xf32>
    %69 = arith.divf %67, %68 : vector<8x96xf32>
    %70 = vector.extract_strided_slice %69 {offsets = [0, 0], sizes = [8, 32], strides = [1, 1]} : vector<8x96xf32> to vector<8x32xf32>
    %71 = vector.extract_strided_slice %69 {offsets = [0, 32], sizes = [8, 32], strides = [1, 1]} : vector<8x96xf32> to vector<8x32xf32>
    %72 = vector.extract_strided_slice %59 {offsets = [0, 64], sizes = [8, 32], strides = [1, 1]} : vector<8x96xf32> to vector<8x32xf32>
    %73 = vector.extract_strided_slice %63 {offsets = [0, 64], sizes = [8, 32], strides = [1, 1]} : vector<8x96xf32> to vector<8x32xf32>
    %74 = arith.mulf %70, %73 : vector<8x32xf32>
    %75 = arith.addf %72, %74 : vector<8x32xf32>
    %76 = math.tanh %75 : vector<8x32xf32>
    %cst_29 = arith.constant 1.000000e+00 : f32
    %77 = vector.broadcast %cst_29 : f32 to vector<8x32xf32>
    %78 = arith.subf %77, %71 : vector<8x32xf32>
    %79 = arith.mulf %78, %76 : vector<8x32xf32>
    %80 = arith.mulf %71, %56 : vector<8x32xf32>
    %81 = arith.addf %79, %80 : vector<8x32xf32>
    %82 = arith.sitofp %c1_i32 : i32 to f32
    %83 = vector.broadcast %82 : f32 to vector<8x32xf32>
    %84 = arith.mulf %12, %83 : vector<8x32xf32>
    %85 = arith.cmpf olt, %84, %15 : vector<8x32xf32>
    %86 = arith.select %85, %81, %56 : vector<8x32xi1>, vector<8x32xf32>
    %c0_30 = arith.constant 0 : index
    %c0_31 = arith.constant 0 : index
    %87 = vector.load %arg6[%c0_30, %c0_31] : memref<8x32xf32, #tpu.memory_space<vmem>>, vector<8x32xf32>
    tpu.vector_store %arg6[%c0_30, %c0_31], %86 {strides = array<i32>} : memref<8x32xf32, #tpu.memory_space<vmem>>, vector<8x32xf32>,
    %cst_32 = arith.constant 0.000000e+00 : f32
    %88 = vector.broadcast %cst_32 : f32 to vector<8x32xf32>
    %89 = arith.select %85, %81, %88 : vector<8x32xi1>, vector<8x32xf32>
    %c4_i32_33 = arith.constant 4 : i32
    %90 = arith.cmpi eq, %c1_i32, %c4_i32_33 : i32
    %91 = arith.extui %90 : i1 to i32
    %c0_i32_34 = arith.constant 0 : i32
    %92 = arith.cmpi ne, %91, %c0_i32_34 : i32
    scf.if %92 {
      %216 = vector.extract_strided_slice %89 {offsets = [0, 0], sizes = [8, 16], strides = [1, 1]} : vector<8x32xf32> to vector<8x16xf32>
      %c0_80 = arith.constant 0 : index
      %c0_81 = arith.constant 0 : index
      %217 = vector.load %arg5[%c0_80, %c0_81] : memref<8x32xf32, #tpu.memory_space<vmem>>, vector<8x16xf32>
      tpu.vector_store %arg5[%c0_80, %c0_81], %216 {strides = array<i32>} : memref<8x32xf32, #tpu.memory_space<vmem>>, vector<8x16xf32>,
    } else {
    }
    %c0_i32_35 = arith.constant 0 : i32
    %93 = arith.cmpi eq, %c1_i32, %c0_i32_35 : i32
    %94 = arith.extui %93 : i1 to i32
    %c0_i32_36 = arith.constant 0 : i32
    %95 = arith.cmpi ne, %94, %c0_i32_36 : i32
    scf.if %95 {
      %216 = vector.extract_strided_slice %89 {offsets = [0, 16], sizes = [8, 16], strides = [1, 1]} : vector<8x32xf32> to vector<8x16xf32>
      %c0_80 = arith.constant 0 : index
      %c16 = arith.constant 16 : index
      %217 = vector.load %arg5[%c0_80, %c16] : memref<8x32xf32, #tpu.memory_space<vmem>>, vector<8x16xf32>
      tpu.vector_store %arg5[%c0_80, %c16], %216 {strides = array<i32>} : memref<8x32xf32, #tpu.memory_space<vmem>>, vector<8x16xf32>,
    } else {
    }
    %c2_i32 = arith.constant 2 : i32
    %c0_37 = arith.constant 0 : index
    %c0_38 = arith.constant 0 : index
    %96 = vector.load %arg6[%c0_37, %c0_38] : memref<8x32xf32, #tpu.memory_space<vmem>>, vector<8x32xf32>
    %97 = arith.index_cast %c2_i32 : i32 to index
    %c0_39 = arith.constant 0 : index
    %c0_40 = arith.constant 0 : index
    %98 = vector.load %arg1[%97, %c0_39, %c0_40] : memref<5x8x96xf32, #tpu.memory_space<vmem>>, vector<1x8x96xf32>
    %99 = vector.shape_cast %98 : vector<1x8x96xf32> to vector<8x96xf32>
    %100 = arith.truncf %96 : vector<8x32xf32> to vector<8x32xbf16>
    %cst_41 = arith.constant dense<0.000000e+00> : vector<8x96xf32>
    %101 = tpu.matmul %100, %2, %cst_41 {dimension_numbers = #tpu.dot_dimension_numbers<[1], [0], [0], [1], [0, 0, 1, 1], [], []>} : vector<8x32xbf16>, vector<32x96xbf16>, vector<8x96xf32> -> vector<8x96xf32>
    %102 = vector.broadcast %3 : vector<1x96xf32> to vector<8x96xf32>
    %103 = arith.addf %101, %102 : vector<8x96xf32>
    %104 = arith.addf %99, %103 : vector<8x96xf32>
    %105 = arith.negf %104 : vector<8x96xf32>
    %106 = math.exp %105 : vector<8x96xf32>
    %cst_42 = arith.constant 1.000000e+00 : f32
    %107 = vector.broadcast %cst_42 : f32 to vector<8x96xf32>
    %108 = arith.addf %107, %106 : vector<8x96xf32>
    %109 = arith.divf %107, %108 : vector<8x96xf32>
    %110 = vector.extract_strided_slice %109 {offsets = [0, 0], sizes = [8, 32], strides = [1, 1]} : vector<8x96xf32> to vector<8x32xf32>
    %111 = vector.extract_strided_slice %109 {offsets = [0, 32], sizes = [8, 32], strides = [1, 1]} : vector<8x96xf32> to vector<8x32xf32>
    %112 = vector.extract_strided_slice %99 {offsets = [0, 64], sizes = [8, 32], strides = [1, 1]} : vector<8x96xf32> to vector<8x32xf32>
    %113 = vector.extract_strided_slice %103 {offsets = [0, 64], sizes = [8, 32], strides = [1, 1]} : vector<8x96xf32> to vector<8x32xf32>
    %114 = arith.mulf %110, %113 : vector<8x32xf32>
    %115 = arith.addf %112, %114 : vector<8x32xf32>
    %116 = math.tanh %115 : vector<8x32xf32>
    %cst_43 = arith.constant 1.000000e+00 : f32
    %117 = vector.broadcast %cst_43 : f32 to vector<8x32xf32>
    %118 = arith.subf %117, %111 : vector<8x32xf32>
    %119 = arith.mulf %118, %116 : vector<8x32xf32>
    %120 = arith.mulf %111, %96 : vector<8x32xf32>
    %121 = arith.addf %119, %120 : vector<8x32xf32>
    %122 = arith.sitofp %c2_i32 : i32 to f32
    %123 = vector.broadcast %122 : f32 to vector<8x32xf32>
    %124 = arith.mulf %12, %123 : vector<8x32xf32>
    %125 = arith.cmpf olt, %124, %15 : vector<8x32xf32>
    %126 = arith.select %125, %121, %96 : vector<8x32xi1>, vector<8x32xf32>
    %c0_44 = arith.constant 0 : index
    %c0_45 = arith.constant 0 : index
    %127 = vector.load %arg6[%c0_44, %c0_45] : memref<8x32xf32, #tpu.memory_space<vmem>>, vector<8x32xf32>
    tpu.vector_store %arg6[%c0_44, %c0_45], %126 {strides = array<i32>} : memref<8x32xf32, #tpu.memory_space<vmem>>, vector<8x32xf32>,
    %cst_46 = arith.constant 0.000000e+00 : f32
    %128 = vector.broadcast %cst_46 : f32 to vector<8x32xf32>
    %129 = arith.select %125, %121, %128 : vector<8x32xi1>, vector<8x32xf32>
    %c4_i32_47 = arith.constant 4 : i32
    %130 = arith.cmpi eq, %c2_i32, %c4_i32_47 : i32
    %131 = arith.extui %130 : i1 to i32
    %c0_i32_48 = arith.constant 0 : i32
    %132 = arith.cmpi ne, %131, %c0_i32_48 : i32
    scf.if %132 {
      %216 = vector.extract_strided_slice %129 {offsets = [0, 0], sizes = [8, 16], strides = [1, 1]} : vector<8x32xf32> to vector<8x16xf32>
      %c0_80 = arith.constant 0 : index
      %c0_81 = arith.constant 0 : index
      %217 = vector.load %arg5[%c0_80, %c0_81] : memref<8x32xf32, #tpu.memory_space<vmem>>, vector<8x16xf32>
      tpu.vector_store %arg5[%c0_80, %c0_81], %216 {strides = array<i32>} : memref<8x32xf32, #tpu.memory_space<vmem>>, vector<8x16xf32>,
    } else {
    }
    %c0_i32_49 = arith.constant 0 : i32
    %133 = arith.cmpi eq, %c2_i32, %c0_i32_49 : i32
    %134 = arith.extui %133 : i1 to i32
    %c0_i32_50 = arith.constant 0 : i32
    %135 = arith.cmpi ne, %134, %c0_i32_50 : i32
    scf.if %135 {
      %216 = vector.extract_strided_slice %129 {offsets = [0, 16], sizes = [8, 16], strides = [1, 1]} : vector<8x32xf32> to vector<8x16xf32>
      %c0_80 = arith.constant 0 : index
      %c16 = arith.constant 16 : index
      %217 = vector.load %arg5[%c0_80, %c16] : memref<8x32xf32, #tpu.memory_space<vmem>>, vector<8x16xf32>
      tpu.vector_store %arg5[%c0_80, %c16], %216 {strides = array<i32>} : memref<8x32xf32, #tpu.memory_space<vmem>>, vector<8x16xf32>,
    } else {
    }
    %c3_i32 = arith.constant 3 : i32
    %c0_51 = arith.constant 0 : index
    %c0_52 = arith.constant 0 : index
    %136 = vector.load %arg6[%c0_51, %c0_52] : memref<8x32xf32, #tpu.memory_space<vmem>>, vector<8x32xf32>
    %137 = arith.index_cast %c3_i32 : i32 to index
    %c0_53 = arith.constant 0 : index
    %c0_54 = arith.constant 0 : index
    %138 = vector.load %arg1[%137, %c0_53, %c0_54] : memref<5x8x96xf32, #tpu.memory_space<vmem>>, vector<1x8x96xf32>
    %139 = vector.shape_cast %138 : vector<1x8x96xf32> to vector<8x96xf32>
    %140 = arith.truncf %136 : vector<8x32xf32> to vector<8x32xbf16>
    %cst_55 = arith.constant dense<0.000000e+00> : vector<8x96xf32>
    %141 = tpu.matmul %140, %2, %cst_55 {dimension_numbers = #tpu.dot_dimension_numbers<[1], [0], [0], [1], [0, 0, 1, 1], [], []>} : vector<8x32xbf16>, vector<32x96xbf16>, vector<8x96xf32> -> vector<8x96xf32>
    %142 = vector.broadcast %3 : vector<1x96xf32> to vector<8x96xf32>
    %143 = arith.addf %141, %142 : vector<8x96xf32>
    %144 = arith.addf %139, %143 : vector<8x96xf32>
    %145 = arith.negf %144 : vector<8x96xf32>
    %146 = math.exp %145 : vector<8x96xf32>
    %cst_56 = arith.constant 1.000000e+00 : f32
    %147 = vector.broadcast %cst_56 : f32 to vector<8x96xf32>
    %148 = arith.addf %147, %146 : vector<8x96xf32>
    %149 = arith.divf %147, %148 : vector<8x96xf32>
    %150 = vector.extract_strided_slice %149 {offsets = [0, 0], sizes = [8, 32], strides = [1, 1]} : vector<8x96xf32> to vector<8x32xf32>
    %151 = vector.extract_strided_slice %149 {offsets = [0, 32], sizes = [8, 32], strides = [1, 1]} : vector<8x96xf32> to vector<8x32xf32>
    %152 = vector.extract_strided_slice %139 {offsets = [0, 64], sizes = [8, 32], strides = [1, 1]} : vector<8x96xf32> to vector<8x32xf32>
    %153 = vector.extract_strided_slice %143 {offsets = [0, 64], sizes = [8, 32], strides = [1, 1]} : vector<8x96xf32> to vector<8x32xf32>
    %154 = arith.mulf %150, %153 : vector<8x32xf32>
    %155 = arith.addf %152, %154 : vector<8x32xf32>
    %156 = math.tanh %155 : vector<8x32xf32>
    %cst_57 = arith.constant 1.000000e+00 : f32
    %157 = vector.broadcast %cst_57 : f32 to vector<8x32xf32>
    %158 = arith.subf %157, %151 : vector<8x32xf32>
    %159 = arith.mulf %158, %156 : vector<8x32xf32>
    %160 = arith.mulf %151, %136 : vector<8x32xf32>
    %161 = arith.addf %159, %160 : vector<8x32xf32>
    %162 = arith.sitofp %c3_i32 : i32 to f32
    %163 = vector.broadcast %162 : f32 to vector<8x32xf32>
    %164 = arith.mulf %12, %163 : vector<8x32xf32>
    %165 = arith.cmpf olt, %164, %15 : vector<8x32xf32>
    %166 = arith.select %165, %161, %136 : vector<8x32xi1>, vector<8x32xf32>
    %c0_58 = arith.constant 0 : index
    %c0_59 = arith.constant 0 : index
    %167 = vector.load %arg6[%c0_58, %c0_59] : memref<8x32xf32, #tpu.memory_space<vmem>>, vector<8x32xf32>
    tpu.vector_store %arg6[%c0_58, %c0_59], %166 {strides = array<i32>} : memref<8x32xf32, #tpu.memory_space<vmem>>, vector<8x32xf32>,
    %cst_60 = arith.constant 0.000000e+00 : f32
    %168 = vector.broadcast %cst_60 : f32 to vector<8x32xf32>
    %169 = arith.select %165, %161, %168 : vector<8x32xi1>, vector<8x32xf32>
    %c4_i32_61 = arith.constant 4 : i32
    %170 = arith.cmpi eq, %c3_i32, %c4_i32_61 : i32
    %171 = arith.extui %170 : i1 to i32
    %c0_i32_62 = arith.constant 0 : i32
    %172 = arith.cmpi ne, %171, %c0_i32_62 : i32
    scf.if %172 {
      %216 = vector.extract_strided_slice %169 {offsets = [0, 0], sizes = [8, 16], strides = [1, 1]} : vector<8x32xf32> to vector<8x16xf32>
      %c0_80 = arith.constant 0 : index
      %c0_81 = arith.constant 0 : index
      %217 = vector.load %arg5[%c0_80, %c0_81] : memref<8x32xf32, #tpu.memory_space<vmem>>, vector<8x16xf32>
      tpu.vector_store %arg5[%c0_80, %c0_81], %216 {strides = array<i32>} : memref<8x32xf32, #tpu.memory_space<vmem>>, vector<8x16xf32>,
    } else {
    }
    %c0_i32_63 = arith.constant 0 : i32
    %173 = arith.cmpi eq, %c3_i32, %c0_i32_63 : i32
    %174 = arith.extui %173 : i1 to i32
    %c0_i32_64 = arith.constant 0 : i32
    %175 = arith.cmpi ne, %174, %c0_i32_64 : i32
    scf.if %175 {
      %216 = vector.extract_strided_slice %169 {offsets = [0, 16], sizes = [8, 16], strides = [1, 1]} : vector<8x32xf32> to vector<8x16xf32>
      %c0_80 = arith.constant 0 : index
      %c16 = arith.constant 16 : index
      %217 = vector.load %arg5[%c0_80, %c16] : memref<8x32xf32, #tpu.memory_space<vmem>>, vector<8x16xf32>
      tpu.vector_store %arg5[%c0_80, %c16], %216 {strides = array<i32>} : memref<8x32xf32, #tpu.memory_space<vmem>>, vector<8x16xf32>,
    } else {
    }
    %c4_i32_65 = arith.constant 4 : i32
    %c0_66 = arith.constant 0 : index
    %c0_67 = arith.constant 0 : index
    %176 = vector.load %arg6[%c0_66, %c0_67] : memref<8x32xf32, #tpu.memory_space<vmem>>, vector<8x32xf32>
    %177 = arith.index_cast %c4_i32_65 : i32 to index
    %c0_68 = arith.constant 0 : index
    %c0_69 = arith.constant 0 : index
    %178 = vector.load %arg1[%177, %c0_68, %c0_69] : memref<5x8x96xf32, #tpu.memory_space<vmem>>, vector<1x8x96xf32>
    %179 = vector.shape_cast %178 : vector<1x8x96xf32> to vector<8x96xf32>
    %180 = arith.truncf %176 : vector<8x32xf32> to vector<8x32xbf16>
    %cst_70 = arith.constant dense<0.000000e+00> : vector<8x96xf32>
    %181 = tpu.matmul %180, %2, %cst_70 {dimension_numbers = #tpu.dot_dimension_numbers<[1], [0], [0], [1], [0, 0, 1, 1], [], []>} : vector<8x32xbf16>, vector<32x96xbf16>, vector<8x96xf32> -> vector<8x96xf32>
    %182 = vector.broadcast %3 : vector<1x96xf32> to vector<8x96xf32>
    %183 = arith.addf %181, %182 : vector<8x96xf32>
    %184 = arith.addf %179, %183 : vector<8x96xf32>
    %185 = arith.negf %184 : vector<8x96xf32>
    %186 = math.exp %185 : vector<8x96xf32>
    %cst_71 = arith.constant 1.000000e+00 : f32
    %187 = vector.broadcast %cst_71 : f32 to vector<8x96xf32>
    %188 = arith.addf %187, %186 : vector<8x96xf32>
    %189 = arith.divf %187, %188 : vector<8x96xf32>
    %190 = vector.extract_strided_slice %189 {offsets = [0, 0], sizes = [8, 32], strides = [1, 1]} : vector<8x96xf32> to vector<8x32xf32>
    %191 = vector.extract_strided_slice %189 {offsets = [0, 32], sizes = [8, 32], strides = [1, 1]} : vector<8x96xf32> to vector<8x32xf32>
    %192 = vector.extract_strided_slice %179 {offsets = [0, 64], sizes = [8, 32], strides = [1, 1]} : vector<8x96xf32> to vector<8x32xf32>
    %193 = vector.extract_strided_slice %183 {offsets = [0, 64], sizes = [8, 32], strides = [1, 1]} : vector<8x96xf32> to vector<8x32xf32>
    %194 = arith.mulf %190, %193 : vector<8x32xf32>
    %195 = arith.addf %192, %194 : vector<8x32xf32>
    %196 = math.tanh %195 : vector<8x32xf32>
    %cst_72 = arith.constant 1.000000e+00 : f32
    %197 = vector.broadcast %cst_72 : f32 to vector<8x32xf32>
    %198 = arith.subf %197, %191 : vector<8x32xf32>
    %199 = arith.mulf %198, %196 : vector<8x32xf32>
    %200 = arith.mulf %191, %176 : vector<8x32xf32>
    %201 = arith.addf %199, %200 : vector<8x32xf32>
    %202 = arith.sitofp %c4_i32_65 : i32 to f32
    %203 = vector.broadcast %202 : f32 to vector<8x32xf32>
    %204 = arith.mulf %12, %203 : vector<8x32xf32>
    %205 = arith.cmpf olt, %204, %15 : vector<8x32xf32>
    %206 = arith.select %205, %201, %176 : vector<8x32xi1>, vector<8x32xf32>
    %c0_73 = arith.constant 0 : index
    %c0_74 = arith.constant 0 : index
    %207 = vector.load %arg6[%c0_73, %c0_74] : memref<8x32xf32, #tpu.memory_space<vmem>>, vector<8x32xf32>
    tpu.vector_store %arg6[%c0_73, %c0_74], %206 {strides = array<i32>} : memref<8x32xf32, #tpu.memory_space<vmem>>, vector<8x32xf32>,
    %cst_75 = arith.constant 0.000000e+00 : f32
    %208 = vector.broadcast %cst_75 : f32 to vector<8x32xf32>
    %209 = arith.select %205, %201, %208 : vector<8x32xi1>, vector<8x32xf32>
    %c4_i32_76 = arith.constant 4 : i32
    %210 = arith.cmpi eq, %c4_i32_65, %c4_i32_76 : i32
    %211 = arith.extui %210 : i1 to i32
    %c0_i32_77 = arith.constant 0 : i32
    %212 = arith.cmpi ne, %211, %c0_i32_77 : i32
    scf.if %212 {
      %216 = vector.extract_strided_slice %209 {offsets = [0, 0], sizes = [8, 16], strides = [1, 1]} : vector<8x32xf32> to vector<8x16xf32>
      %c0_80 = arith.constant 0 : index
      %c0_81 = arith.constant 0 : index
      %217 = vector.load %arg5[%c0_80, %c0_81] : memref<8x32xf32, #tpu.memory_space<vmem>>, vector<8x16xf32>
      tpu.vector_store %arg5[%c0_80, %c0_81], %216 {strides = array<i32>} : memref<8x32xf32, #tpu.memory_space<vmem>>, vector<8x16xf32>,
    } else {
    }
    %c0_i32_78 = arith.constant 0 : i32
    %213 = arith.cmpi eq, %c4_i32_65, %c0_i32_78 : i32
    %214 = arith.extui %213 : i1 to i32
    %c0_i32_79 = arith.constant 0 : i32
    %215 = arith.cmpi ne, %214, %c0_i32_79 : i32
    scf.if %215 {
      %216 = vector.extract_strided_slice %209 {offsets = [0, 16], sizes = [8, 16], strides = [1, 1]} : vector<8x32xf32> to vector<8x16xf32>
      %c0_80 = arith.constant 0 : index
      %c16 = arith.constant 16 : index
      %217 = vector.load %arg5[%c0_80, %c16] : memref<8x32xf32, #tpu.memory_space<vmem>>, vector<8x16xf32>
      tpu.vector_store %arg5[%c0_80, %c16], %216 {strides = array<i32>} : memref<8x32xf32, #tpu.memory_space<vmem>>, vector<8x16xf32>,
    } else {
    }
    %c5_i32 = arith.constant 5 : i32
    return
  }
  func.func @transform_0(%arg0: i32) -> (i32, i32, i32) {
    %c0_i32 = arith.constant 0 : i32
    %c0_i32_0 = arith.constant 0 : i32
    %c0_i32_1 = arith.constant 0 : i32
    return %c0_i32, %arg0, %c0_i32_0 : i32, i32, i32
  }
  func.func @transform_1(%arg0: i32) -> (i32, i32) {
    %c0_i32 = arith.constant 0 : i32
    %c0_i32_0 = arith.constant 0 : i32
    %c0_i32_1 = arith.constant 0 : i32
    return %c0_i32, %c0_i32_0 : i32, i32
  }
  func.func @transform_2(%arg0: i32) -> (i32, i32) {
    %c0_i32 = arith.constant 0 : i32
    %c0_i32_0 = arith.constant 0 : i32
    %c0_i32_1 = arith.constant 0 : i32
    return %c0_i32, %c0_i32_0 : i32, i32
  }
  func.func @transform_3(%arg0: i32) -> (i32, i32) {
    %c0_i32 = arith.constant 0 : i32
    %c0_i32_0 = arith.constant 0 : i32
    return %arg0, %c0_i32 : i32, i32
  }
  func.func @transform_4(%arg0: i32) -> (i32, i32) {
    %c0_i32 = arith.constant 0 : i32
    %c0_i32_0 = arith.constant 0 : i32
    return %arg0, %c0_i32 : i32, i32
  }
}

module attributes {stable_mosaic.version = 11 : i64} {
  func.func @_bilstm_kernel(%arg0: i32, %arg1: memref<8x2x128xf32, #tpu.memory_space<vmem>>, %arg2: memref<32x128xbf16, #tpu.memory_space<vmem>>, %arg3: memref<2x1xf32, #tpu.memory_space<vmem>>, %arg4: memref<8x2x32xf32, #tpu.memory_space<vmem>>, %arg5: memref<2x32xf32, #tpu.memory_space<vmem>>, %arg6: memref<2x32xf32, #tpu.memory_space<vmem>>) attributes {dimension_semantics = [#tpu.dimension_semantics<parallel>], iteration_bounds = array<i64: 1>, scalar_prefetch = 0 : i64, scratch_operands = 2 : i64, tpu.core_type = #tpu.core_type<tc>, window_params = [{transform_indices = @transform_0, window_bounds = array<i64: 8, 2, 128>}, {pipeline_mode = #tpu.pipeline_mode<synchronous>, transform_indices = @transform_1, window_bounds = array<i64: 32, 128>}, {transform_indices = @transform_2, window_bounds = array<i64: 2, 1>}, {transform_indices = @transform_3, window_bounds = array<i64: 8, 2, 32>}]} {
    %cst = arith.constant 0.000000e+00 : f32
    %0 = vector.broadcast %cst : f32 to vector<2x32xf32>
    %c0 = arith.constant 0 : index
    %c0_0 = arith.constant 0 : index
    %1 = vector.load %arg5[%c0, %c0_0] : memref<2x32xf32, #tpu.memory_space<vmem>>, vector<2x32xf32>
    tpu.vector_store %arg5[%c0, %c0_0], %0 {strides = array<i32>} : memref<2x32xf32, #tpu.memory_space<vmem>>, vector<2x32xf32>,
    %cst_1 = arith.constant 0.000000e+00 : f32
    %2 = vector.broadcast %cst_1 : f32 to vector<2x32xf32>
    %c0_2 = arith.constant 0 : index
    %c0_3 = arith.constant 0 : index
    %3 = vector.load %arg6[%c0_2, %c0_3] : memref<2x32xf32, #tpu.memory_space<vmem>>, vector<2x32xf32>
    tpu.vector_store %arg6[%c0_2, %c0_3], %2 {strides = array<i32>} : memref<2x32xf32, #tpu.memory_space<vmem>>, vector<2x32xf32>,
    %c0_4 = arith.constant 0 : index
    %c0_5 = arith.constant 0 : index
    %4 = vector.load %arg2[%c0_4, %c0_5] : memref<32x128xbf16, #tpu.memory_space<vmem>>, vector<32x128xbf16>
    %5 = tpu.iota {dimensions = array<i32: 1>} : vector<1x128xi32>
    %c96_i32 = arith.constant 96 : i32
    %6 = vector.broadcast %c96_i32 : i32 to vector<1x128xi32>
    %7 = arith.cmpi slt, %5, %6 : vector<1x128xi32>
    %8 = tpu.iota {dimensions = array<i32: 1>} : vector<2x32xi32>
    %c16_i32 = arith.constant 16 : i32
    %9 = vector.broadcast %c16_i32 : i32 to vector<2x32xi32>
    %10 = arith.cmpi slt, %8, %9 : vector<2x32xi32>
    %c0_6 = arith.constant 0 : index
    %c0_7 = arith.constant 0 : index
    %11 = vector.load %arg3[%c0_6, %c0_7] : memref<2x1xf32, #tpu.memory_space<vmem>>, vector<2x1xf32>
    %12 = vector.shape_cast %11 : vector<2x1xf32> to vector<2x1xf32>
    %13 = vector.broadcast %12 : vector<2x1xf32> to vector<2x32xf32>
    %cst_8 = arith.constant 1.000000e+00 : f32
    %cst_9 = arith.constant -1.000000e+00 : f32
    %14 = vector.broadcast %cst_8 : f32 to vector<2x32xf32>
    %15 = vector.broadcast %cst_9 : f32 to vector<2x32xf32>
    %16 = arith.select %10, %14, %15 : vector<2x32xi1>, vector<2x32xf32>
    %cst_10 = arith.constant 7.000000e+00 : f32
    %17 = vector.broadcast %cst_10 : f32 to vector<2x32xf32>
    %18 = arith.subf %13, %17 : vector<2x32xf32>
    %19 = arith.select %10, %13, %18 : vector<2x32xi1>, vector<2x32xf32>
    %c0_i32 = arith.constant 0 : i32
    %c0_11 = arith.constant 0 : index
    %c0_12 = arith.constant 0 : index
    %20 = vector.load %arg5[%c0_11, %c0_12] : memref<2x32xf32, #tpu.memory_space<vmem>>, vector<2x32xf32>
    %c0_13 = arith.constant 0 : index
    %c0_14 = arith.constant 0 : index
    %21 = vector.load %arg6[%c0_13, %c0_14] : memref<2x32xf32, #tpu.memory_space<vmem>>, vector<2x32xf32>
    %22 = arith.index_cast %c0_i32 : i32 to index
    %c0_15 = arith.constant 0 : index
    %c0_16 = arith.constant 0 : index
    %23 = vector.load %arg1[%22, %c0_15, %c0_16] : memref<8x2x128xf32, #tpu.memory_space<vmem>>, vector<1x2x128xf32>
    %24 = vector.shape_cast %23 : vector<1x2x128xf32> to vector<2x128xf32>
    %25 = arith.truncf %20 : vector<2x32xf32> to vector<2x32xbf16>
    %cst_17 = arith.constant dense<0.000000e+00> : vector<2x128xf32>
    %26 = tpu.matmul %25, %4, %cst_17 {dimension_numbers = #tpu.dot_dimension_numbers<[1], [0], [0], [1], [0, 0, 1, 1], [], []>} : vector<2x32xbf16>, vector<32x128xbf16>, vector<2x128xf32> -> vector<2x128xf32>
    %27 = arith.addf %24, %26 : vector<2x128xf32>
    %28 = arith.negf %27 : vector<2x128xf32>
    %29 = math.exp %28 : vector<2x128xf32>
    %cst_18 = arith.constant 1.000000e+00 : f32
    %30 = vector.broadcast %cst_18 : f32 to vector<2x128xf32>
    %31 = arith.addf %30, %29 : vector<2x128xf32>
    %32 = arith.divf %30, %31 : vector<2x128xf32>
    %33 = math.tanh %27 : vector<2x128xf32>
    %34 = vector.shape_cast %7 : vector<1x128xi1> to vector<1x128xi1>
    %35 = vector.broadcast %34 : vector<1x128xi1> to vector<2x128xi1>
    %36 = arith.select %35, %32, %33 : vector<2x128xi1>, vector<2x128xf32>
    %37 = vector.extract_strided_slice %36 {offsets = [0, 0], sizes = [2, 32], strides = [1, 1]} : vector<2x128xf32> to vector<2x32xf32>
    %38 = vector.extract_strided_slice %36 {offsets = [0, 32], sizes = [2, 32], strides = [1, 1]} : vector<2x128xf32> to vector<2x32xf32>
    %39 = vector.extract_strided_slice %36 {offsets = [0, 64], sizes = [2, 32], strides = [1, 1]} : vector<2x128xf32> to vector<2x32xf32>
    %40 = vector.extract_strided_slice %36 {offsets = [0, 96], sizes = [2, 32], strides = [1, 1]} : vector<2x128xf32> to vector<2x32xf32>
    %41 = arith.mulf %38, %21 : vector<2x32xf32>
    %42 = arith.mulf %37, %40 : vector<2x32xf32>
    %43 = arith.addf %41, %42 : vector<2x32xf32>
    %44 = math.tanh %43 : vector<2x32xf32>
    %45 = arith.mulf %39, %44 : vector<2x32xf32>
    %46 = arith.sitofp %c0_i32 : i32 to f32
    %47 = vector.broadcast %46 : f32 to vector<2x32xf32>
    %48 = arith.mulf %16, %47 : vector<2x32xf32>
    %49 = arith.cmpf olt, %48, %19 : vector<2x32xf32>
    %50 = arith.select %49, %43, %21 : vector<2x32xi1>, vector<2x32xf32>
    %c0_19 = arith.constant 0 : index
    %c0_20 = arith.constant 0 : index
    %51 = vector.load %arg6[%c0_19, %c0_20] : memref<2x32xf32, #tpu.memory_space<vmem>>, vector<2x32xf32>
    tpu.vector_store %arg6[%c0_19, %c0_20], %50 {strides = array<i32>} : memref<2x32xf32, #tpu.memory_space<vmem>>, vector<2x32xf32>,
    %52 = arith.select %49, %45, %20 : vector<2x32xi1>, vector<2x32xf32>
    %c0_21 = arith.constant 0 : index
    %c0_22 = arith.constant 0 : index
    %53 = vector.load %arg5[%c0_21, %c0_22] : memref<2x32xf32, #tpu.memory_space<vmem>>, vector<2x32xf32>
    tpu.vector_store %arg5[%c0_21, %c0_22], %52 {strides = array<i32>} : memref<2x32xf32, #tpu.memory_space<vmem>>, vector<2x32xf32>,
    %cst_23 = arith.constant 0.000000e+00 : f32
    %54 = vector.broadcast %cst_23 : f32 to vector<2x32xf32>
    %55 = arith.select %49, %45, %54 : vector<2x32xi1>, vector<2x32xf32>
    %56 = vector.extract_strided_slice %55 {offsets = [0, 0], sizes = [2, 16], strides = [1, 1]} : vector<2x32xf32> to vector<2x16xf32>
    %57 = arith.index_cast %c0_i32 : i32 to index
    %c0_24 = arith.constant 0 : index
    %c0_25 = arith.constant 0 : index
    %58 = vector.load %arg4[%57, %c0_24, %c0_25] : memref<8x2x32xf32, #tpu.memory_space<vmem>>, vector<1x2x16xf32>
    %59 = vector.shape_cast %58 : vector<1x2x16xf32> to vector<2x16xf32>
    %60 = vector.shape_cast %56 : vector<2x16xf32> to vector<1x2x16xf32>
    tpu.vector_store %arg4[%57, %c0_24, %c0_25], %60 {strides = array<i32>} : memref<8x2x32xf32, #tpu.memory_space<vmem>>, vector<1x2x16xf32>,
    %61 = vector.extract_strided_slice %55 {offsets = [0, 16], sizes = [2, 16], strides = [1, 1]} : vector<2x32xf32> to vector<2x16xf32>
    %c7_i32 = arith.constant 7 : i32
    %62 = arith.subi %c7_i32, %c0_i32 : i32
    %63 = arith.index_cast %62 : i32 to index
    %c0_26 = arith.constant 0 : index
    %c16 = arith.constant 16 : index
    %64 = vector.load %arg4[%63, %c0_26, %c16] : memref<8x2x32xf32, #tpu.memory_space<vmem>>, vector<1x2x16xf32>
    %65 = vector.shape_cast %64 : vector<1x2x16xf32> to vector<2x16xf32>
    %66 = vector.shape_cast %61 : vector<2x16xf32> to vector<1x2x16xf32>
    tpu.vector_store %arg4[%63, %c0_26, %c16], %66 {strides = array<i32>} : memref<8x2x32xf32, #tpu.memory_space<vmem>>, vector<1x2x16xf32>,
    %c1_i32 = arith.constant 1 : i32
    %c0_27 = arith.constant 0 : index
    %c0_28 = arith.constant 0 : index
    %67 = vector.load %arg5[%c0_27, %c0_28] : memref<2x32xf32, #tpu.memory_space<vmem>>, vector<2x32xf32>
    %c0_29 = arith.constant 0 : index
    %c0_30 = arith.constant 0 : index
    %68 = vector.load %arg6[%c0_29, %c0_30] : memref<2x32xf32, #tpu.memory_space<vmem>>, vector<2x32xf32>
    %69 = arith.index_cast %c1_i32 : i32 to index
    %c0_31 = arith.constant 0 : index
    %c0_32 = arith.constant 0 : index
    %70 = vector.load %arg1[%69, %c0_31, %c0_32] : memref<8x2x128xf32, #tpu.memory_space<vmem>>, vector<1x2x128xf32>
    %71 = vector.shape_cast %70 : vector<1x2x128xf32> to vector<2x128xf32>
    %72 = arith.truncf %67 : vector<2x32xf32> to vector<2x32xbf16>
    %cst_33 = arith.constant dense<0.000000e+00> : vector<2x128xf32>
    %73 = tpu.matmul %72, %4, %cst_33 {dimension_numbers = #tpu.dot_dimension_numbers<[1], [0], [0], [1], [0, 0, 1, 1], [], []>} : vector<2x32xbf16>, vector<32x128xbf16>, vector<2x128xf32> -> vector<2x128xf32>
    %74 = arith.addf %71, %73 : vector<2x128xf32>
    %75 = arith.negf %74 : vector<2x128xf32>
    %76 = math.exp %75 : vector<2x128xf32>
    %cst_34 = arith.constant 1.000000e+00 : f32
    %77 = vector.broadcast %cst_34 : f32 to vector<2x128xf32>
    %78 = arith.addf %77, %76 : vector<2x128xf32>
    %79 = arith.divf %77, %78 : vector<2x128xf32>
    %80 = math.tanh %74 : vector<2x128xf32>
    %81 = vector.shape_cast %7 : vector<1x128xi1> to vector<1x128xi1>
    %82 = vector.broadcast %81 : vector<1x128xi1> to vector<2x128xi1>
    %83 = arith.select %82, %79, %80 : vector<2x128xi1>, vector<2x128xf32>
    %84 = vector.extract_strided_slice %83 {offsets = [0, 0], sizes = [2, 32], strides = [1, 1]} : vector<2x128xf32> to vector<2x32xf32>
    %85 = vector.extract_strided_slice %83 {offsets = [0, 32], sizes = [2, 32], strides = [1, 1]} : vector<2x128xf32> to vector<2x32xf32>
    %86 = vector.extract_strided_slice %83 {offsets = [0, 64], sizes = [2, 32], strides = [1, 1]} : vector<2x128xf32> to vector<2x32xf32>
    %87 = vector.extract_strided_slice %83 {offsets = [0, 96], sizes = [2, 32], strides = [1, 1]} : vector<2x128xf32> to vector<2x32xf32>
    %88 = arith.mulf %85, %68 : vector<2x32xf32>
    %89 = arith.mulf %84, %87 : vector<2x32xf32>
    %90 = arith.addf %88, %89 : vector<2x32xf32>
    %91 = math.tanh %90 : vector<2x32xf32>
    %92 = arith.mulf %86, %91 : vector<2x32xf32>
    %93 = arith.sitofp %c1_i32 : i32 to f32
    %94 = vector.broadcast %93 : f32 to vector<2x32xf32>
    %95 = arith.mulf %16, %94 : vector<2x32xf32>
    %96 = arith.cmpf olt, %95, %19 : vector<2x32xf32>
    %97 = arith.select %96, %90, %68 : vector<2x32xi1>, vector<2x32xf32>
    %c0_35 = arith.constant 0 : index
    %c0_36 = arith.constant 0 : index
    %98 = vector.load %arg6[%c0_35, %c0_36] : memref<2x32xf32, #tpu.memory_space<vmem>>, vector<2x32xf32>
    tpu.vector_store %arg6[%c0_35, %c0_36], %97 {strides = array<i32>} : memref<2x32xf32, #tpu.memory_space<vmem>>, vector<2x32xf32>,
    %99 = arith.select %96, %92, %67 : vector<2x32xi1>, vector<2x32xf32>
    %c0_37 = arith.constant 0 : index
    %c0_38 = arith.constant 0 : index
    %100 = vector.load %arg5[%c0_37, %c0_38] : memref<2x32xf32, #tpu.memory_space<vmem>>, vector<2x32xf32>
    tpu.vector_store %arg5[%c0_37, %c0_38], %99 {strides = array<i32>} : memref<2x32xf32, #tpu.memory_space<vmem>>, vector<2x32xf32>,
    %cst_39 = arith.constant 0.000000e+00 : f32
    %101 = vector.broadcast %cst_39 : f32 to vector<2x32xf32>
    %102 = arith.select %96, %92, %101 : vector<2x32xi1>, vector<2x32xf32>
    %103 = vector.extract_strided_slice %102 {offsets = [0, 0], sizes = [2, 16], strides = [1, 1]} : vector<2x32xf32> to vector<2x16xf32>
    %104 = arith.index_cast %c1_i32 : i32 to index
    %c0_40 = arith.constant 0 : index
    %c0_41 = arith.constant 0 : index
    %105 = vector.load %arg4[%104, %c0_40, %c0_41] : memref<8x2x32xf32, #tpu.memory_space<vmem>>, vector<1x2x16xf32>
    %106 = vector.shape_cast %105 : vector<1x2x16xf32> to vector<2x16xf32>
    %107 = vector.shape_cast %103 : vector<2x16xf32> to vector<1x2x16xf32>
    tpu.vector_store %arg4[%104, %c0_40, %c0_41], %107 {strides = array<i32>} : memref<8x2x32xf32, #tpu.memory_space<vmem>>, vector<1x2x16xf32>,
    %108 = vector.extract_strided_slice %102 {offsets = [0, 16], sizes = [2, 16], strides = [1, 1]} : vector<2x32xf32> to vector<2x16xf32>
    %c7_i32_42 = arith.constant 7 : i32
    %109 = arith.subi %c7_i32_42, %c1_i32 : i32
    %110 = arith.index_cast %109 : i32 to index
    %c0_43 = arith.constant 0 : index
    %c16_44 = arith.constant 16 : index
    %111 = vector.load %arg4[%110, %c0_43, %c16_44] : memref<8x2x32xf32, #tpu.memory_space<vmem>>, vector<1x2x16xf32>
    %112 = vector.shape_cast %111 : vector<1x2x16xf32> to vector<2x16xf32>
    %113 = vector.shape_cast %108 : vector<2x16xf32> to vector<1x2x16xf32>
    tpu.vector_store %arg4[%110, %c0_43, %c16_44], %113 {strides = array<i32>} : memref<8x2x32xf32, #tpu.memory_space<vmem>>, vector<1x2x16xf32>,
    %c2_i32 = arith.constant 2 : i32
    %c0_45 = arith.constant 0 : index
    %c0_46 = arith.constant 0 : index
    %114 = vector.load %arg5[%c0_45, %c0_46] : memref<2x32xf32, #tpu.memory_space<vmem>>, vector<2x32xf32>
    %c0_47 = arith.constant 0 : index
    %c0_48 = arith.constant 0 : index
    %115 = vector.load %arg6[%c0_47, %c0_48] : memref<2x32xf32, #tpu.memory_space<vmem>>, vector<2x32xf32>
    %116 = arith.index_cast %c2_i32 : i32 to index
    %c0_49 = arith.constant 0 : index
    %c0_50 = arith.constant 0 : index
    %117 = vector.load %arg1[%116, %c0_49, %c0_50] : memref<8x2x128xf32, #tpu.memory_space<vmem>>, vector<1x2x128xf32>
    %118 = vector.shape_cast %117 : vector<1x2x128xf32> to vector<2x128xf32>
    %119 = arith.truncf %114 : vector<2x32xf32> to vector<2x32xbf16>
    %cst_51 = arith.constant dense<0.000000e+00> : vector<2x128xf32>
    %120 = tpu.matmul %119, %4, %cst_51 {dimension_numbers = #tpu.dot_dimension_numbers<[1], [0], [0], [1], [0, 0, 1, 1], [], []>} : vector<2x32xbf16>, vector<32x128xbf16>, vector<2x128xf32> -> vector<2x128xf32>
    %121 = arith.addf %118, %120 : vector<2x128xf32>
    %122 = arith.negf %121 : vector<2x128xf32>
    %123 = math.exp %122 : vector<2x128xf32>
    %cst_52 = arith.constant 1.000000e+00 : f32
    %124 = vector.broadcast %cst_52 : f32 to vector<2x128xf32>
    %125 = arith.addf %124, %123 : vector<2x128xf32>
    %126 = arith.divf %124, %125 : vector<2x128xf32>
    %127 = math.tanh %121 : vector<2x128xf32>
    %128 = vector.shape_cast %7 : vector<1x128xi1> to vector<1x128xi1>
    %129 = vector.broadcast %128 : vector<1x128xi1> to vector<2x128xi1>
    %130 = arith.select %129, %126, %127 : vector<2x128xi1>, vector<2x128xf32>
    %131 = vector.extract_strided_slice %130 {offsets = [0, 0], sizes = [2, 32], strides = [1, 1]} : vector<2x128xf32> to vector<2x32xf32>
    %132 = vector.extract_strided_slice %130 {offsets = [0, 32], sizes = [2, 32], strides = [1, 1]} : vector<2x128xf32> to vector<2x32xf32>
    %133 = vector.extract_strided_slice %130 {offsets = [0, 64], sizes = [2, 32], strides = [1, 1]} : vector<2x128xf32> to vector<2x32xf32>
    %134 = vector.extract_strided_slice %130 {offsets = [0, 96], sizes = [2, 32], strides = [1, 1]} : vector<2x128xf32> to vector<2x32xf32>
    %135 = arith.mulf %132, %115 : vector<2x32xf32>
    %136 = arith.mulf %131, %134 : vector<2x32xf32>
    %137 = arith.addf %135, %136 : vector<2x32xf32>
    %138 = math.tanh %137 : vector<2x32xf32>
    %139 = arith.mulf %133, %138 : vector<2x32xf32>
    %140 = arith.sitofp %c2_i32 : i32 to f32
    %141 = vector.broadcast %140 : f32 to vector<2x32xf32>
    %142 = arith.mulf %16, %141 : vector<2x32xf32>
    %143 = arith.cmpf olt, %142, %19 : vector<2x32xf32>
    %144 = arith.select %143, %137, %115 : vector<2x32xi1>, vector<2x32xf32>
    %c0_53 = arith.constant 0 : index
    %c0_54 = arith.constant 0 : index
    %145 = vector.load %arg6[%c0_53, %c0_54] : memref<2x32xf32, #tpu.memory_space<vmem>>, vector<2x32xf32>
    tpu.vector_store %arg6[%c0_53, %c0_54], %144 {strides = array<i32>} : memref<2x32xf32, #tpu.memory_space<vmem>>, vector<2x32xf32>,
    %146 = arith.select %143, %139, %114 : vector<2x32xi1>, vector<2x32xf32>
    %c0_55 = arith.constant 0 : index
    %c0_56 = arith.constant 0 : index
    %147 = vector.load %arg5[%c0_55, %c0_56] : memref<2x32xf32, #tpu.memory_space<vmem>>, vector<2x32xf32>
    tpu.vector_store %arg5[%c0_55, %c0_56], %146 {strides = array<i32>} : memref<2x32xf32, #tpu.memory_space<vmem>>, vector<2x32xf32>,
    %cst_57 = arith.constant 0.000000e+00 : f32
    %148 = vector.broadcast %cst_57 : f32 to vector<2x32xf32>
    %149 = arith.select %143, %139, %148 : vector<2x32xi1>, vector<2x32xf32>
    %150 = vector.extract_strided_slice %149 {offsets = [0, 0], sizes = [2, 16], strides = [1, 1]} : vector<2x32xf32> to vector<2x16xf32>
    %151 = arith.index_cast %c2_i32 : i32 to index
    %c0_58 = arith.constant 0 : index
    %c0_59 = arith.constant 0 : index
    %152 = vector.load %arg4[%151, %c0_58, %c0_59] : memref<8x2x32xf32, #tpu.memory_space<vmem>>, vector<1x2x16xf32>
    %153 = vector.shape_cast %152 : vector<1x2x16xf32> to vector<2x16xf32>
    %154 = vector.shape_cast %150 : vector<2x16xf32> to vector<1x2x16xf32>
    tpu.vector_store %arg4[%151, %c0_58, %c0_59], %154 {strides = array<i32>} : memref<8x2x32xf32, #tpu.memory_space<vmem>>, vector<1x2x16xf32>,
    %155 = vector.extract_strided_slice %149 {offsets = [0, 16], sizes = [2, 16], strides = [1, 1]} : vector<2x32xf32> to vector<2x16xf32>
    %c7_i32_60 = arith.constant 7 : i32
    %156 = arith.subi %c7_i32_60, %c2_i32 : i32
    %157 = arith.index_cast %156 : i32 to index
    %c0_61 = arith.constant 0 : index
    %c16_62 = arith.constant 16 : index
    %158 = vector.load %arg4[%157, %c0_61, %c16_62] : memref<8x2x32xf32, #tpu.memory_space<vmem>>, vector<1x2x16xf32>
    %159 = vector.shape_cast %158 : vector<1x2x16xf32> to vector<2x16xf32>
    %160 = vector.shape_cast %155 : vector<2x16xf32> to vector<1x2x16xf32>
    tpu.vector_store %arg4[%157, %c0_61, %c16_62], %160 {strides = array<i32>} : memref<8x2x32xf32, #tpu.memory_space<vmem>>, vector<1x2x16xf32>,
    %c3_i32 = arith.constant 3 : i32
    %c0_63 = arith.constant 0 : index
    %c0_64 = arith.constant 0 : index
    %161 = vector.load %arg5[%c0_63, %c0_64] : memref<2x32xf32, #tpu.memory_space<vmem>>, vector<2x32xf32>
    %c0_65 = arith.constant 0 : index
    %c0_66 = arith.constant 0 : index
    %162 = vector.load %arg6[%c0_65, %c0_66] : memref<2x32xf32, #tpu.memory_space<vmem>>, vector<2x32xf32>
    %163 = arith.index_cast %c3_i32 : i32 to index
    %c0_67 = arith.constant 0 : index
    %c0_68 = arith.constant 0 : index
    %164 = vector.load %arg1[%163, %c0_67, %c0_68] : memref<8x2x128xf32, #tpu.memory_space<vmem>>, vector<1x2x128xf32>
    %165 = vector.shape_cast %164 : vector<1x2x128xf32> to vector<2x128xf32>
    %166 = arith.truncf %161 : vector<2x32xf32> to vector<2x32xbf16>
    %cst_69 = arith.constant dense<0.000000e+00> : vector<2x128xf32>
    %167 = tpu.matmul %166, %4, %cst_69 {dimension_numbers = #tpu.dot_dimension_numbers<[1], [0], [0], [1], [0, 0, 1, 1], [], []>} : vector<2x32xbf16>, vector<32x128xbf16>, vector<2x128xf32> -> vector<2x128xf32>
    %168 = arith.addf %165, %167 : vector<2x128xf32>
    %169 = arith.negf %168 : vector<2x128xf32>
    %170 = math.exp %169 : vector<2x128xf32>
    %cst_70 = arith.constant 1.000000e+00 : f32
    %171 = vector.broadcast %cst_70 : f32 to vector<2x128xf32>
    %172 = arith.addf %171, %170 : vector<2x128xf32>
    %173 = arith.divf %171, %172 : vector<2x128xf32>
    %174 = math.tanh %168 : vector<2x128xf32>
    %175 = vector.shape_cast %7 : vector<1x128xi1> to vector<1x128xi1>
    %176 = vector.broadcast %175 : vector<1x128xi1> to vector<2x128xi1>
    %177 = arith.select %176, %173, %174 : vector<2x128xi1>, vector<2x128xf32>
    %178 = vector.extract_strided_slice %177 {offsets = [0, 0], sizes = [2, 32], strides = [1, 1]} : vector<2x128xf32> to vector<2x32xf32>
    %179 = vector.extract_strided_slice %177 {offsets = [0, 32], sizes = [2, 32], strides = [1, 1]} : vector<2x128xf32> to vector<2x32xf32>
    %180 = vector.extract_strided_slice %177 {offsets = [0, 64], sizes = [2, 32], strides = [1, 1]} : vector<2x128xf32> to vector<2x32xf32>
    %181 = vector.extract_strided_slice %177 {offsets = [0, 96], sizes = [2, 32], strides = [1, 1]} : vector<2x128xf32> to vector<2x32xf32>
    %182 = arith.mulf %179, %162 : vector<2x32xf32>
    %183 = arith.mulf %178, %181 : vector<2x32xf32>
    %184 = arith.addf %182, %183 : vector<2x32xf32>
    %185 = math.tanh %184 : vector<2x32xf32>
    %186 = arith.mulf %180, %185 : vector<2x32xf32>
    %187 = arith.sitofp %c3_i32 : i32 to f32
    %188 = vector.broadcast %187 : f32 to vector<2x32xf32>
    %189 = arith.mulf %16, %188 : vector<2x32xf32>
    %190 = arith.cmpf olt, %189, %19 : vector<2x32xf32>
    %191 = arith.select %190, %184, %162 : vector<2x32xi1>, vector<2x32xf32>
    %c0_71 = arith.constant 0 : index
    %c0_72 = arith.constant 0 : index
    %192 = vector.load %arg6[%c0_71, %c0_72] : memref<2x32xf32, #tpu.memory_space<vmem>>, vector<2x32xf32>
    tpu.vector_store %arg6[%c0_71, %c0_72], %191 {strides = array<i32>} : memref<2x32xf32, #tpu.memory_space<vmem>>, vector<2x32xf32>,
    %193 = arith.select %190, %186, %161 : vector<2x32xi1>, vector<2x32xf32>
    %c0_73 = arith.constant 0 : index
    %c0_74 = arith.constant 0 : index
    %194 = vector.load %arg5[%c0_73, %c0_74] : memref<2x32xf32, #tpu.memory_space<vmem>>, vector<2x32xf32>
    tpu.vector_store %arg5[%c0_73, %c0_74], %193 {strides = array<i32>} : memref<2x32xf32, #tpu.memory_space<vmem>>, vector<2x32xf32>,
    %cst_75 = arith.constant 0.000000e+00 : f32
    %195 = vector.broadcast %cst_75 : f32 to vector<2x32xf32>
    %196 = arith.select %190, %186, %195 : vector<2x32xi1>, vector<2x32xf32>
    %197 = vector.extract_strided_slice %196 {offsets = [0, 0], sizes = [2, 16], strides = [1, 1]} : vector<2x32xf32> to vector<2x16xf32>
    %198 = arith.index_cast %c3_i32 : i32 to index
    %c0_76 = arith.constant 0 : index
    %c0_77 = arith.constant 0 : index
    %199 = vector.load %arg4[%198, %c0_76, %c0_77] : memref<8x2x32xf32, #tpu.memory_space<vmem>>, vector<1x2x16xf32>
    %200 = vector.shape_cast %199 : vector<1x2x16xf32> to vector<2x16xf32>
    %201 = vector.shape_cast %197 : vector<2x16xf32> to vector<1x2x16xf32>
    tpu.vector_store %arg4[%198, %c0_76, %c0_77], %201 {strides = array<i32>} : memref<8x2x32xf32, #tpu.memory_space<vmem>>, vector<1x2x16xf32>,
    %202 = vector.extract_strided_slice %196 {offsets = [0, 16], sizes = [2, 16], strides = [1, 1]} : vector<2x32xf32> to vector<2x16xf32>
    %c7_i32_78 = arith.constant 7 : i32
    %203 = arith.subi %c7_i32_78, %c3_i32 : i32
    %204 = arith.index_cast %203 : i32 to index
    %c0_79 = arith.constant 0 : index
    %c16_80 = arith.constant 16 : index
    %205 = vector.load %arg4[%204, %c0_79, %c16_80] : memref<8x2x32xf32, #tpu.memory_space<vmem>>, vector<1x2x16xf32>
    %206 = vector.shape_cast %205 : vector<1x2x16xf32> to vector<2x16xf32>
    %207 = vector.shape_cast %202 : vector<2x16xf32> to vector<1x2x16xf32>
    tpu.vector_store %arg4[%204, %c0_79, %c16_80], %207 {strides = array<i32>} : memref<8x2x32xf32, #tpu.memory_space<vmem>>, vector<1x2x16xf32>,
    %c4_i32 = arith.constant 4 : i32
    %c0_81 = arith.constant 0 : index
    %c0_82 = arith.constant 0 : index
    %208 = vector.load %arg5[%c0_81, %c0_82] : memref<2x32xf32, #tpu.memory_space<vmem>>, vector<2x32xf32>
    %c0_83 = arith.constant 0 : index
    %c0_84 = arith.constant 0 : index
    %209 = vector.load %arg6[%c0_83, %c0_84] : memref<2x32xf32, #tpu.memory_space<vmem>>, vector<2x32xf32>
    %210 = arith.index_cast %c4_i32 : i32 to index
    %c0_85 = arith.constant 0 : index
    %c0_86 = arith.constant 0 : index
    %211 = vector.load %arg1[%210, %c0_85, %c0_86] : memref<8x2x128xf32, #tpu.memory_space<vmem>>, vector<1x2x128xf32>
    %212 = vector.shape_cast %211 : vector<1x2x128xf32> to vector<2x128xf32>
    %213 = arith.truncf %208 : vector<2x32xf32> to vector<2x32xbf16>
    %cst_87 = arith.constant dense<0.000000e+00> : vector<2x128xf32>
    %214 = tpu.matmul %213, %4, %cst_87 {dimension_numbers = #tpu.dot_dimension_numbers<[1], [0], [0], [1], [0, 0, 1, 1], [], []>} : vector<2x32xbf16>, vector<32x128xbf16>, vector<2x128xf32> -> vector<2x128xf32>
    %215 = arith.addf %212, %214 : vector<2x128xf32>
    %216 = arith.negf %215 : vector<2x128xf32>
    %217 = math.exp %216 : vector<2x128xf32>
    %cst_88 = arith.constant 1.000000e+00 : f32
    %218 = vector.broadcast %cst_88 : f32 to vector<2x128xf32>
    %219 = arith.addf %218, %217 : vector<2x128xf32>
    %220 = arith.divf %218, %219 : vector<2x128xf32>
    %221 = math.tanh %215 : vector<2x128xf32>
    %222 = vector.shape_cast %7 : vector<1x128xi1> to vector<1x128xi1>
    %223 = vector.broadcast %222 : vector<1x128xi1> to vector<2x128xi1>
    %224 = arith.select %223, %220, %221 : vector<2x128xi1>, vector<2x128xf32>
    %225 = vector.extract_strided_slice %224 {offsets = [0, 0], sizes = [2, 32], strides = [1, 1]} : vector<2x128xf32> to vector<2x32xf32>
    %226 = vector.extract_strided_slice %224 {offsets = [0, 32], sizes = [2, 32], strides = [1, 1]} : vector<2x128xf32> to vector<2x32xf32>
    %227 = vector.extract_strided_slice %224 {offsets = [0, 64], sizes = [2, 32], strides = [1, 1]} : vector<2x128xf32> to vector<2x32xf32>
    %228 = vector.extract_strided_slice %224 {offsets = [0, 96], sizes = [2, 32], strides = [1, 1]} : vector<2x128xf32> to vector<2x32xf32>
    %229 = arith.mulf %226, %209 : vector<2x32xf32>
    %230 = arith.mulf %225, %228 : vector<2x32xf32>
    %231 = arith.addf %229, %230 : vector<2x32xf32>
    %232 = math.tanh %231 : vector<2x32xf32>
    %233 = arith.mulf %227, %232 : vector<2x32xf32>
    %234 = arith.sitofp %c4_i32 : i32 to f32
    %235 = vector.broadcast %234 : f32 to vector<2x32xf32>
    %236 = arith.mulf %16, %235 : vector<2x32xf32>
    %237 = arith.cmpf olt, %236, %19 : vector<2x32xf32>
    %238 = arith.select %237, %231, %209 : vector<2x32xi1>, vector<2x32xf32>
    %c0_89 = arith.constant 0 : index
    %c0_90 = arith.constant 0 : index
    %239 = vector.load %arg6[%c0_89, %c0_90] : memref<2x32xf32, #tpu.memory_space<vmem>>, vector<2x32xf32>
    tpu.vector_store %arg6[%c0_89, %c0_90], %238 {strides = array<i32>} : memref<2x32xf32, #tpu.memory_space<vmem>>, vector<2x32xf32>,
    %240 = arith.select %237, %233, %208 : vector<2x32xi1>, vector<2x32xf32>
    %c0_91 = arith.constant 0 : index
    %c0_92 = arith.constant 0 : index
    %241 = vector.load %arg5[%c0_91, %c0_92] : memref<2x32xf32, #tpu.memory_space<vmem>>, vector<2x32xf32>
    tpu.vector_store %arg5[%c0_91, %c0_92], %240 {strides = array<i32>} : memref<2x32xf32, #tpu.memory_space<vmem>>, vector<2x32xf32>,
    %cst_93 = arith.constant 0.000000e+00 : f32
    %242 = vector.broadcast %cst_93 : f32 to vector<2x32xf32>
    %243 = arith.select %237, %233, %242 : vector<2x32xi1>, vector<2x32xf32>
    %244 = vector.extract_strided_slice %243 {offsets = [0, 0], sizes = [2, 16], strides = [1, 1]} : vector<2x32xf32> to vector<2x16xf32>
    %245 = arith.index_cast %c4_i32 : i32 to index
    %c0_94 = arith.constant 0 : index
    %c0_95 = arith.constant 0 : index
    %246 = vector.load %arg4[%245, %c0_94, %c0_95] : memref<8x2x32xf32, #tpu.memory_space<vmem>>, vector<1x2x16xf32>
    %247 = vector.shape_cast %246 : vector<1x2x16xf32> to vector<2x16xf32>
    %248 = vector.shape_cast %244 : vector<2x16xf32> to vector<1x2x16xf32>
    tpu.vector_store %arg4[%245, %c0_94, %c0_95], %248 {strides = array<i32>} : memref<8x2x32xf32, #tpu.memory_space<vmem>>, vector<1x2x16xf32>,
    %249 = vector.extract_strided_slice %243 {offsets = [0, 16], sizes = [2, 16], strides = [1, 1]} : vector<2x32xf32> to vector<2x16xf32>
    %c7_i32_96 = arith.constant 7 : i32
    %250 = arith.subi %c7_i32_96, %c4_i32 : i32
    %251 = arith.index_cast %250 : i32 to index
    %c0_97 = arith.constant 0 : index
    %c16_98 = arith.constant 16 : index
    %252 = vector.load %arg4[%251, %c0_97, %c16_98] : memref<8x2x32xf32, #tpu.memory_space<vmem>>, vector<1x2x16xf32>
    %253 = vector.shape_cast %252 : vector<1x2x16xf32> to vector<2x16xf32>
    %254 = vector.shape_cast %249 : vector<2x16xf32> to vector<1x2x16xf32>
    tpu.vector_store %arg4[%251, %c0_97, %c16_98], %254 {strides = array<i32>} : memref<8x2x32xf32, #tpu.memory_space<vmem>>, vector<1x2x16xf32>,
    %c5_i32 = arith.constant 5 : i32
    %c0_99 = arith.constant 0 : index
    %c0_100 = arith.constant 0 : index
    %255 = vector.load %arg5[%c0_99, %c0_100] : memref<2x32xf32, #tpu.memory_space<vmem>>, vector<2x32xf32>
    %c0_101 = arith.constant 0 : index
    %c0_102 = arith.constant 0 : index
    %256 = vector.load %arg6[%c0_101, %c0_102] : memref<2x32xf32, #tpu.memory_space<vmem>>, vector<2x32xf32>
    %257 = arith.index_cast %c5_i32 : i32 to index
    %c0_103 = arith.constant 0 : index
    %c0_104 = arith.constant 0 : index
    %258 = vector.load %arg1[%257, %c0_103, %c0_104] : memref<8x2x128xf32, #tpu.memory_space<vmem>>, vector<1x2x128xf32>
    %259 = vector.shape_cast %258 : vector<1x2x128xf32> to vector<2x128xf32>
    %260 = arith.truncf %255 : vector<2x32xf32> to vector<2x32xbf16>
    %cst_105 = arith.constant dense<0.000000e+00> : vector<2x128xf32>
    %261 = tpu.matmul %260, %4, %cst_105 {dimension_numbers = #tpu.dot_dimension_numbers<[1], [0], [0], [1], [0, 0, 1, 1], [], []>} : vector<2x32xbf16>, vector<32x128xbf16>, vector<2x128xf32> -> vector<2x128xf32>
    %262 = arith.addf %259, %261 : vector<2x128xf32>
    %263 = arith.negf %262 : vector<2x128xf32>
    %264 = math.exp %263 : vector<2x128xf32>
    %cst_106 = arith.constant 1.000000e+00 : f32
    %265 = vector.broadcast %cst_106 : f32 to vector<2x128xf32>
    %266 = arith.addf %265, %264 : vector<2x128xf32>
    %267 = arith.divf %265, %266 : vector<2x128xf32>
    %268 = math.tanh %262 : vector<2x128xf32>
    %269 = vector.shape_cast %7 : vector<1x128xi1> to vector<1x128xi1>
    %270 = vector.broadcast %269 : vector<1x128xi1> to vector<2x128xi1>
    %271 = arith.select %270, %267, %268 : vector<2x128xi1>, vector<2x128xf32>
    %272 = vector.extract_strided_slice %271 {offsets = [0, 0], sizes = [2, 32], strides = [1, 1]} : vector<2x128xf32> to vector<2x32xf32>
    %273 = vector.extract_strided_slice %271 {offsets = [0, 32], sizes = [2, 32], strides = [1, 1]} : vector<2x128xf32> to vector<2x32xf32>
    %274 = vector.extract_strided_slice %271 {offsets = [0, 64], sizes = [2, 32], strides = [1, 1]} : vector<2x128xf32> to vector<2x32xf32>
    %275 = vector.extract_strided_slice %271 {offsets = [0, 96], sizes = [2, 32], strides = [1, 1]} : vector<2x128xf32> to vector<2x32xf32>
    %276 = arith.mulf %273, %256 : vector<2x32xf32>
    %277 = arith.mulf %272, %275 : vector<2x32xf32>
    %278 = arith.addf %276, %277 : vector<2x32xf32>
    %279 = math.tanh %278 : vector<2x32xf32>
    %280 = arith.mulf %274, %279 : vector<2x32xf32>
    %281 = arith.sitofp %c5_i32 : i32 to f32
    %282 = vector.broadcast %281 : f32 to vector<2x32xf32>
    %283 = arith.mulf %16, %282 : vector<2x32xf32>
    %284 = arith.cmpf olt, %283, %19 : vector<2x32xf32>
    %285 = arith.select %284, %278, %256 : vector<2x32xi1>, vector<2x32xf32>
    %c0_107 = arith.constant 0 : index
    %c0_108 = arith.constant 0 : index
    %286 = vector.load %arg6[%c0_107, %c0_108] : memref<2x32xf32, #tpu.memory_space<vmem>>, vector<2x32xf32>
    tpu.vector_store %arg6[%c0_107, %c0_108], %285 {strides = array<i32>} : memref<2x32xf32, #tpu.memory_space<vmem>>, vector<2x32xf32>,
    %287 = arith.select %284, %280, %255 : vector<2x32xi1>, vector<2x32xf32>
    %c0_109 = arith.constant 0 : index
    %c0_110 = arith.constant 0 : index
    %288 = vector.load %arg5[%c0_109, %c0_110] : memref<2x32xf32, #tpu.memory_space<vmem>>, vector<2x32xf32>
    tpu.vector_store %arg5[%c0_109, %c0_110], %287 {strides = array<i32>} : memref<2x32xf32, #tpu.memory_space<vmem>>, vector<2x32xf32>,
    %cst_111 = arith.constant 0.000000e+00 : f32
    %289 = vector.broadcast %cst_111 : f32 to vector<2x32xf32>
    %290 = arith.select %284, %280, %289 : vector<2x32xi1>, vector<2x32xf32>
    %291 = vector.extract_strided_slice %290 {offsets = [0, 0], sizes = [2, 16], strides = [1, 1]} : vector<2x32xf32> to vector<2x16xf32>
    %292 = arith.index_cast %c5_i32 : i32 to index
    %c0_112 = arith.constant 0 : index
    %c0_113 = arith.constant 0 : index
    %293 = vector.load %arg4[%292, %c0_112, %c0_113] : memref<8x2x32xf32, #tpu.memory_space<vmem>>, vector<1x2x16xf32>
    %294 = vector.shape_cast %293 : vector<1x2x16xf32> to vector<2x16xf32>
    %295 = vector.shape_cast %291 : vector<2x16xf32> to vector<1x2x16xf32>
    tpu.vector_store %arg4[%292, %c0_112, %c0_113], %295 {strides = array<i32>} : memref<8x2x32xf32, #tpu.memory_space<vmem>>, vector<1x2x16xf32>,
    %296 = vector.extract_strided_slice %290 {offsets = [0, 16], sizes = [2, 16], strides = [1, 1]} : vector<2x32xf32> to vector<2x16xf32>
    %c7_i32_114 = arith.constant 7 : i32
    %297 = arith.subi %c7_i32_114, %c5_i32 : i32
    %298 = arith.index_cast %297 : i32 to index
    %c0_115 = arith.constant 0 : index
    %c16_116 = arith.constant 16 : index
    %299 = vector.load %arg4[%298, %c0_115, %c16_116] : memref<8x2x32xf32, #tpu.memory_space<vmem>>, vector<1x2x16xf32>
    %300 = vector.shape_cast %299 : vector<1x2x16xf32> to vector<2x16xf32>
    %301 = vector.shape_cast %296 : vector<2x16xf32> to vector<1x2x16xf32>
    tpu.vector_store %arg4[%298, %c0_115, %c16_116], %301 {strides = array<i32>} : memref<8x2x32xf32, #tpu.memory_space<vmem>>, vector<1x2x16xf32>,
    %c6_i32 = arith.constant 6 : i32
    %c0_117 = arith.constant 0 : index
    %c0_118 = arith.constant 0 : index
    %302 = vector.load %arg5[%c0_117, %c0_118] : memref<2x32xf32, #tpu.memory_space<vmem>>, vector<2x32xf32>
    %c0_119 = arith.constant 0 : index
    %c0_120 = arith.constant 0 : index
    %303 = vector.load %arg6[%c0_119, %c0_120] : memref<2x32xf32, #tpu.memory_space<vmem>>, vector<2x32xf32>
    %304 = arith.index_cast %c6_i32 : i32 to index
    %c0_121 = arith.constant 0 : index
    %c0_122 = arith.constant 0 : index
    %305 = vector.load %arg1[%304, %c0_121, %c0_122] : memref<8x2x128xf32, #tpu.memory_space<vmem>>, vector<1x2x128xf32>
    %306 = vector.shape_cast %305 : vector<1x2x128xf32> to vector<2x128xf32>
    %307 = arith.truncf %302 : vector<2x32xf32> to vector<2x32xbf16>
    %cst_123 = arith.constant dense<0.000000e+00> : vector<2x128xf32>
    %308 = tpu.matmul %307, %4, %cst_123 {dimension_numbers = #tpu.dot_dimension_numbers<[1], [0], [0], [1], [0, 0, 1, 1], [], []>} : vector<2x32xbf16>, vector<32x128xbf16>, vector<2x128xf32> -> vector<2x128xf32>
    %309 = arith.addf %306, %308 : vector<2x128xf32>
    %310 = arith.negf %309 : vector<2x128xf32>
    %311 = math.exp %310 : vector<2x128xf32>
    %cst_124 = arith.constant 1.000000e+00 : f32
    %312 = vector.broadcast %cst_124 : f32 to vector<2x128xf32>
    %313 = arith.addf %312, %311 : vector<2x128xf32>
    %314 = arith.divf %312, %313 : vector<2x128xf32>
    %315 = math.tanh %309 : vector<2x128xf32>
    %316 = vector.shape_cast %7 : vector<1x128xi1> to vector<1x128xi1>
    %317 = vector.broadcast %316 : vector<1x128xi1> to vector<2x128xi1>
    %318 = arith.select %317, %314, %315 : vector<2x128xi1>, vector<2x128xf32>
    %319 = vector.extract_strided_slice %318 {offsets = [0, 0], sizes = [2, 32], strides = [1, 1]} : vector<2x128xf32> to vector<2x32xf32>
    %320 = vector.extract_strided_slice %318 {offsets = [0, 32], sizes = [2, 32], strides = [1, 1]} : vector<2x128xf32> to vector<2x32xf32>
    %321 = vector.extract_strided_slice %318 {offsets = [0, 64], sizes = [2, 32], strides = [1, 1]} : vector<2x128xf32> to vector<2x32xf32>
    %322 = vector.extract_strided_slice %318 {offsets = [0, 96], sizes = [2, 32], strides = [1, 1]} : vector<2x128xf32> to vector<2x32xf32>
    %323 = arith.mulf %320, %303 : vector<2x32xf32>
    %324 = arith.mulf %319, %322 : vector<2x32xf32>
    %325 = arith.addf %323, %324 : vector<2x32xf32>
    %326 = math.tanh %325 : vector<2x32xf32>
    %327 = arith.mulf %321, %326 : vector<2x32xf32>
    %328 = arith.sitofp %c6_i32 : i32 to f32
    %329 = vector.broadcast %328 : f32 to vector<2x32xf32>
    %330 = arith.mulf %16, %329 : vector<2x32xf32>
    %331 = arith.cmpf olt, %330, %19 : vector<2x32xf32>
    %332 = arith.select %331, %325, %303 : vector<2x32xi1>, vector<2x32xf32>
    %c0_125 = arith.constant 0 : index
    %c0_126 = arith.constant 0 : index
    %333 = vector.load %arg6[%c0_125, %c0_126] : memref<2x32xf32, #tpu.memory_space<vmem>>, vector<2x32xf32>
    tpu.vector_store %arg6[%c0_125, %c0_126], %332 {strides = array<i32>} : memref<2x32xf32, #tpu.memory_space<vmem>>, vector<2x32xf32>,
    %334 = arith.select %331, %327, %302 : vector<2x32xi1>, vector<2x32xf32>
    %c0_127 = arith.constant 0 : index
    %c0_128 = arith.constant 0 : index
    %335 = vector.load %arg5[%c0_127, %c0_128] : memref<2x32xf32, #tpu.memory_space<vmem>>, vector<2x32xf32>
    tpu.vector_store %arg5[%c0_127, %c0_128], %334 {strides = array<i32>} : memref<2x32xf32, #tpu.memory_space<vmem>>, vector<2x32xf32>,
    %cst_129 = arith.constant 0.000000e+00 : f32
    %336 = vector.broadcast %cst_129 : f32 to vector<2x32xf32>
    %337 = arith.select %331, %327, %336 : vector<2x32xi1>, vector<2x32xf32>
    %338 = vector.extract_strided_slice %337 {offsets = [0, 0], sizes = [2, 16], strides = [1, 1]} : vector<2x32xf32> to vector<2x16xf32>
    %339 = arith.index_cast %c6_i32 : i32 to index
    %c0_130 = arith.constant 0 : index
    %c0_131 = arith.constant 0 : index
    %340 = vector.load %arg4[%339, %c0_130, %c0_131] : memref<8x2x32xf32, #tpu.memory_space<vmem>>, vector<1x2x16xf32>
    %341 = vector.shape_cast %340 : vector<1x2x16xf32> to vector<2x16xf32>
    %342 = vector.shape_cast %338 : vector<2x16xf32> to vector<1x2x16xf32>
    tpu.vector_store %arg4[%339, %c0_130, %c0_131], %342 {strides = array<i32>} : memref<8x2x32xf32, #tpu.memory_space<vmem>>, vector<1x2x16xf32>,
    %343 = vector.extract_strided_slice %337 {offsets = [0, 16], sizes = [2, 16], strides = [1, 1]} : vector<2x32xf32> to vector<2x16xf32>
    %c7_i32_132 = arith.constant 7 : i32
    %344 = arith.subi %c7_i32_132, %c6_i32 : i32
    %345 = arith.index_cast %344 : i32 to index
    %c0_133 = arith.constant 0 : index
    %c16_134 = arith.constant 16 : index
    %346 = vector.load %arg4[%345, %c0_133, %c16_134] : memref<8x2x32xf32, #tpu.memory_space<vmem>>, vector<1x2x16xf32>
    %347 = vector.shape_cast %346 : vector<1x2x16xf32> to vector<2x16xf32>
    %348 = vector.shape_cast %343 : vector<2x16xf32> to vector<1x2x16xf32>
    tpu.vector_store %arg4[%345, %c0_133, %c16_134], %348 {strides = array<i32>} : memref<8x2x32xf32, #tpu.memory_space<vmem>>, vector<1x2x16xf32>,
    %c7_i32_135 = arith.constant 7 : i32
    %c0_136 = arith.constant 0 : index
    %c0_137 = arith.constant 0 : index
    %349 = vector.load %arg5[%c0_136, %c0_137] : memref<2x32xf32, #tpu.memory_space<vmem>>, vector<2x32xf32>
    %c0_138 = arith.constant 0 : index
    %c0_139 = arith.constant 0 : index
    %350 = vector.load %arg6[%c0_138, %c0_139] : memref<2x32xf32, #tpu.memory_space<vmem>>, vector<2x32xf32>
    %351 = arith.index_cast %c7_i32_135 : i32 to index
    %c0_140 = arith.constant 0 : index
    %c0_141 = arith.constant 0 : index
    %352 = vector.load %arg1[%351, %c0_140, %c0_141] : memref<8x2x128xf32, #tpu.memory_space<vmem>>, vector<1x2x128xf32>
    %353 = vector.shape_cast %352 : vector<1x2x128xf32> to vector<2x128xf32>
    %354 = arith.truncf %349 : vector<2x32xf32> to vector<2x32xbf16>
    %cst_142 = arith.constant dense<0.000000e+00> : vector<2x128xf32>
    %355 = tpu.matmul %354, %4, %cst_142 {dimension_numbers = #tpu.dot_dimension_numbers<[1], [0], [0], [1], [0, 0, 1, 1], [], []>} : vector<2x32xbf16>, vector<32x128xbf16>, vector<2x128xf32> -> vector<2x128xf32>
    %356 = arith.addf %353, %355 : vector<2x128xf32>
    %357 = arith.negf %356 : vector<2x128xf32>
    %358 = math.exp %357 : vector<2x128xf32>
    %cst_143 = arith.constant 1.000000e+00 : f32
    %359 = vector.broadcast %cst_143 : f32 to vector<2x128xf32>
    %360 = arith.addf %359, %358 : vector<2x128xf32>
    %361 = arith.divf %359, %360 : vector<2x128xf32>
    %362 = math.tanh %356 : vector<2x128xf32>
    %363 = vector.shape_cast %7 : vector<1x128xi1> to vector<1x128xi1>
    %364 = vector.broadcast %363 : vector<1x128xi1> to vector<2x128xi1>
    %365 = arith.select %364, %361, %362 : vector<2x128xi1>, vector<2x128xf32>
    %366 = vector.extract_strided_slice %365 {offsets = [0, 0], sizes = [2, 32], strides = [1, 1]} : vector<2x128xf32> to vector<2x32xf32>
    %367 = vector.extract_strided_slice %365 {offsets = [0, 32], sizes = [2, 32], strides = [1, 1]} : vector<2x128xf32> to vector<2x32xf32>
    %368 = vector.extract_strided_slice %365 {offsets = [0, 64], sizes = [2, 32], strides = [1, 1]} : vector<2x128xf32> to vector<2x32xf32>
    %369 = vector.extract_strided_slice %365 {offsets = [0, 96], sizes = [2, 32], strides = [1, 1]} : vector<2x128xf32> to vector<2x32xf32>
    %370 = arith.mulf %367, %350 : vector<2x32xf32>
    %371 = arith.mulf %366, %369 : vector<2x32xf32>
    %372 = arith.addf %370, %371 : vector<2x32xf32>
    %373 = math.tanh %372 : vector<2x32xf32>
    %374 = arith.mulf %368, %373 : vector<2x32xf32>
    %375 = arith.sitofp %c7_i32_135 : i32 to f32
    %376 = vector.broadcast %375 : f32 to vector<2x32xf32>
    %377 = arith.mulf %16, %376 : vector<2x32xf32>
    %378 = arith.cmpf olt, %377, %19 : vector<2x32xf32>
    %379 = arith.select %378, %372, %350 : vector<2x32xi1>, vector<2x32xf32>
    %c0_144 = arith.constant 0 : index
    %c0_145 = arith.constant 0 : index
    %380 = vector.load %arg6[%c0_144, %c0_145] : memref<2x32xf32, #tpu.memory_space<vmem>>, vector<2x32xf32>
    tpu.vector_store %arg6[%c0_144, %c0_145], %379 {strides = array<i32>} : memref<2x32xf32, #tpu.memory_space<vmem>>, vector<2x32xf32>,
    %381 = arith.select %378, %374, %349 : vector<2x32xi1>, vector<2x32xf32>
    %c0_146 = arith.constant 0 : index
    %c0_147 = arith.constant 0 : index
    %382 = vector.load %arg5[%c0_146, %c0_147] : memref<2x32xf32, #tpu.memory_space<vmem>>, vector<2x32xf32>
    tpu.vector_store %arg5[%c0_146, %c0_147], %381 {strides = array<i32>} : memref<2x32xf32, #tpu.memory_space<vmem>>, vector<2x32xf32>,
    %cst_148 = arith.constant 0.000000e+00 : f32
    %383 = vector.broadcast %cst_148 : f32 to vector<2x32xf32>
    %384 = arith.select %378, %374, %383 : vector<2x32xi1>, vector<2x32xf32>
    %385 = vector.extract_strided_slice %384 {offsets = [0, 0], sizes = [2, 16], strides = [1, 1]} : vector<2x32xf32> to vector<2x16xf32>
    %386 = arith.index_cast %c7_i32_135 : i32 to index
    %c0_149 = arith.constant 0 : index
    %c0_150 = arith.constant 0 : index
    %387 = vector.load %arg4[%386, %c0_149, %c0_150] : memref<8x2x32xf32, #tpu.memory_space<vmem>>, vector<1x2x16xf32>
    %388 = vector.shape_cast %387 : vector<1x2x16xf32> to vector<2x16xf32>
    %389 = vector.shape_cast %385 : vector<2x16xf32> to vector<1x2x16xf32>
    tpu.vector_store %arg4[%386, %c0_149, %c0_150], %389 {strides = array<i32>} : memref<8x2x32xf32, #tpu.memory_space<vmem>>, vector<1x2x16xf32>,
    %390 = vector.extract_strided_slice %384 {offsets = [0, 16], sizes = [2, 16], strides = [1, 1]} : vector<2x32xf32> to vector<2x16xf32>
    %c7_i32_151 = arith.constant 7 : i32
    %391 = arith.subi %c7_i32_151, %c7_i32_135 : i32
    %392 = arith.index_cast %391 : i32 to index
    %c0_152 = arith.constant 0 : index
    %c16_153 = arith.constant 16 : index
    %393 = vector.load %arg4[%392, %c0_152, %c16_153] : memref<8x2x32xf32, #tpu.memory_space<vmem>>, vector<1x2x16xf32>
    %394 = vector.shape_cast %393 : vector<1x2x16xf32> to vector<2x16xf32>
    %395 = vector.shape_cast %390 : vector<2x16xf32> to vector<1x2x16xf32>
    tpu.vector_store %arg4[%392, %c0_152, %c16_153], %395 {strides = array<i32>} : memref<8x2x32xf32, #tpu.memory_space<vmem>>, vector<1x2x16xf32>,
    %c8_i32 = arith.constant 8 : i32
    return
  }
  func.func @transform_0(%arg0: i32) -> (i32, i32, i32) {
    %c0_i32 = arith.constant 0 : i32
    %c0_i32_0 = arith.constant 0 : i32
    %c0_i32_1 = arith.constant 0 : i32
    return %c0_i32, %arg0, %c0_i32_0 : i32, i32, i32
  }
  func.func @transform_1(%arg0: i32) -> (i32, i32) {
    %c0_i32 = arith.constant 0 : i32
    %c0_i32_0 = arith.constant 0 : i32
    %c0_i32_1 = arith.constant 0 : i32
    return %c0_i32, %c0_i32_0 : i32, i32
  }
  func.func @transform_2(%arg0: i32) -> (i32, i32) {
    %c0_i32 = arith.constant 0 : i32
    %c0_i32_0 = arith.constant 0 : i32
    return %arg0, %c0_i32 : i32, i32
  }
  func.func @transform_3(%arg0: i32) -> (i32, i32, i32) {
    %c0_i32 = arith.constant 0 : i32
    %c0_i32_0 = arith.constant 0 : i32
    %c0_i32_1 = arith.constant 0 : i32
    return %c0_i32, %arg0, %c0_i32_0 : i32, i32, i32
  }
}

module attributes {stable_mosaic.version = 11 : i64} {
  func.func @_epilogue_kernel(%arg0: i32, %arg1: memref<8x2x32xf32, #tpu.memory_space<vmem>>, %arg2: memref<1x1x32xf32, #tpu.memory_space<vmem>>, %arg3: memref<8x2x1xf32, #tpu.memory_space<vmem>>, %arg4: memref<1x32xf32, #tpu.memory_space<vmem>>, %arg5: memref<1x32xf32, #tpu.memory_space<vmem>>, %arg6: memref<32x64xbf16, #tpu.memory_space<vmem>>, %arg7: memref<1x64xf32, #tpu.memory_space<vmem>>, %arg8: memref<2x4xf32, #tpu.memory_space<vmem>>, %arg9: memref<1x68xf32, #tpu.memory_space<vmem>>, %arg10: memref<1x68xf32, #tpu.memory_space<vmem>>, %arg11: memref<68x128xbf16, #tpu.memory_space<vmem>>, %arg12: memref<1x128xf32, #tpu.memory_space<vmem>>, %arg13: memref<2x128xf32, #tpu.memory_space<vmem>>) attributes {dimension_semantics = [#tpu.dimension_semantics<parallel>], iteration_bounds = array<i64: 1>, scalar_prefetch = 0 : i64, scratch_operands = 0 : i64, tpu.core_type = #tpu.core_type<tc>, window_params = [{transform_indices = @transform_0, window_bounds = array<i64: 8, 2, 32>}, {pipeline_mode = #tpu.pipeline_mode<synchronous>, transform_indices = @transform_1, window_bounds = array<i64: 1, 1, 32>}, {transform_indices = @transform_2, window_bounds = array<i64: 8, 2, 1>}, {pipeline_mode = #tpu.pipeline_mode<synchronous>, transform_indices = @transform_3, window_bounds = array<i64: 1, 32>}, {pipeline_mode = #tpu.pipeline_mode<synchronous>, transform_indices = @transform_4, window_bounds = array<i64: 1, 32>}, {pipeline_mode = #tpu.pipeline_mode<synchronous>, transform_indices = @transform_5, window_bounds = array<i64: 32, 64>}, {pipeline_mode = #tpu.pipeline_mode<synchronous>, transform_indices = @transform_6, window_bounds = array<i64: 1, 64>}, {transform_indices = @transform_7, window_bounds = array<i64: 2, 4>}, {pipeline_mode = #tpu.pipeline_mode<synchronous>, transform_indices = @transform_8, window_bounds = array<i64: 1, 68>}, {pipeline_mode = #tpu.pipeline_mode<synchronous>, transform_indices = @transform_9, window_bounds = array<i64: 1, 68>}, {pipeline_mode = #tpu.pipeline_mode<synchronous>, transform_indices = @transform_10, window_bounds = array<i64: 68, 128>}, {pipeline_mode = #tpu.pipeline_mode<synchronous>, transform_indices = @transform_11, window_bounds = array<i64: 1, 128>}, {transform_indices = @transform_12, window_bounds = array<i64: 2, 128>}]} {
    %c0 = arith.constant 0 : index
    %c0_0 = arith.constant 0 : index
    %c0_1 = arith.constant 0 : index
    %0 = vector.load %arg1[%c0, %c0_0, %c0_1] : memref<8x2x32xf32, #tpu.memory_space<vmem>>, vector<8x2x32xf32>
    %c0_2 = arith.constant 0 : index
    %c0_3 = arith.constant 0 : index
    %c0_4 = arith.constant 0 : index
    %1 = vector.load %arg2[%c0_2, %c0_3, %c0_4] : memref<1x1x32xf32, #tpu.memory_space<vmem>>, vector<1x1x32xf32>
    %2 = vector.broadcast %1 : vector<1x1x32xf32> to vector<8x2x32xf32>
    %3 = arith.mulf %0, %2 : vector<8x2x32xf32>
    %cst = arith.constant dense<0.000000e+00> : vector<8x2xf32>
    %4 = vector.multi_reduction <add>, %3, %cst [2] : vector<8x2x32xf32> to vector<8x2xf32>
    %5 = vector.shape_cast %4 : vector<8x2xf32> to vector<8x2x1xf32>
    %6 = math.tanh %5 : vector<8x2x1xf32>
    %7 = math.exp %6 : vector<8x2x1xf32>
    %c0_5 = arith.constant 0 : index
    %c0_6 = arith.constant 0 : index
    %c0_7 = arith.constant 0 : index
    %8 = vector.load %arg3[%c0_5, %c0_6, %c0_7] : memref<8x2x1xf32, #tpu.memory_space<vmem>>, vector<8x2x1xf32>
    %9 = arith.mulf %7, %8 : vector<8x2x1xf32>
    %cst_8 = arith.constant dense<0.000000e+00> : vector<2x1xf32>
    %10 = vector.multi_reduction <add>, %9, %cst_8 [0] : vector<8x2x1xf32> to vector<2x1xf32>
    %11 = vector.shape_cast %10 : vector<2x1xf32> to vector<1x2x1xf32>
    %12 = vector.broadcast %11 : vector<1x2x1xf32> to vector<8x2x1xf32>
    %13 = arith.divf %9, %12 : vector<8x2x1xf32>
    %cst_9 = arith.constant 1.000000e-10 : f32
    %14 = vector.broadcast %cst_9 : f32 to vector<8x2x1xf32>
    %15 = arith.addf %13, %14 : vector<8x2x1xf32>
    %16 = vector.broadcast %15 : vector<8x2x1xf32> to vector<8x2x32xf32>
    %17 = arith.mulf %0, %16 : vector<8x2x32xf32>
    %cst_10 = arith.constant dense<0.000000e+00> : vector<2x32xf32>
    %18 = vector.multi_reduction <add>, %17, %cst_10 [0] : vector<8x2x32xf32> to vector<2x32xf32>
    %c0_11 = arith.constant 0 : index
    %c0_12 = arith.constant 0 : index
    %19 = vector.load %arg4[%c0_11, %c0_12] : memref<1x32xf32, #tpu.memory_space<vmem>>, vector<1x32xf32>
    %20 = vector.broadcast %19 : vector<1x32xf32> to vector<2x32xf32>
    %21 = arith.mulf %18, %20 : vector<2x32xf32>
    %c0_13 = arith.constant 0 : index
    %c0_14 = arith.constant 0 : index
    %22 = vector.load %arg5[%c0_13, %c0_14] : memref<1x32xf32, #tpu.memory_space<vmem>>, vector<1x32xf32>
    %23 = vector.broadcast %22 : vector<1x32xf32> to vector<2x32xf32>
    %24 = arith.addf %21, %23 : vector<2x32xf32>
    %25 = arith.truncf %24 : vector<2x32xf32> to vector<2x32xbf16>
    %c0_15 = arith.constant 0 : index
    %c0_16 = arith.constant 0 : index
    %26 = vector.load %arg6[%c0_15, %c0_16] : memref<32x64xbf16, #tpu.memory_space<vmem>>, vector<32x64xbf16>
    %cst_17 = arith.constant dense<0.000000e+00> : vector<2x64xf32>
    %27 = tpu.matmul %25, %26, %cst_17 {dimension_numbers = #tpu.dot_dimension_numbers<[1], [0], [0], [1], [0, 0, 1, 1], [], []>} : vector<2x32xbf16>, vector<32x64xbf16>, vector<2x64xf32> -> vector<2x64xf32>
    %c0_18 = arith.constant 0 : index
    %c0_19 = arith.constant 0 : index
    %28 = vector.load %arg7[%c0_18, %c0_19] : memref<1x64xf32, #tpu.memory_space<vmem>>, vector<1x64xf32>
    %29 = vector.broadcast %28 : vector<1x64xf32> to vector<2x64xf32>
    %30 = arith.addf %27, %29 : vector<2x64xf32>
    %31 = arith.negf %30 : vector<2x64xf32>
    %32 = math.exp %31 : vector<2x64xf32>
    %cst_20 = arith.constant 1.000000e+00 : f32
    %33 = vector.broadcast %cst_20 : f32 to vector<2x64xf32>
    %34 = arith.addf %33, %32 : vector<2x64xf32>
    %35 = arith.divf %33, %34 : vector<2x64xf32>
    %c0_21 = arith.constant 0 : index
    %c0_22 = arith.constant 0 : index
    %36 = vector.load %arg8[%c0_21, %c0_22] : memref<2x4xf32, #tpu.memory_space<vmem>>, vector<2x4xf32>
    %37 = tpu.concatenate %35, %36 in 1 : vector<2x64xf32>, vector<2x4xf32> -> vector<2x68xf32>
    %c0_23 = arith.constant 0 : index
    %c0_24 = arith.constant 0 : index
    %38 = vector.load %arg9[%c0_23, %c0_24] : memref<1x68xf32, #tpu.memory_space<vmem>>, vector<1x68xf32>
    %39 = vector.broadcast %38 : vector<1x68xf32> to vector<2x68xf32>
    %40 = arith.mulf %37, %39 : vector<2x68xf32>
    %c0_25 = arith.constant 0 : index
    %c0_26 = arith.constant 0 : index
    %41 = vector.load %arg10[%c0_25, %c0_26] : memref<1x68xf32, #tpu.memory_space<vmem>>, vector<1x68xf32>
    %42 = vector.broadcast %41 : vector<1x68xf32> to vector<2x68xf32>
    %43 = arith.addf %40, %42 : vector<2x68xf32>
    %44 = arith.truncf %43 : vector<2x68xf32> to vector<2x68xbf16>
    %c0_27 = arith.constant 0 : index
    %c0_28 = arith.constant 0 : index
    %45 = vector.load %arg11[%c0_27, %c0_28] : memref<68x128xbf16, #tpu.memory_space<vmem>>, vector<68x128xbf16>
    %cst_29 = arith.constant dense<0.000000e+00> : vector<2x128xf32>
    %46 = tpu.matmul %44, %45, %cst_29 {dimension_numbers = #tpu.dot_dimension_numbers<[1], [0], [0], [1], [0, 0, 1, 1], [], []>} : vector<2x68xbf16>, vector<68x128xbf16>, vector<2x128xf32> -> vector<2x128xf32>
    %c0_30 = arith.constant 0 : index
    %c0_31 = arith.constant 0 : index
    %47 = vector.load %arg12[%c0_30, %c0_31] : memref<1x128xf32, #tpu.memory_space<vmem>>, vector<1x128xf32>
    %48 = vector.broadcast %47 : vector<1x128xf32> to vector<2x128xf32>
    %49 = arith.addf %46, %48 : vector<2x128xf32>
    %50 = arith.negf %49 : vector<2x128xf32>
    %51 = math.exp %50 : vector<2x128xf32>
    %cst_32 = arith.constant 1.000000e+00 : f32
    %52 = vector.broadcast %cst_32 : f32 to vector<2x128xf32>
    %53 = arith.addf %52, %51 : vector<2x128xf32>
    %54 = arith.divf %52, %53 : vector<2x128xf32>
    %c0_33 = arith.constant 0 : index
    %c0_34 = arith.constant 0 : index
    %55 = vector.load %arg13[%c0_33, %c0_34] : memref<2x128xf32, #tpu.memory_space<vmem>>, vector<2x128xf32>
    tpu.vector_store %arg13[%c0_33, %c0_34], %54 {strides = array<i32>} : memref<2x128xf32, #tpu.memory_space<vmem>>, vector<2x128xf32>,
    return
  }
  func.func @transform_0(%arg0: i32) -> (i32, i32, i32) {
    %c0_i32 = arith.constant 0 : i32
    %c0_i32_0 = arith.constant 0 : i32
    %c0_i32_1 = arith.constant 0 : i32
    return %c0_i32, %arg0, %c0_i32_0 : i32, i32, i32
  }
  func.func @transform_1(%arg0: i32) -> (i32, i32, i32) {
    %c0_i32 = arith.constant 0 : i32
    %c0_i32_0 = arith.constant 0 : i32
    %c0_i32_1 = arith.constant 0 : i32
    %c0_i32_2 = arith.constant 0 : i32
    return %c0_i32, %c0_i32_0, %c0_i32_1 : i32, i32, i32
  }
  func.func @transform_2(%arg0: i32) -> (i32, i32, i32) {
    %c0_i32 = arith.constant 0 : i32
    %c0_i32_0 = arith.constant 0 : i32
    %c0_i32_1 = arith.constant 0 : i32
    return %c0_i32, %arg0, %c0_i32_0 : i32, i32, i32
  }
  func.func @transform_3(%arg0: i32) -> (i32, i32) {
    %c0_i32 = arith.constant 0 : i32
    %c0_i32_0 = arith.constant 0 : i32
    %c0_i32_1 = arith.constant 0 : i32
    return %c0_i32, %c0_i32_0 : i32, i32
  }
  func.func @transform_4(%arg0: i32) -> (i32, i32) {
    %c0_i32 = arith.constant 0 : i32
    %c0_i32_0 = arith.constant 0 : i32
    %c0_i32_1 = arith.constant 0 : i32
    return %c0_i32, %c0_i32_0 : i32, i32
  }
  func.func @transform_5(%arg0: i32) -> (i32, i32) {
    %c0_i32 = arith.constant 0 : i32
    %c0_i32_0 = arith.constant 0 : i32
    %c0_i32_1 = arith.constant 0 : i32
    return %c0_i32, %c0_i32_0 : i32, i32
  }
  func.func @transform_6(%arg0: i32) -> (i32, i32) {
    %c0_i32 = arith.constant 0 : i32
    %c0_i32_0 = arith.constant 0 : i32
    %c0_i32_1 = arith.constant 0 : i32
    return %c0_i32, %c0_i32_0 : i32, i32
  }
  func.func @transform_7(%arg0: i32) -> (i32, i32) {
    %c0_i32 = arith.constant 0 : i32
    %c0_i32_0 = arith.constant 0 : i32
    return %arg0, %c0_i32 : i32, i32
  }
  func.func @transform_8(%arg0: i32) -> (i32, i32) {
    %c0_i32 = arith.constant 0 : i32
    %c0_i32_0 = arith.constant 0 : i32
    %c0_i32_1 = arith.constant 0 : i32
    return %c0_i32, %c0_i32_0 : i32, i32
  }
  func.func @transform_9(%arg0: i32) -> (i32, i32) {
    %c0_i32 = arith.constant 0 : i32
    %c0_i32_0 = arith.constant 0 : i32
    %c0_i32_1 = arith.constant 0 : i32
    return %c0_i32, %c0_i32_0 : i32, i32
  }
  func.func @transform_10(%arg0: i32) -> (i32, i32) {
    %c0_i32 = arith.constant 0 : i32
    %c0_i32_0 = arith.constant 0 : i32
    %c0_i32_1 = arith.constant 0 : i32
    return %c0_i32, %c0_i32_0 : i32, i32
  }
  func.func @transform_11(%arg0: i32) -> (i32, i32) {
    %c0_i32 = arith.constant 0 : i32
    %c0_i32_0 = arith.constant 0 : i32
    %c0_i32_1 = arith.constant 0 : i32
    return %c0_i32, %c0_i32_0 : i32, i32
  }
  func.func @transform_12(%arg0: i32) -> (i32, i32) {
    %c0_i32 = arith.constant 0 : i32
    %c0_i32_0 = arith.constant 0 : i32
    return %arg0, %c0_i32 : i32, i32
  }
}

</mosaic_0001>

<bundles_post_ra>
// kernel: spo_forward.3
= control target key start
LH: loop header
LB: loop body
LE: loop exit
PB: predicated region body
PF: predicated region fallthrough
CT: control target
= control target key end

     0   :  { %s1006_s15 = smov 0   ;;  %s1008_s16 = smov 0   ;;  %s1184_s0 = inlined_call_operand.vmem [shape: f32[5,16,96], index: 0, kind: input, shape index: {}]   ;;  %s1185_s1 = inlined_call_operand.vmem [shape: bf16[32,96], index: 1, kind: input, shape index: {}]   ;;  %s1186_s2 = inlined_call_operand.vmem [shape: f32[1,96], index: 2, kind: input, shape index: {}]   ;;  %s1187_s3 = inlined_call_operand.vmem [shape: f32[16,1], index: 3, kind: input, shape index: {}]   ;;  %s1188_s4 = inlined_call_operand.vmem [shape: f32[16,32], index: 4, kind: output, shape index: {}]  }
   0x1   :  { %s1010_s17 = smov 0  }
   0x2 LB: > { %s801_s18 = sadd.s32 4294967295, %s972_s17   ;;  %s1023_s19 = sadd.s32 1, %s972_s17   ;;  %s972_s17 = sphi %s1010_s17, %s1191_s17   ;;  %s968_s16 = sphi %s1008_s16, %s1190_s16   ;;  %s964_s15 = sphi %s1006_s15, %s1189_s15  }
   0x3   : > { %s18_s20 = ssub.s32 %s972_s17, %s1023_s19  ;;  %s21_s21 = sadd.s32 1, %s968_s16 }
   0x4   : > { %p19_p0 = scmp.eq.s32.totalorder %s18_s20, 0  ;;  %p28_p1 = scmp.ne.s32.totalorder %s968_s16, %s964_s15 }
   0x5   : > { %p29_p2 = scmp.eq.s32.totalorder %s972_s17, 0  ;;  %p804_p4 = scmp.ge.s32.totalorder %s972_s17, 2 }
   0x6   : > { %s1032_s22 = scalar_select %p19_p0, %s968_s16, %s21_s21  }
   0x7   : > { %p30_p3 = por %p29_p2, %p28_p1  ;;  %154 = sbr.rel (%p804_p4) target bundleno = 21 (0x15), region = 24 }
   0xe   : > { %157 = sbr.rel (!%p30_p3) target bundleno = 21 (0x15), region = 28  ;;  %s159_s23 = sand.u32 (%p30_p3), 1, %s968_s16  }
   0xf   : > { %s805_s24 = sshll.u32 (%p30_p3), %s972_s17, 3  ;;  %s884_s25 = smul.u32 (%p30_p3), 40, %s159_s23 }
  0x10   : > { %s163_s28 = scalar_lea.vmem (%p30_p3), %s1184_s0, %s805_s24 }
  0x11   : > { %v199_v0 = vld [vmem:[%s163_s28] sm:$0xff] (%p30_p3)  ;;  %v201_v1 = vld [vmem:[%s163_s28 + $0x10] sm:$0xff] (%p30_p3)  ;;  %s161_s29 = scalar_lea.vmem (%p30_p3), [#allocation3], %s884_s25 }
  0x12   : > { %v203_v2 = vld [vmem:[%s163_s28 + $0x20] sm:$0xff] (%p30_p3)  ;;  %v205_v3 = vld [vmem:[%s163_s28 + $0x30] sm:$0xff] (%p30_p3)  ;;  %200 = vst [vmem:[%s161_s29] sm:$0xff] (%p30_p3), %v199_v0  ;;  %202 = vst [vmem:[%s161_s29 + $0x8] sm:$0xff] (%p30_p3), %v201_v1 }
  0x13   : > { %v207_v4 = vld [vmem:[%s163_s28 + $0x40] sm:$0xff] (%p30_p3)  ;;  %204 = vst [vmem:[%s161_s29 + $0x10] sm:$0xff] (%p30_p3), %v203_v2  ;;  %206 = vst [vmem:[%s161_s29 + $0x18] sm:$0xff] (%p30_p3), %v205_v3 }
  0x14   : > { %208 = vst [vmem:[%s161_s29 + $0x20] sm:$0xff] (%p30_p3), %v207_v4 }
  0x15 PF: > { %p806_p5 = scmp.ge.s32.totalorder %s972_s17, 1  ;;  %p220_p6 = scmp.lt.s32.totalorder %s972_s17, 3 }
  0x17   : > { %p221_p7 = pnand %p806_p5, %p220_p6 }
  0x18   : > { %v1045_v5 = vld [vmem:[%s1185_s1] sm:$0xff] (!%p221_p7)   ;;  %v974_v6 = vmov (!%p221_p7), 0.0   ;;  %v1053_v7 = vld [vmem:[%s1185_s1 + $0x8] sm:$0xff] (!%p221_p7)   ;;  %vm975_vm0 = vmmov (!%p221_p7), 0   ;;  %vm264_vm1 = vcmask (!%p221_p7), 261120   ;;  %s976_s10 = smov (!%p221_p7), 64   ;;  %v271_v35 = vlaneseq (!%p221_p7) }
  0x19   : > { %224 = sbr.rel (%p221_p7) target bundleno = 3551 (0xddf), region = 70  ;;  %844 = vmatprep.subr.bf16.mxu0 (!%p221_p7), %v974_v6  ;;  %852 = vmatprep.subr.bf16.mxu1 (!%p221_p7), %v974_v6  ;;  %265 = vst.msk [vmem:[#allocation2] sm:$0xff] (!%p221_p7), %vm264_vm1, %v974_v6  ;;  %v1082_v10 = vld [vmem:[%s1186_s2] ss:$0 sm:$0xff] (!%p221_p7)  ;;  %s227_s11 = sand.u32 (!%p221_p7), 1, %s964_s15   ;;  %v977_v24 = vmov (!%p221_p7), 0  }
  0x1a   : > { %845 = vmatpush3.bf16.msra.mxu0 (!%p221_p7), %v1045_v5  ;;  %848 = vmatprep.mubr.msk.bf16.mxu0 (!%p221_p7), %vm975_vm0, %v974_v6  ;;  %s885_s12 = smul.u32 (!%p221_p7), 40, %s227_s11  ;;  %p255_p8 = scmp.lt.s32.totalorder (!%p221_p7), %s801_s18, 1  ;;  %v272_v36 = vand.u32 (!%p221_p7), 127, %v271_v35  ;;  %v980_v38 = vmov (!%p221_p7), -1.0   ;;  %vm386_vm3 = vcmask (!%p221_p7), 261248   ;;  %vm728_vm8 = vcmask (!%p221_p7), 130048  }
  0x1b   : > { %846 = vmatprep.subr.bf16.mxu0 (!%p221_p7), %v974_v6  ;;  %853 = vmatpush3.bf16.msra.mxu1 (!%p221_p7), %v1045_v5  ;;  %s978_s23 = smov (!%p221_p7), 96   ;;  %s979_s24 = smov (!%p221_p7), 32  }
  0x1c   : > { %854 = vmatprep.subr.bf16.mxu1 (!%p221_p7), %v974_v6  ;;  %856 = vmatprep.mubr.msk.bf16.mxu1 (!%p221_p7), %vm975_vm0, %v974_v6  ;;  %s1087_s13 = scalar_lea.vmem (!%p221_p7), [#allocation3], %s885_s12  ;;  %vm273_vm2 = vcmp.lt.s32.totalorder (!%p221_p7), %v272_v36, 16 }
  0x1d   : > { %v284_v16 = vld [vmem:[%s1087_s13] sm:$0xff] (!%p221_p7)  ;;  %917 = vset.pattern.permute.xlu0 (!%p221_p7), %v977_v24  ;;  %v1105_v39 = vsel (!%p221_p7), %vm273_vm2, 1.0, %v980_v38  ;;  %v815_v53 = vld [vmem:[%s1087_s13 + $0x8] sm:$0xff] (!%p221_p7) }
  0x1e   : > { %847 = vmatpush3.bf16.msra.mxu0 (!%p221_p7), %v1053_v7  ;;  %v377_v41 = vmul.f32 (!%p221_p7), 0.0, %v1105_v39 }
  0x1f   : > { %855 = vmatpush3.bf16.msra.mxu1 (!%p221_p7), %v1053_v7  ;;  %860 = vmatprep.subr.bf16.mxu0 (!%p221_p7), %v974_v6 }
  0x20   : > { %868 = vmatprep.subr.bf16.mxu1 %v974_v6  ;;  %v1068_v8 = vld [vmem:[#allocation2] sm:$0xff]  ;;  %s1193_s18 = smov (!%p255_p8, %s801_s18), 1 }
  0x21   : > { %v285_v9 = vpack.c.bf16 %v1068_v8, %v1068_v8  ;;  %s807_s14 = sshll.u32 %s1193_s18, 3 }
  0x22   : > { %s258_s21 = scalar_lea.vmem %s1187_s3, %s807_s14  ;;  %s1113_s25 = scalar_lea.vmem %s1188_s4, %s807_s14 }
  0x23   : > { %849 = vmatmul.mubr.msk.bf16.vlgmr.msra.gmra.mrb[0].mxu0 %vm264_vm1, %v285_v9  ;;  %v274_v25 = vld [vmem:[%s258_s21] sm:$0xff] }
  0x24   : > { %861 = vmatpush3.bf16.msra.mxu0 %v1045_v5  ;;  %864 = vmatprep.mubr.msk.bf16.mxu0 %vm975_vm0, %v974_v6 }
  0x25   : > { %862 = vmatprep.subr.bf16.mxu0 %v974_v6 }
  0x28   : > { %863 = vmatpush3.bf16.msra.mxu0 %v1053_v7 }
  0x29   : > { %876 = vmatprep.subr.bf16.mxu0 %v974_v6 }
  0xf6   : > { %v341_v11 = vpop.f32.mrb[0].mxu0 }
  0xf7   : > { %v342_v12 = vadd.f32 %v1082_v10, %v341_v11  ;;  %v850_v13 = vpop.f32.mrb[1].mxu0 }
  0xf8   : > { %v344_v14 = vpop.f32.mrb[2].mxu0 }
  0xf9   : > { %355 = vrot.lane.b32.xlu0 %v342_v12, %s976_s10  ;;  %v851_v15 = vpop.f32.mrb[3].mxu0  ;;  %v347_v17 = vadd.f32 %v342_v12, %v284_v16 }
  0xfb   : > { %v814_v18 = vmul.f32 -1.442695, %v347_v17 }
  0xfd   : > { %920 = vpow2.f32 %v814_v18 }
 0x107   : > { %v921_v19 = vpop.eup %920 }
 0x108   : > { %v351_v20 = vadd.f32 1.0, %v921_v19  ;;  %v818_v19 = vld [vmem:[%s1087_s13 + $0x10] sm:$0xff] }
 0x10a   : > { %922 = vrcp.f32 %v351_v20 }
 0x114   : > { %v923_v21 = vpop.eup %922 }
 0x115   : > { %v365_v30 = vsub.f32 1.0, %v923_v21 }
 0x16b   : > { %v356_v22 = vpop.permute.xlu0 %355 }
 0x16c   : > { %v358_v23 = vmul.f32 %v923_v21, %v356_v22 }
 0x16e   : > { %360 = vrot.lane.b32.xlu0 %v358_v23, %s976_s10 }
 0x172   : > { %277 = vperm.xlu0 %917, %v274_v25  }
 0x1e0   : > { %v361_v26 = vpop.permute.xlu0 %360 }
 0x1e1   : > { %v363_v27 = vadd.f32 %v361_v26, %v284_v16 }
 0x1e3   : > { %924 = vtanh.f32 %v363_v27 }
 0x1ed   : > { %v925_v28 = vpop.eup %924 }
 0x1ee   : > { %367 = vrot.lane.b32.xlu1 %v925_v28, %s978_s23 }
 0x1f1   : > { %v278_v37 = vpop.permute.xlu0 %277 }
 0x1f2   : > { %372 = vrot.lane.b32.xlu1 %v1068_v8, %s979_s24  ;;  %v809_v40 = vadd.f32 -4.0, %v278_v37 }
 0x1f4   : > { %v1108_v42 = vsel %vm273_vm2, %v278_v37, %v809_v40 }
 0x1f5   : > { %vm378_vm4 = vcmp.lt.f32.partialorder %v377_v41, %v1108_v42  ;;  %vm465_vm5 = vcmp.lt.f32.partialorder %v1105_v39, %v1108_v42 }
 0x260   : > { %v368_v29 = vpop.permute.xlu1 %367 }
 0x261   : > { %v370_v32 = vmul.f32 %v368_v29, %v365_v30 }
 0x264   : > { %v373_v31 = vpop.permute.xlu1 %372 }
 0x265   : > { %v375_v33 = vmul.f32 %v923_v21, %v373_v31 }
 0x267   : > { %v376_v34 = vadd.f32 %v375_v33, %v370_v32  ;;  %v549_v33 = vmul.f32 2.0, %v1105_v39 }
 0x269   : > { %380 = vrot.lane.b32.xlu1 %v376_v34, %s978_s23  ;;  %vm550_vm6 = vcmp.lt.f32.partialorder %v549_v33, %v1108_v42 }
 0x2db   : > { %v381_v43 = vpop.permute.xlu1 %380 }
 0x2dc   : > { %v383_v44 = vsel %vm378_vm4, %v381_v43, %v1068_v8  ;;  %v385_v45 = vsel %vm378_vm4, %v381_v43, 0.0 }
 0x2dd   : > { %384 = vst.msk [vmem:[#allocation2] sm:$0xff] %vm264_vm1, %v383_v44 }
 0x2de   : > { %387 = vst.msk [vmem:[%s1113_s25] sm:$0xff] %vm386_vm3, %v385_v45  ;;  %v821_v45 = vld [vmem:[%s1087_s13 + $0x18] sm:$0xff] }
 0x2e4   : > { %v388_v46 = vld [vmem:[#allocation2] sm:$0xff] }
 0x2e5   : > { %v391_v47 = vpack.c.bf16 %v388_v46, %v388_v46 }
 0x2e7   : > { %857 = vmatmul.mubr.msk.bf16.vlgmr.msra.gmra.mrb[0].mxu1 %vm264_vm1, %v391_v47 }
 0x2e8   : > { %869 = vmatpush3.bf16.msra.mxu1 %v1045_v5  ;;  %872 = vmatprep.mubr.msk.bf16.mxu1 %vm975_vm0, %v974_v6 }
 0x2e9   : > { %870 = vmatprep.subr.bf16.mxu1 %v974_v6 }
 0x2ec   : > { %871 = vmatpush3.bf16.msra.mxu1 %v1053_v7 }
 0x3ba   : > { %v429_v48 = vpop.f32.mrb[0].mxu1 }
 0x3bb   : > { %v430_v49 = vadd.f32 %v1082_v10, %v429_v48  ;;  %v858_v50 = vpop.f32.mrb[1].mxu1 }
 0x3bc   : > { %v432_v51 = vpop.f32.mrb[2].mxu1 }
 0x3bd   : > { %443 = vrot.lane.b32.xlu1 %v430_v49, %s976_s10  ;;  %v859_v52 = vpop.f32.mrb[3].mxu1  ;;  %v435_v54 = vadd.f32 %v815_v53, %v430_v49 }
 0x3bf   : > { %v817_v55 = vmul.f32 -1.442695, %v435_v54 }
 0x3c1   : > { %926 = vpow2.f32 %v817_v55 }
 0x3cb   : > { %v927_v56 = vpop.eup %926 }
 0x3cc   : > { %v439_v57 = vadd.f32 1.0, %v927_v56 }
 0x3ce   : > { %928 = vrcp.f32 %v439_v57 }
 0x3d8   : > { %v929_v58 = vpop.eup %928 }
 0x3d9   : > { %v453_v1 = vsub.f32 1.0, %v929_v58 }
 0x42f   : > { %v444_v59 = vpop.permute.xlu1 %443 }
 0x430   : > { %v446_v60 = vmul.f32 %v929_v58, %v444_v59 }
 0x432   : > { %448 = vrot.lane.b32.xlu0 %v446_v60, %s976_s10 }
 0x436   : > { %460 = vrot.lane.b32.xlu0 %v388_v46, %s979_s24 }
 0x4a4   : > { %v449_v61 = vpop.permute.xlu0 %448 }
 0x4a5   : > { %v451_v62 = vadd.f32 %v815_v53, %v449_v61 }
 0x4a7   : > { %930 = vtanh.f32 %v451_v62  ;;  %v634_v62 = vmul.f32 3.0, %v1105_v39 }
 0x4a8   : > { %v461_v0 = vpop.permute.xlu0 %460 }
 0x4a9   : > { %v463_v3 = vmul.f32 %v929_v58, %v461_v0  ;;  %vm635_vm7 = vcmp.lt.f32.partialorder %v634_v62, %v1108_v42 }
 0x4b1   : > { %v931_v63 = vpop.eup %930 }
 0x4b2   : > { %455 = vrot.lane.b32.xlu1 %v931_v63, %s978_s23 }
 0x524   : > { %v456_v2 = vpop.permute.xlu1 %455 }
 0x525   : > { %v458_v4 = vmul.f32 %v456_v2, %v453_v1 }
 0x527   : > { %v464_v8 = vadd.f32 %v463_v3, %v458_v4 }
 0x529   : > { %467 = vrot.lane.b32.xlu1 %v464_v8, %s978_s23 }
 0x59b   : > { %v468_v9 = vpop.permute.xlu1 %467 }
 0x59c   : > { %v470_v11 = vsel %vm465_vm5, %v468_v9, %v388_v46 }
 0x59d   : > { %471 = vst.msk [vmem:[#allocation2] sm:$0xff] %vm264_vm1, %v470_v11 }
 0x5a4   : > { %v472_v12 = vld [vmem:[#allocation2] sm:$0xff] }
 0x5a5   : > { %v475_v13 = vpack.c.bf16 %v472_v12, %v472_v12 }
 0x5a7   : > { %865 = vmatmul.mubr.msk.bf16.vlgmr.msra.gmra.mrb[4].mxu0 %vm264_vm1, %v475_v13 }
 0x5a8   : > { %877 = vmatpush3.bf16.msra.mxu0 %v1045_v5  ;;  %880 = vmatprep.mubr.msk.bf16.mxu0 %vm975_vm0, %v974_v6 }
 0x5a9   : > { %878 = vmatprep.subr.bf16.mxu0 %v974_v6 }
 0x5ac   : > { %879 = vmatpush3.bf16.msra.mxu0 %v1053_v7 }
 0x67a   : > { %v513_v14 = vpop.f32.mrb[4].mxu0 }
 0x67b   : > { %v514_v15 = vadd.f32 %v1082_v10, %v513_v14  ;;  %v866_v16 = vpop.f32.mrb[5].mxu0 }
 0x67c   : > { %v516_v17 = vpop.f32.mrb[6].mxu0 }
 0x67d   : > { %527 = vrot.lane.b32.xlu0 %v514_v15, %s976_s10  ;;  %v867_v18 = vpop.f32.mrb[7].mxu0  ;;  %v519_v20 = vadd.f32 %v818_v19, %v514_v15 }
 0x67f   : > { %v820_v21 = vmul.f32 -1.442695, %v519_v20 }
 0x681   : > { %932 = vpow2.f32 %v820_v21 }
 0x68b   : > { %v933_v5 = vpop.eup %932 }
 0x68c   : > { %v523_v22 = vadd.f32 1.0, %v933_v5 }
 0x68e   : > { %934 = vrcp.f32 %v523_v22 }
 0x698   : > { %v935_v23 = vpop.eup %934 }
 0x699   : > { %v537_v28 = vsub.f32 1.0, %v935_v23 }
 0x6ef   : > { %v528_v24 = vpop.permute.xlu0 %527 }
 0x6f0   : > { %v530_v6 = vmul.f32 %v935_v23, %v528_v24 }
 0x6f2   : > { %532 = vrot.lane.b32.xlu1 %v530_v6, %s976_s10 }
 0x6f6   : > { %544 = vrot.lane.b32.xlu1 %v472_v12, %s979_s24 }
 0x764   : > { %v533_v7 = vpop.permute.xlu1 %532 }
 0x765   : > { %v535_v25 = vadd.f32 %v818_v19, %v533_v7 }
 0x767   : > { %936 = vtanh.f32 %v535_v25  ;;  %v719_v25 = vmul.f32 4.0, %v1105_v39 }
 0x768   : > { %v545_v27 = vpop.permute.xlu1 %544 }
 0x769   : > { %v547_v30 = vmul.f32 %v935_v23, %v545_v27  ;;  %vm720_vm9 = vcmp.lt.f32.partialorder %v719_v25, %v1108_v42 }
 0x771   : > { %v937_v26 = vpop.eup %936 }
 0x772   : > { %539 = vrot.lane.b32.xlu0 %v937_v26, %s978_s23 }
 0x7e4   : > { %v540_v29 = vpop.permute.xlu0 %539 }
 0x7e5   : > { %v542_v31 = vmul.f32 %v540_v29, %v537_v28 }
 0x7e7   : > { %v548_v32 = vadd.f32 %v547_v30, %v542_v31 }
 0x7e9   : > { %552 = vrot.lane.b32.xlu0 %v548_v32, %s978_s23 }
 0x85b   : > { %v553_v34 = vpop.permute.xlu0 %552 }
 0x85c   : > { %v555_v35 = vsel %vm550_vm6, %v553_v34, %v472_v12  ;;  %v824_v12 = vld [vmem:[%s1087_s13 + $0x20] sm:$0xff] }
 0x85d   : > { %556 = vst.msk [vmem:[#allocation2] sm:$0xff] %vm264_vm1, %v555_v35 }
 0x864   : > { %v557_v36 = vld [vmem:[#allocation2] sm:$0xff] }
 0x865   : > { %v560_v37 = vpack.c.bf16 %v557_v36, %v557_v36 }
 0x867   : > { %873 = vmatmul.mubr.msk.bf16.vlgmr.msra.gmra.mrb[4].mxu1 %vm264_vm1, %v560_v37 }
 0x93a   : > { %v598_v38 = vpop.f32.mrb[4].mxu1 }
 0x93b   : > { %v599_v40 = vadd.f32 %v1082_v10, %v598_v38  ;;  %v874_v41 = vpop.f32.mrb[5].mxu1 }
 0x93c   : > { %v601_v43 = vpop.f32.mrb[6].mxu1 }
 0x93d   : > { %612 = vrot.lane.b32.xlu1 %v599_v40, %s976_s10  ;;  %v875_v44 = vpop.f32.mrb[7].mxu1  ;;  %v604_v46 = vadd.f32 %v821_v45, %v599_v40 }
 0x93f   : > { %v823_v47 = vmul.f32 -1.442695, %v604_v46 }
 0x941   : > { %938 = vpow2.f32 %v823_v47 }
 0x94b   : > { %v939_v48 = vpop.eup %938 }
 0x94c   : > { %v608_v49 = vadd.f32 1.0, %v939_v48 }
 0x94e   : > { %940 = vrcp.f32 %v608_v49 }
 0x958   : > { %v941_v50 = vpop.eup %940 }
 0x959   : > { %v622_v57 = vsub.f32 1.0, %v941_v50 }
 0x9af   : > { %v613_v51 = vpop.permute.xlu1 %612 }
 0x9b0   : > { %v615_v52 = vmul.f32 %v941_v50, %v613_v51 }
 0x9b2   : > { %617 = vrot.lane.b32.xlu0 %v615_v52, %s976_s10 }
 0x9b6   : > { %629 = vrot.lane.b32.xlu0 %v557_v36, %s979_s24 }
 0xa24   : > { %v618_v53 = vpop.permute.xlu0 %617 }
 0xa25   : > { %v620_v54 = vadd.f32 %v821_v45, %v618_v53 }
 0xa27   : > { %942 = vtanh.f32 %v620_v54 }
 0xa28   : > { %v630_v56 = vpop.permute.xlu0 %629 }
 0xa29   : > { %v632_v59 = vmul.f32 %v941_v50, %v630_v56 }
 0xa31   : > { %v943_v55 = vpop.eup %942 }
 0xa32   : > { %624 = vrot.lane.b32.xlu1 %v943_v55, %s978_s23 }
 0xaa4   : > { %v625_v58 = vpop.permute.xlu1 %624 }
 0xaa5   : > { %v627_v60 = vmul.f32 %v625_v58, %v622_v57 }
 0xaa7   : > { %v633_v61 = vadd.f32 %v632_v59, %v627_v60 }
 0xaa9   : > { %637 = vrot.lane.b32.xlu1 %v633_v61, %s978_s23 }
 0xb1b   : > { %v638_v63 = vpop.permute.xlu1 %637 }
 0xb1c   : > { %v640_v0 = vsel %vm635_vm7, %v638_v63, %v557_v36 }
 0xb1d   : > { %641 = vst.msk [vmem:[#allocation2] sm:$0xff] %vm264_vm1, %v640_v0 }
 0xb24   : > { %v642_v1 = vld [vmem:[#allocation2] sm:$0xff] }
 0xb25   : > { %v645_v2 = vpack.c.bf16 %v642_v1, %v642_v1 }
 0xb27   : > { %881 = vmatmul.mubr.msk.bf16.vlgmr.msra.gmra.mrb[8].mxu0 %vm264_vm1, %v645_v2 }
 0xbfa   : > { %v683_v3 = vpop.f32.mrb[8].mxu0 }
 0xbfb   : > { %v684_v4 = vadd.f32 %v1082_v10, %v683_v3  ;;  %v882_v8 = vpop.f32.mrb[9].mxu0 }
 0xbfc   : > { %v686_v9 = vpop.f32.mrb[10].mxu0 }
 0xbfd   : > { %697 = vrot.lane.b32.xlu0 %v684_v4, %s976_s10  ;;  %v883_v11 = vpop.f32.mrb[11].mxu0  ;;  %v689_v13 = vadd.f32 %v824_v12, %v684_v4 }
 0xbff   : > { %v826_v14 = vmul.f32 -1.442695, %v689_v13 }
 0xc01   : > { %944 = vpow2.f32 %v826_v14 }
 0xc0b   : > { %v945_v15 = vpop.eup %944 }
 0xc0c   : > { %v693_v16 = vadd.f32 1.0, %v945_v15 }
 0xc0e   : > { %946 = vrcp.f32 %v693_v16 }
 0xc18   : > { %v947_v17 = vpop.eup %946 }
 0xc19   : > { %v707_v22 = vsub.f32 1.0, %v947_v17 }
 0xc6f   : > { %v698_v18 = vpop.permute.xlu0 %697 }
 0xc70   : > { %v700_v19 = vmul.f32 %v947_v17, %v698_v18 }
 0xc72   : > { %702 = vrot.lane.b32.xlu1 %v700_v19, %s976_s10 }
 0xc76   : > { %714 = vrot.lane.b32.xlu1 %v642_v1, %s979_s24 }
 0xce4   : > { %v703_v10 = vpop.permute.xlu1 %702 }
 0xce5   : > { %v705_v20 = vadd.f32 %v824_v12, %v703_v10 }
 0xce7   : > { %948 = vtanh.f32 %v705_v20 }
 0xce8   : > { %v715_v5 = vpop.permute.xlu1 %714 }
 0xce9   : > { %v717_v24 = vmul.f32 %v947_v17, %v715_v5 }
 0xcf1   : > { %v949_v21 = vpop.eup %948 }
 0xcf2   : > { %709 = vrot.lane.b32.xlu0 %v949_v21, %s978_s23 }
 0xd64   : > { %v710_v23 = vpop.permute.xlu0 %709 }
 0xd65   : > { %v712_v6 = vmul.f32 %v710_v23, %v707_v22 }
 0xd67   : > { %v718_v7 = vadd.f32 %v717_v24, %v712_v6 }
 0xd69   : > { %722 = vrot.lane.b32.xlu0 %v718_v7, %s978_s23 }
 0xddb   : > { %v723_v26 = vpop.permute.xlu0 %722 }
 0xddc   : > { %v725_v27 = vsel %vm720_vm9, %v723_v26, %v642_v1  ;;  %v727_v28 = vsel %vm720_vm9, %v723_v26, 0.0 }
 0xddd   : > { %726 = vst.msk [vmem:[#allocation2] sm:$0xff] %vm264_vm1, %v725_v27 }
 0xdde   : > { %729 = vst.msk [vmem:[%s1113_s25] sm:$0xff] %vm728_vm8, %v727_v28 }
 0xddf PF: > { %p11_p9 = scmp.ge.s32.totalorder %s1023_s19, 4   ;;  %s1189_s15 = smov %s968_s16 }
 0xde0   : > { %s1190_s16 = smov %s1032_s22  ;;  %s1191_s17 = smov %s1023_s19 }
 0xde1   :  { %13 = sbr.rel (!%p11_p9) target bundleno = 2 (0x2), region = 116 }

// kernel: spo_forward.5
= control target key start
LH: loop header
LB: loop body
LE: loop exit
PB: predicated region body
PF: predicated region fallthrough
CT: control target
= control target key end

     0   :  { %vm66_vm0 = vcmask 254976   ;;  %s813_s0 = inlined_call_operand.vmem [shape: f32[8,2,32], index: 0, kind: input, shape index: {}]   ;;  %s814_s1 = inlined_call_operand.vmem [shape: f32[1,1,32], index: 1, kind: input, shape index: {}]   ;;  %s815_s2 = inlined_call_operand.vmem [shape: f32[8,2,1], index: 2, kind: input, shape index: {}]   ;;  %s816_s3 = inlined_call_operand.vmem [shape: f32[1,32], index: 3, kind: input, shape index: {}]   ;;  %s817_s4 = inlined_call_operand.vmem [shape: f32[1,32], index: 4, kind: input, shape index: {}]   ;;  %s818_s5 = inlined_call_operand.vmem [shape: bf16[32,64], index: 5, kind: input, shape index: {}]   ;;  %s819_s6 = inlined_call_operand.vmem [shape: f32[1,64], index: 6, kind: input, shape index: {}]   ;;  %s820_s7 = inlined_call_operand.vmem [shape: f32[2,4], index: 7, kind: input, shape index: {}]   ;;  %s821_s8 = inlined_call_operand.vmem [shape: f32[1,68], index: 8, kind: input, shape index: {}]   ;;  %s822_s9 = inlined_call_operand.vmem [shape: f32[1,68], index: 9, kind: input, shape index: {}]   ;;  %s823_s10 = inlined_call_operand.vmem [shape: bf16[68,128], index: 10, kind: input, shape index: {}]   ;;  %s824_s11 = inlined_call_operand.vmem [shape: f32[1,128], index: 11, kind: input, shape index: {}]   ;;  %s825_s12 = inlined_call_operand.hbm [shape: f32[2,128], index: 12, kind: output, shape index: {}]  }
   0x1   :  { %v655_v0 = vld [vmem:[%s813_s0] sm:$0x3]  ;;  %v664_v3 = vld [vmem:[%s813_s0 + $0x4] sm:$0x3]  ;;  %v669_v4 = vld [vmem:[%s813_s0 + $0x2] sm:$0x3] }
   0x2   :  { %v453_v1 = vld [vmem:[%s814_s1] ss:$0 sm:$0xff]  ;;  %v674_v5 = vld [vmem:[%s813_s0 + $0x6] sm:$0x3]  ;;  %v682_v9 = vld [vmem:[%s813_s0 + $0x8] sm:$0x3] }
   0x3   :  { %v58_v2 = vmul.f32 %v453_v1, %v655_v0  ;;  %v60_v6 = vmul.f32 %v453_v1, %v664_v3  ;;  %v59_v7 = vmul.f32 %v453_v1, %v669_v4  ;;  %v61_v8 = vmul.f32 %v453_v1, %v674_v5  ;;  %v689_v12 = vld [vmem:[%s813_s0 + $0xa] sm:$0x3]  ;;  %v695_v14 = vld [vmem:[%s813_s0 + $0xc] sm:$0x3]  ;;  %v701_v16 = vld [vmem:[%s813_s0 + $0xe] sm:$0x3] }
   0x4   :  { %v62_v11 = vmul.f32 %v453_v1, %v682_v9  ;;  %v63_v19 = vmul.f32 %v453_v1, %v689_v12  ;;  %v64_v20 = vmul.f32 %v453_v1, %v695_v14 }
   0x5   :  { %v67_v10 = vsel %vm66_vm0, %v58_v2, 0.0  ;;  %v73_v13 = vsel %vm66_vm0, %v60_v6, 0.0  ;;  %v70_v15 = vsel %vm66_vm0, %v59_v7, 0.0  ;;  %v76_v17 = vsel %vm66_vm0, %v61_v8, 0.0 }
   0x6   :  { %68 = vadd.xlane.f32.xlu0 %v67_v10  ;;  %74 = vadd.xlane.f32.xlu1 %v73_v13  ;;  %v79_v18 = vsel %vm66_vm0, %v62_v11, 0.0 }
   0xa   :  { %71 = vadd.xlane.f32.xlu0 %v70_v15  ;;  %77 = vadd.xlane.f32.xlu1 %v76_v17 }
   0xb   :  { %17 = vsyncpa [#allocation3], 0  ;;  %v82_v21 = vsel %vm66_vm0, %v63_v19, 0.0  ;;  %v65_v22 = vmul.f32 %v453_v1, %v701_v16  ;;  %v85_v23 = vsel %vm66_vm0, %v64_v20, 0.0  ;;  %v582_v25 = vmov 0   ;;  %s585_s20 = smov 64  }
   0xc   :  { %508 = vset.pattern.permute.xlu1 %v582_v25  ;;  %507 = vset.pattern.permute.xlu0 %v582_v25  ;;  %v115_v49 = vld [vmem:[%s815_s2] sm:$0x3]  ;;  %v116_v52 = vld [vmem:[%s815_s2 + $0x2] sm:$0x3]  ;;  %v117_v53 = vld [vmem:[%s815_s2 + $0x4] sm:$0x3] }
   0xd   :  { %v88_v24 = vsel %vm66_vm0, %v65_v22, 0.0  ;;  %v118_v54 = vld [vmem:[%s815_s2 + $0x6] sm:$0x3]  ;;  %vm131_vm1 = vcmask 1024   ;;  %v119_v62 = vld [vmem:[%s815_s2 + $0x8] sm:$0x3] }
   0xe   :  { %80 = vadd.xlane.f32.xlu0 %v79_v18  ;;  %83 = vadd.xlane.f32.xlu1 %v82_v21  ;;  %v120_v63 = vld [vmem:[%s815_s2 + $0xa] sm:$0x3]  ;;  %v121_v17 = vld [vmem:[%s815_s2 + $0xc] sm:$0x3]  ;;  %vm584_vm2 = vmmov 0   ;;  %vm267_vm3 = vcmask 261120  }
   0xf   :  { %vm388_vm4 = vcmask 1041408   ;;  %vm322_vm5 = vcmask 523264   ;;  %vm384_vm6 = vcmask 556032  }
  0x12   :  { %86 = vadd.xlane.f32.xlu0 %v85_v23  ;;  %89 = vadd.xlane.f32.xlu1 %v88_v24  ;;  %v122_v24 = vld [vmem:[%s815_s2 + $0xe] sm:$0x3] }
  0x93   :  { %v69_v26 = vpop.xlane.xlu0 %68  ;;  %v75_v27 = vpop.xlane.xlu1 %74 }
  0x94   :  { %516 = vtanh.f32 %v69_v26 }
  0x95   :  { %518 = vtanh.f32 %v75_v27 }
  0x97   :  { %v72_v28 = vpop.xlane.xlu0 %71  ;;  %v78_v29 = vpop.xlane.xlu1 %77 }
  0x98   :  { %520 = vtanh.f32 %v72_v28 }
  0x99   :  { %522 = vtanh.f32 %v78_v29 }
  0x9b   :  { %v81_v30 = vpop.xlane.xlu0 %80  ;;  %v84_v31 = vpop.xlane.xlu1 %83 }
  0x9c   :  { %524 = vtanh.f32 %v81_v30 }
  0x9d   :  { %526 = vtanh.f32 %v84_v31 }
  0x9e   :  { %v517_v32 = vpop.eup %516 }
  0x9f   :  { %v519_v33 = vpop.eup %518  ;;  %v99_v34 = vmul.f32 1.442695, %v517_v32  ;;  %v87_v35 = vpop.xlane.xlu0 %86 }
  0xa0   :  { %v103_v36 = vmul.f32 1.442695, %v519_v33  ;;  %528 = vtanh.f32 %v87_v35  ;;  %v90_v37 = vpop.xlane.xlu1 %89 }
  0xa1   :  { %530 = vpow2.f32 %v99_v34 }
  0xa2   :  { %v521_v38 = vpop.eup %520  ;;  %532 = vpow2.f32 %v103_v36 }
  0xa3   :  { %v523_v39 = vpop.eup %522  ;;  %v101_v40 = vmul.f32 1.442695, %v521_v38  ;;  %534 = vtanh.f32 %v90_v37 }
  0xa4   :  { %v105_v41 = vmul.f32 1.442695, %v523_v39 }
  0xa5   :  { %536 = vpow2.f32 %v101_v40 }
  0xa6   :  { %v525_v42 = vpop.eup %524  ;;  %538 = vpow2.f32 %v105_v41 }
  0xa7   :  { %v527_v43 = vpop.eup %526  ;;  %v107_v44 = vmul.f32 1.442695, %v525_v42 }
  0xa8   :  { %v109_v45 = vmul.f32 1.442695, %v527_v43 }
  0xa9   :  { %540 = vpow2.f32 %v107_v44 }
  0xaa   :  { %v529_v46 = vpop.eup %528  ;;  %542 = vpow2.f32 %v109_v45 }
  0xab   :  { %v531_v47 = vpop.eup %530  ;;  %v111_v48 = vmul.f32 1.442695, %v529_v46 }
  0xac   :  { %v533_v50 = vpop.eup %532  ;;  %v123_v56 = vmul.f32 %v531_v47, %v115_v49 }
  0xad   :  { %v535_v51 = vpop.eup %534  ;;  %544 = vpow2.f32 %v111_v48  ;;  %v125_v60 = vmul.f32 %v533_v50, %v117_v53  ;;  %v509_v50 = vld [vmem:[%s818_s5] sm:$0xff]  }
  0xae   :  { %v113_v55 = vmul.f32 1.442695, %v535_v51  ;;  %v132_v1 = vsel %vm131_vm1, %v123_v56, 0.0  ;;  %v583_v51 = vmov 0.0   ;;  %v317_v53 = vld [vmem:[%s820_s7] sm:$0x3] }
  0xaf   :  { %v537_v57 = vpop.eup %536  ;;  %v135_v11 = vsel %vm131_vm1, %v125_v60, 0.0  ;;  %480 = vmatprep.subr.bf16.mxu0 %v583_v51  ;;  %488 = vmatprep.subr.bf16.mxu1 %v583_v51 }
  0xb0   :  { %v539_v58 = vpop.eup %538  ;;  %546 = vpow2.f32 %v113_v55  ;;  %v124_v59 = vmul.f32 %v537_v57, %v116_v52  ;;  %481 = vmatpush3.bf16.msra.mxu0 %v509_v50  ;;  %v510_v52 = vld [vmem:[%s818_s5 + $0x8] sm:$0xff]   ;;  %484 = vmatprep.mubr.msk.bf16.mxu0 %vm584_vm2, %v583_v51 }
  0xb1   :  { %v126_v61 = vmul.f32 %v539_v58, %v118_v54  ;;  %482 = vmatprep.subr.bf16.mxu0 %v583_v51  ;;  %498 = vmatprep.mubr.msk.bf16.mxu1 %vm584_vm2, %v583_v51 }
  0xb2   :  { %v133_v2 = vsel %vm131_vm1, %v124_v59, 0.0 }
  0xb3   :  { %v541_v6 = vpop.eup %540  ;;  %v134_v7 = vadd.f32 %v133_v2, %v132_v1  ;;  %v137_v13 = vsel %vm131_vm1, %v126_v61, 0.0 }
  0xb4   :  { %v543_v8 = vpop.eup %542  ;;  %v127_v10 = vmul.f32 %v541_v6, %v119_v62  ;;  %483 = vmatpush3.bf16.msra.mxu0 %v510_v52 }
  0xb5   :  { %v128_v15 = vmul.f32 %v543_v8, %v120_v63  ;;  %v136_v18 = vadd.f32 %v135_v11, %v134_v7 }
  0xb6   :  { %v139_v19 = vsel %vm131_vm1, %v127_v10, 0.0 }
  0xb7   :  { %v545_v20 = vpop.eup %544  ;;  %v138_v21 = vadd.f32 %v137_v13, %v136_v18  ;;  %v141_v22 = vsel %vm131_vm1, %v128_v15, 0.0 }
  0xb8   :  { %v129_v23 = vmul.f32 %v545_v20, %v121_v17 }
  0xb9   :  { %v140_v25 = vadd.f32 %v139_v19, %v138_v21 }
  0xba   :  { %v547_v26 = vpop.eup %546  ;;  %v143_v27 = vsel %vm131_vm1, %v129_v23, 0.0 }
  0xbb   :  { %v130_v28 = vmul.f32 %v547_v26, %v122_v24  ;;  %v142_v29 = vadd.f32 %v141_v22, %v140_v25  ;;  %v455_v24 = vld [vmem:[%s817_s4] ss:$0 sm:$0xff] }
  0xbd   :  { %v145_v30 = vsel %vm131_vm1, %v130_v28, 0.0  ;;  %v144_v31 = vadd.f32 %v143_v27, %v142_v29  ;;  %v512_v27 = vld [vmem:[%s823_s10 + $0x8] sm:$0xff]   ;;  %v514_v29 = vld [vmem:[%s823_s10 + $0x18] sm:$0xff]  }
  0xbf   :  { %v146_v32 = vadd.f32 %v145_v30, %v144_v31  ;;  %v515_v30 = vld [vmem:[%s823_s10 + $0x20] ss:$0 sps:$4 sm:$0x33]  }
  0xc0   :  { %v390_v31 = vsel %vm388_vm4, %v515_v30, 0 }
  0xc1   :  { %548 = vrcp.f32 %v146_v32  ;;  %v456_v32 = vld [vmem:[%s819_s6] ss:$0 sm:$0xff] }
  0xcb   :  { %v549_v33 = vpop.eup %548 }
  0xcc   :  { %v149_v34 = vmul.f32 %v549_v33, %v124_v59  ;;  %v148_v35 = vmul.f32 %v549_v33, %v123_v56  ;;  %v150_v38 = vmul.f32 %v549_v33, %v125_v60  ;;  %v151_v40 = vmul.f32 %v549_v33, %v126_v61 }
  0xcd   :  { %v152_v42 = vmul.f32 %v549_v33, %v127_v10  ;;  %v153_v44 = vmul.f32 %v549_v33, %v128_v15  ;;  %v154_v46 = vmul.f32 %v549_v33, %v129_v23  ;;  %v155_v48 = vmul.f32 %v549_v33, %v130_v28  ;;  %v513_v28 = vld [vmem:[%s823_s10 + $0x10] sm:$0xff]  }
  0xce   :  { %v157_v36 = vadd.f32 1e-10, %v149_v34  ;;  %v156_v37 = vadd.f32 1e-10, %v148_v35  ;;  %v158_v39 = vadd.f32 1e-10, %v150_v38 }
  0xcf   :  { %v159_v41 = vadd.f32 1e-10, %v151_v40  ;;  %v160_v43 = vadd.f32 1e-10, %v152_v42  ;;  %v161_v45 = vadd.f32 1e-10, %v153_v44 }
  0xd0   :  { %171 = vperm.xlu1 %508, %v157_v36   ;;  %166 = vperm.xlu0 %507, %v156_v37   ;;  %v162_v47 = vadd.f32 1e-10, %v154_v46  ;;  %v163_v49 = vadd.f32 1e-10, %v155_v48  ;;  %v461_v42 = vld [vmem:[%s821_s8] ss:$0 sm:$0xff] }
  0xd1   :  { %v462_v44 = vld [vmem:[%s822_s9] ss:$0 sm:$0xff]  ;;  %s586_s8 = smov [#allocation2]  }
  0xd2   :  { %s445_s9 = sshll.u32 %s586_s8, 4  ;;  %s446_s9 = int_to_ptr.vmem [resolvable:$true] %s445_s9 }
  0xd3   :  { %s558_s17 = scalar_lea.vmem %s446_s9, 32  ;;  %p563_p1 = scmp.lt.s32.totalorder %s446_s9, %s446_s9 }
  0xd4   :  { %176 = vperm.xlu1 %508, %v158_v39   ;;  %p559_p0 = scmp.ne.s32.totalorder %s446_s9, %s558_s17  ;;  %p564_p2 = scmp.lt.s32.totalorder %s558_s17, %s558_s17 }
  0xd6   :  { %p565_p3 = por %p564_p2, %p563_p1 }
  0xd8   :  { %181 = vperm.xlu1 %508, %v159_v41   ;;  %p566_p4 = pnand %p565_p3, %p559_p0 }
  0xdc   :  { %186 = vperm.xlu1 %508, %v160_v43  }
  0xe0   :  { %191 = vperm.xlu1 %508, %v161_v45  }
  0xe4   :  { %196 = vperm.xlu1 %508, %v162_v47  }
  0xe8   :  { %201 = vperm.xlu1 %508, %v163_v49   ;;  %v463_v49 = vld [vmem:[%s824_s11] ss:$0 sm:$0xff] }
  0xec   :  { %319 = vrot.lane.b32.xlu1 %v317_v53, %s585_s20 }
 0x14f   :  { %v172_v54 = vpop.permute.xlu1 %171  ;;  %v167_v56 = vpop.permute.xlu0 %166 }
 0x150   :  { %v205_v58 = vmul.f32 %v172_v54, %v669_v4  ;;  %v204_v59 = vmul.f32 %v167_v56, %v655_v0 }
 0x152   :  { %v213_v62 = vsel %vm66_vm0, %v205_v58, 0.0  ;;  %v212_v63 = vsel %vm66_vm0, %v204_v59, 0.0 }
 0x153   :  { %v177_v55 = vpop.permute.xlu1 %176  ;;  %v214_v7 = vadd.f32 %v213_v62, %v212_v63 }
 0x154   :  { %v206_v60 = vmul.f32 %v177_v55, %v664_v3 }
 0x156   :  { %v215_v2 = vsel %vm66_vm0, %v206_v60, 0.0 }
 0x157   :  { %v182_v57 = vpop.permute.xlu1 %181  ;;  %v216_v0 = vadd.f32 %v215_v2, %v214_v7 }
 0x158   :  { %v207_v1 = vmul.f32 %v182_v57, %v674_v5 }
 0x15a   :  { %v217_v10 = vsel %vm66_vm0, %v207_v1, 0.0 }
 0x15b   :  { %v187_v61 = vpop.permute.xlu1 %186  ;;  %v218_v11 = vadd.f32 %v217_v10, %v216_v0 }
 0x15c   :  { %v208_v6 = vmul.f32 %v187_v61, %v682_v9 }
 0x15e   :  { %v219_v3 = vsel %vm66_vm0, %v208_v6, 0.0 }
 0x15f   :  { %v192_v8 = vpop.permute.xlu1 %191  ;;  %v220_v5 = vadd.f32 %v219_v3, %v218_v11 }
 0x160   :  { %v209_v4 = vmul.f32 %v192_v8, %v689_v12  ;;  %v454_v12 = vld [vmem:[%s816_s3] ss:$0 sm:$0xff] }
 0x162   :  { %v221_v15 = vsel %vm66_vm0, %v209_v4, 0.0 }
 0x163   :  { %v197_v13 = vpop.permute.xlu1 %196  ;;  %v222_v19 = vadd.f32 %v221_v15, %v220_v5 }
 0x164   :  { %v210_v17 = vmul.f32 %v197_v13, %v695_v14 }
 0x166   :  { %v223_v18 = vsel %vm66_vm0, %v210_v17, 0.0 }
 0x167   :  { %v202_v9 = vpop.permute.xlu1 %201  ;;  %v224_v21 = vadd.f32 %v223_v18, %v222_v19 }
 0x168   :  { %v211_v20 = vmul.f32 %v202_v9, %v701_v16  ;;  %v511_v16 = vld [vmem:[%s823_s10] sm:$0xff]  }
 0x169   :  { %489 = vmatpush3.bf16.msra.mxu1 %v511_v16 }
 0x16a   :  { %v225_v22 = vsel %vm66_vm0, %v211_v20, 0.0  ;;  %490 = vmatprep.subr.bf16.mxu1 %v583_v51 }
 0x16b   :  { %v226_v23 = vadd.f32 %v225_v22, %v224_v21  ;;  %v320_v41 = vpop.permute.xlu1 %319 }
 0x16d   :  { %v234_v14 = vmul.f32 %v454_v12, %v226_v23  ;;  %491 = vmatpush3.bf16.msra.mxu1 %v512_v27 }
 0x16e   :  { %492 = vmatprep.subr.bf16.mxu1 %v583_v51 }
 0x16f   :  { %v242_v25 = vadd.f32 %v455_v24, %v234_v14 }
 0x171   :  { %v243_v26 = vpack.c.bf16 %v242_v25, %v242_v25  ;;  %493 = vmatpush3.bf16.msra.mxu1 %v513_v28 }
 0x172   :  { %494 = vmatprep.subr.bf16.mxu1 %v583_v51 }
 0x173   :  { %485 = vmatmul.mubr.msk.bf16.vlgmr.msra.gmra.mrb[0].mxu0 %vm267_vm3, %v243_v26 }
 0x175   :  { %495 = vmatpush3.bf16.msra.mxu1 %v514_v29 }
 0x176   :  { %496 = vmatprep.subr.bf16.mxu1 %v583_v51 }
 0x179   :  { %497 = vmatpush3.bf16.msra.mxu1 %v390_v31 }
 0x246   :  { %v305_v33 = vpop.f32.mrb[0].mxu0 }
 0x247   :  { %v306_v34 = vadd.f32 %v456_v32, %v305_v33  ;;  %v486_v35 = vpop.f32.mrb[1].mxu0 }
 0x248   :  { %v308_v36 = vpop.f32.mrb[2].mxu0 }
 0x249   :  { %v460_v37 = vmul.f32 -1.442695, %v306_v34  ;;  %v487_v38 = vpop.f32.mrb[3].mxu0 }
 0x24b   :  { %550 = vpow2.f32 %v460_v37 }
 0x255   :  { %v551_v39 = vpop.eup %550 }
 0x256   :  { %v314_v40 = vadd.f32 1.0, %v551_v39 }
 0x258   :  { %552 = vrcp.f32 %v314_v40 }
 0x262   :  { %v553_v43 = vpop.eup %552 }
 0x263   :  { %v323_v45 = vsel %vm322_vm5, %v553_v43, %v320_v41 }
 0x264   :  { %v331_v46 = vmul.f32 %v461_v42, %v323_v45 }
 0x266   :  { %v339_v47 = vadd.f32 %v462_v44, %v331_v46 }
 0x268   :  { %v340_v48 = vpack.c.bf16 %v339_v47, %v339_v47 }
 0x26a   :  { %499 = vmatmul.mubr.msk.bf16.vlgmr.msra.gmra.mrb[0].mxu1 %vm384_vm6, %v340_v48 }
 0x33d   :  { %v426_v50 = vpop.f32.mrb[0].mxu1 }
 0x33e   :  { %v427_v51 = vadd.f32 %v463_v49, %v426_v50  ;;  %v500_v52 = vpop.f32.mrb[1].mxu1 }
 0x33f   :  { %v429_v53 = vpop.f32.mrb[2].mxu1 }
 0x340   :  { %v470_v54 = vmul.f32 -1.442695, %v427_v51  ;;  %v501_v55 = vpop.f32.mrb[3].mxu1 }
 0x342   :  { %554 = vpow2.f32 %v470_v54 }
 0x34c   :  { %v555_v56 = vpop.eup %554 }
 0x34d   :  { %v435_v57 = vadd.f32 1.0, %v555_v56 }
 0x34f   :  { %556 = vrcp.f32 %v435_v57 }
 0x359   :  { %v557_v58 = vpop.eup %556 }
 0x35a   :  { %438 = vst [vmem:[#allocation2] sm:$0x3] %v557_v58 }
 0x35b   :  { %569 = shalt.err (!%p566_p4)
}
 0x35c   :  { %s570_s19 = scalar_lea.hbm %s825_s12, 32 }
 0x35d   :  { %p571_p5 = scmp.ne.s32.totalorder %s825_s12, %s570_s19  ;;  %p574_p6 = scmp.lt.u32.totalorder %s570_s19, %s825_s12 }
 0x35f   :  { %p576_p7 = pnand %p574_p6, %p571_p5 }
 0x361   :  { %579 = shalt.err (!%p576_p7)
}
 0x362   :  { %448 = dma.vmem_to_hbm [thread:$0]  %s446_s9, 32, %s825_s12, [#allocation3]  }
 0x363   :  { %580 = dma.done.wait [#allocation3], 32  }
 0x364   :  { %581 = vsyncadd [#allocation3], 4294967264 }
 0x365   :  { %452 = vsyncpa [#allocation3], 1 }

// kernel: spo_forward.4
= control target key start
LH: loop header
LB: loop body
LE: loop exit
PB: predicated region body
PF: predicated region fallthrough
CT: control target
= control target key end

     0   :  { %vm15_vm0 = vcmask 254976   ;;  %v1023_v0 = vmov 0.0   ;;  %vm1024_vm1 = vmmov 0   ;;  %vm51_vm2 = vcmask 261120   ;;  %s1025_s17 = smov 32   ;;  %s1027_s20 = smov 64   ;;  %s1320_s1 = inlined_call_operand.vmem [shape: bf16[32,128], index: 1, kind: input, shape index: {}]   ;;  %s1321_s0 = inlined_call_operand.vmem [shape: f32[8,2,128], index: 0, kind: input, shape index: {}]   ;;  %s1322_s2 = inlined_call_operand.vmem [shape: f32[2,1], index: 2, kind: input, shape index: {}]   ;;  %s1323_s3 = inlined_call_operand.vmem [shape: f32[8,2,32], index: 3, kind: output, shape index: {}]  }
   0x1   :  { %885 = vmatprep.subr.bf16.mxu0 %v1023_v0  ;;  %v1054_v1 = vld [vmem:[%s1320_s1] sm:$0xff]   ;;  %889 = vmatprep.mubr.msk.bf16.mxu0 %vm1024_vm1, %v1023_v0  ;;  %16 = vst.msk [vmem:[#allocation2] sm:$0x3] %vm15_vm0, %v1023_v0  ;;  %17 = vst.msk [vmem:[#allocation3] sm:$0x3] %vm15_vm0, %v1023_v0  ;;  %v1069_v2 = vld [vmem:[%s1320_s1 + $0x8] sm:$0xff]   ;;  %v22_v14 = vlaneseq }
   0x2   :  { %893 = vmatprep.subr.bf16.mxu1 %v1023_v0  ;;  %897 = vmatprep.mubr.msk.bf16.mxu1 %vm1024_vm1, %v1023_v0  ;;  %v37_v5 = vld [vmem:[%s1321_s0] sm:$0x3]  ;;  %v1026_v22 = vmov 0   ;;  %s1028_s21 = smov 96   ;;  %v1029_v32 = vmov -1.0   ;;  %vm142_vm5 = vcmask 123904  }
   0x3   :  { %886 = vmatpush3.bf16.msra.mxu0 %v1054_v1  ;;  %894 = vmatpush3.bf16.msra.mxu1 %v1054_v1  ;;  %v1092_v15 = vand.u32 127, %v22_v14  ;;  %v26_v23 = vld [vmem:[%s1322_s2] sm:$0x3]  ;;  %vm145_vm6 = vcmask 255104   ;;  %v827_v45 = vld [vmem:[%s1321_s0 + $0x2] sm:$0x3] }
   0x4   :  { %887 = vmatprep.subr.bf16.mxu0 %v1023_v0  ;;  %895 = vmatprep.subr.bf16.mxu1 %v1023_v0 }
   0x5   :  { %vm24_vm3 = vcmp.lt.s32.totalorder %v1092_v15, 96  ;;  %956 = vset.pattern.permute.xlu0 %v1026_v22  ;;  %vm25_vm4 = vcmp.lt.s32.totalorder %v1092_v15, 16 }
   0x6   :  { %v1107_v33 = vsel %vm25_vm4, 1.0, %v1029_v32 }
   0x7   :  { %888 = vmatpush3.bf16.msra.mxu0 %v1069_v2  ;;  %896 = vmatpush3.bf16.msra.mxu1 %v1069_v2  ;;  %v127_v35 = vmul.f32 0.0, %v1107_v33 }
   0x8   :  { %v1076_v3 = vld [vmem:[#allocation2] sm:$0x3]  ;;  %901 = vmatprep.subr.bf16.mxu0 %v1023_v0  ;;  %909 = vmatprep.subr.bf16.mxu1 %v1023_v0  ;;  %v36_v19 = vld [vmem:[#allocation3] sm:$0x3] }
   0x9   :  { %v38_v4 = vpack.c.bf16 %v1076_v3, %v1076_v3 }
   0xb   :  { %890 = vmatmul.mubr.msk.bf16.vlgmr.msra.gmra.mrb[0].mxu0 %vm51_vm2, %v38_v4 }
   0xc   :  { %902 = vmatpush3.bf16.msra.mxu0 %v1054_v1  ;;  %905 = vmatprep.mubr.msk.bf16.mxu0 %vm1024_vm1, %v1023_v0 }
   0xd   :  { %903 = vmatprep.subr.bf16.mxu0 %v1023_v0 }
  0x10   :  { %904 = vmatpush3.bf16.msra.mxu0 %v1069_v2 }
  0x11   :  { %917 = vmatprep.subr.bf16.mxu0 %v1023_v0 }
  0xde   :  { %v89_v6 = vpop.f32.mrb[0].mxu0 }
  0xdf   :  { %v95_v7 = vadd.f32 %v89_v6, %v37_v5  ;;  %v891_v8 = vpop.f32.mrb[1].mxu0 }
  0xe0   :  { %v92_v9 = vpop.f32.mrb[2].mxu0 }
  0xe1   :  { %v825_v10 = vmul.f32 -1.442695, %v95_v7  ;;  %v892_v11 = vpop.f32.mrb[3].mxu0 }
  0xe3   :  { %959 = vpow2.f32 %v825_v10 }
  0xe4   :  { %961 = vtanh.f32 %v95_v7 }
  0xed   :  { %v960_v12 = vpop.eup %959 }
  0xee   :  { %v99_v13 = vadd.f32 1.0, %v960_v12  ;;  %v962_v16 = vpop.eup %961 }
  0xf0   :  { %963 = vrcp.f32 %v99_v13  ;;  %v832_v13 = vld [vmem:[%s1321_s0 + $0x4] sm:$0x3] }
  0xfa   :  { %v964_v17 = vpop.eup %963 }
  0xfb   :  { %v105_v18 = vsel %vm24_vm3, %v964_v17, %v962_v16 }
  0xfc   :  { %112 = vrot.lane.b32.xlu0 %v105_v18, %s1025_s17 }
 0x100   :  { %107 = vrot.lane.b32.xlu0 %v36_v19, %s1025_s17 }
 0x104   :  { %29 = vperm.xlu0 %956, %v26_v23  }
 0x16e   :  { %v113_v20 = vpop.permute.xlu0 %112 }
 0x16f   :  { %v115_v21 = vmul.f32 %v113_v20, %v105_v18 }
 0x171   :  { %117 = vrot.lane.b32.xlu1 %v115_v21, %s1025_s17 }
 0x172   :  { %v108_v24 = vpop.permute.xlu0 %107 }
 0x173   :  { %v110_v25 = vmul.f32 %v108_v24, %v105_v18 }
 0x183   :  { %v30_v31 = vpop.permute.xlu0 %29 }
 0x184   :  { %v821_v34 = vadd.f32 -7.0, %v30_v31 }
 0x186   :  { %v1110_v36 = vsel %vm25_vm4, %v30_v31, %v821_v34 }
 0x187   :  { %vm128_vm7 = vcmp.lt.f32.partialorder %v127_v35, %v1110_v36  ;;  %vm225_vm8 = vcmp.lt.f32.partialorder %v1107_v33, %v1110_v36  ;;  %v321_v35 = vmul.f32 2.0, %v1107_v33 }
 0x189   :  { %vm322_vm9 = vcmp.lt.f32.partialorder %v321_v35, %v1110_v36 }
 0x1e3   :  { %v118_v26 = vpop.permute.xlu1 %117 }
 0x1e4   :  { %v120_v27 = vadd.f32 %v118_v26, %v110_v25 }
 0x1e6   :  { %965 = vtanh.f32 %v120_v27 }
 0x1f0   :  { %v966_v28 = vpop.eup %965 }
 0x1f1   :  { %123 = vrot.lane.b32.xlu1 %v966_v28, %s1025_s17 }
 0x263   :  { %v124_v29 = vpop.permute.xlu1 %123 }
 0x264   :  { %v126_v30 = vmul.f32 %v124_v29, %v105_v18 }
 0x266   :  { %136 = vrot.lane.b32.xlu1 %v126_v30, %s1027_s20 }
 0x26a   :  { %130 = vrot.lane.b32.xlu1 %v120_v27, %s1028_s21 }
 0x2d8   :  { %v137_v37 = vpop.permute.xlu1 %136 }
 0x2d9   :  { %v139_v38 = vsel %vm128_vm7, %v137_v37, %v1076_v3  ;;  %v141_v39 = vsel %vm128_vm7, %v137_v37, 0.0 }
 0x2da   :  { %140 = vst.msk [vmem:[#allocation2] sm:$0x3] %vm15_vm0, %v139_v38 }
 0x2db   :  { %143 = vst.msk [vmem:[%s1323_s3] sm:$0x3] %vm142_vm5, %v141_v39 }
 0x2dc   :  { %826 = vst.msk [vmem:[%s1323_s3 + $0xe] sm:$0x3] %vm145_vm6, %v141_v39  ;;  %v131_v40 = vpop.permute.xlu1 %130 }
 0x2dd   :  { %v133_v41 = vsel %vm128_vm7, %v131_v40, %v36_v19 }
 0x2de   :  { %134 = vst.msk [vmem:[#allocation3] sm:$0x3] %vm15_vm0, %v133_v41 }
 0x2e1   :  { %v147_v42 = vld [vmem:[#allocation2] sm:$0x3] }
 0x2e2   :  { %v151_v43 = vpack.c.bf16 %v147_v42, %v147_v42 }
 0x2e4   :  { %898 = vmatmul.mubr.msk.bf16.vlgmr.msra.gmra.mrb[0].mxu1 %vm51_vm2, %v151_v43 }
 0x2e5   :  { %v148_v44 = vld [vmem:[#allocation3] sm:$0x3]  ;;  %910 = vmatpush3.bf16.msra.mxu1 %v1054_v1  ;;  %913 = vmatprep.mubr.msk.bf16.mxu1 %vm1024_vm1, %v1023_v0 }
 0x2e6   :  { %205 = vrot.lane.b32.xlu1 %v148_v44, %s1025_s17  ;;  %911 = vmatprep.subr.bf16.mxu1 %v1023_v0 }
 0x2e9   :  { %912 = vmatpush3.bf16.msra.mxu1 %v1069_v2 }
 0x2ea   :  { %925 = vmatprep.subr.bf16.mxu1 %v1023_v0 }
 0x358   :  { %v206_v59 = vpop.permute.xlu1 %205 }
 0x3b7   :  { %v189_v46 = vpop.f32.mrb[0].mxu1 }
 0x3b8   :  { %v195_v47 = vadd.f32 %v827_v45, %v189_v46  ;;  %v899_v48 = vpop.f32.mrb[1].mxu1  ;;  %v837_v46 = vld [vmem:[%s1321_s0 + $0x6] sm:$0x3] }
 0x3b9   :  { %v192_v49 = vpop.f32.mrb[2].mxu1 }
 0x3ba   :  { %v829_v50 = vmul.f32 -1.442695, %v195_v47  ;;  %v900_v51 = vpop.f32.mrb[3].mxu1 }
 0x3bc   :  { %967 = vpow2.f32 %v829_v50 }
 0x3bd   :  { %969 = vtanh.f32 %v195_v47 }
 0x3c6   :  { %v968_v52 = vpop.eup %967 }
 0x3c7   :  { %v199_v53 = vadd.f32 1.0, %v968_v52  ;;  %v970_v54 = vpop.eup %969 }
 0x3c9   :  { %971 = vrcp.f32 %v199_v53 }
 0x3d3   :  { %v972_v55 = vpop.eup %971 }
 0x3d4   :  { %v203_v56 = vsel %vm24_vm3, %v972_v55, %v970_v54 }
 0x3d5   :  { %210 = vrot.lane.b32.xlu0 %v203_v56, %s1025_s17  ;;  %v208_v60 = vmul.f32 %v206_v59, %v203_v56 }
 0x447   :  { %v211_v57 = vpop.permute.xlu0 %210 }
 0x448   :  { %v213_v58 = vmul.f32 %v211_v57, %v203_v56 }
 0x44a   :  { %215 = vrot.lane.b32.xlu0 %v213_v58, %s1025_s17 }
 0x4bc   :  { %v216_v61 = vpop.permute.xlu0 %215 }
 0x4bd   :  { %v218_v62 = vadd.f32 %v216_v61, %v208_v60 }
 0x4bf   :  { %973 = vtanh.f32 %v218_v62 }
 0x4c9   :  { %v974_v63 = vpop.eup %973 }
 0x4ca   :  { %221 = vrot.lane.b32.xlu1 %v974_v63, %s1025_s17 }
 0x4ce   :  { %227 = vrot.lane.b32.xlu1 %v218_v62, %s1028_s21 }
 0x53c   :  { %v222_v3 = vpop.permute.xlu1 %221 }
 0x53d   :  { %v224_v4 = vmul.f32 %v222_v3, %v203_v56 }
 0x53f   :  { %233 = vrot.lane.b32.xlu0 %v224_v4, %s1027_s20 }
 0x540   :  { %v228_v5 = vpop.permute.xlu1 %227 }
 0x541   :  { %v230_v6 = vsel %vm225_vm8, %v228_v5, %v148_v44  ;;  %v418_v5 = vmul.f32 3.0, %v1107_v33 }
 0x542   :  { %231 = vst.msk [vmem:[#allocation3] sm:$0x3] %vm15_vm0, %v230_v6 }
 0x543   :  { %vm419_vm10 = vcmp.lt.f32.partialorder %v418_v5, %v1110_v36 }
 0x549   :  { %v244_v7 = vld [vmem:[#allocation3] sm:$0x3] }
 0x54a   :  { %301 = vrot.lane.b32.xlu1 %v244_v7, %s1025_s17 }
 0x5b1   :  { %v234_v8 = vpop.permute.xlu0 %233 }
 0x5b2   :  { %v236_v9 = vsel %vm225_vm8, %v234_v8, %v147_v42  ;;  %v238_v10 = vsel %vm225_vm8, %v234_v8, 0.0 }
 0x5b3   :  { %237 = vst.msk [vmem:[#allocation2] sm:$0x3] %vm15_vm0, %v236_v9 }
 0x5b4   :  { %830 = vst.msk [vmem:[%s1323_s3 + $0x2] sm:$0x3] %vm142_vm5, %v238_v10 }
 0x5b5   :  { %831 = vst.msk [vmem:[%s1323_s3 + $0xc] sm:$0x3] %vm145_vm6, %v238_v10 }
 0x5ba   :  { %v243_v11 = vld [vmem:[#allocation2] sm:$0x3] }
 0x5bb   :  { %v247_v12 = vpack.c.bf16 %v243_v11, %v243_v11 }
 0x5bc   :  { %v302_v28 = vpop.permute.xlu1 %301 }
 0x5bd   :  { %906 = vmatmul.mubr.msk.bf16.vlgmr.msra.gmra.mrb[4].mxu0 %vm51_vm2, %v247_v12 }
 0x5be   :  { %918 = vmatpush3.bf16.msra.mxu0 %v1054_v1  ;;  %921 = vmatprep.mubr.msk.bf16.mxu0 %vm1024_vm1, %v1023_v0 }
 0x5bf   :  { %919 = vmatprep.subr.bf16.mxu0 %v1023_v0 }
 0x5c2   :  { %920 = vmatpush3.bf16.msra.mxu0 %v1069_v2 }
 0x5c3   :  { %933 = vmatprep.subr.bf16.mxu0 %v1023_v0 }
 0x690   :  { %v285_v14 = vpop.f32.mrb[4].mxu0 }
 0x691   :  { %v291_v16 = vadd.f32 %v832_v13, %v285_v14  ;;  %v907_v17 = vpop.f32.mrb[5].mxu0 }
 0x692   :  { %v288_v18 = vpop.f32.mrb[6].mxu0 }
 0x693   :  { %v834_v19 = vmul.f32 -1.442695, %v291_v16  ;;  %v908_v20 = vpop.f32.mrb[7].mxu0 }
 0x695   :  { %975 = vpow2.f32 %v834_v19 }
 0x696   :  { %977 = vtanh.f32 %v291_v16  ;;  %v842_v16 = vld [vmem:[%s1321_s0 + $0x8] sm:$0x3] }
 0x69f   :  { %v976_v21 = vpop.eup %975 }
 0x6a0   :  { %v295_v22 = vadd.f32 1.0, %v976_v21  ;;  %v978_v23 = vpop.eup %977 }
 0x6a2   :  { %979 = vrcp.f32 %v295_v22 }
 0x6ac   :  { %v980_v24 = vpop.eup %979 }
 0x6ad   :  { %v299_v25 = vsel %vm24_vm3, %v980_v24, %v978_v23 }
 0x6ae   :  { %306 = vrot.lane.b32.xlu0 %v299_v25, %s1025_s17  ;;  %v304_v29 = vmul.f32 %v302_v28, %v299_v25 }
 0x720   :  { %v307_v26 = vpop.permute.xlu0 %306 }
 0x721   :  { %v309_v27 = vmul.f32 %v307_v26, %v299_v25 }
 0x723   :  { %311 = vrot.lane.b32.xlu0 %v309_v27, %s1025_s17 }
 0x795   :  { %v312_v30 = vpop.permute.xlu0 %311 }
 0x796   :  { %v314_v31 = vadd.f32 %v312_v30, %v304_v29 }
 0x798   :  { %981 = vtanh.f32 %v314_v31 }
 0x7a2   :  { %v982_v32 = vpop.eup %981 }
 0x7a3   :  { %317 = vrot.lane.b32.xlu1 %v982_v32, %s1025_s17 }
 0x7a7   :  { %324 = vrot.lane.b32.xlu1 %v314_v31, %s1028_s21 }
 0x815   :  { %v318_v34 = vpop.permute.xlu1 %317 }
 0x816   :  { %v320_v37 = vmul.f32 %v318_v34, %v299_v25 }
 0x818   :  { %330 = vrot.lane.b32.xlu0 %v320_v37, %s1027_s20 }
 0x819   :  { %v325_v38 = vpop.permute.xlu1 %324 }
 0x81a   :  { %v327_v39 = vsel %vm322_vm9, %v325_v38, %v244_v7  ;;  %v515_v38 = vmul.f32 4.0, %v1107_v33 }
 0x81b   :  { %328 = vst.msk [vmem:[#allocation3] sm:$0x3] %vm15_vm0, %v327_v39 }
 0x81c   :  { %vm516_vm11 = vcmp.lt.f32.partialorder %v515_v38, %v1110_v36 }
 0x822   :  { %v341_v40 = vld [vmem:[#allocation3] sm:$0x3] }
 0x823   :  { %398 = vrot.lane.b32.xlu1 %v341_v40, %s1025_s17 }
 0x88a   :  { %v331_v41 = vpop.permute.xlu0 %330 }
 0x88b   :  { %v333_v42 = vsel %vm322_vm9, %v331_v41, %v243_v11  ;;  %v335_v43 = vsel %vm322_vm9, %v331_v41, 0.0 }
 0x88c   :  { %334 = vst.msk [vmem:[#allocation2] sm:$0x3] %vm15_vm0, %v333_v42 }
 0x88d   :  { %835 = vst.msk [vmem:[%s1323_s3 + $0x4] sm:$0x3] %vm142_vm5, %v335_v43 }
 0x88e   :  { %836 = vst.msk [vmem:[%s1323_s3 + $0xa] sm:$0x3] %vm145_vm6, %v335_v43 }
 0x893   :  { %v340_v44 = vld [vmem:[#allocation2] sm:$0x3] }
 0x894   :  { %v344_v45 = vpack.c.bf16 %v340_v44, %v340_v44 }
 0x895   :  { %v399_v60 = vpop.permute.xlu1 %398 }
 0x896   :  { %914 = vmatmul.mubr.msk.bf16.vlgmr.msra.gmra.mrb[4].mxu1 %vm51_vm2, %v344_v45 }
 0x897   :  { %926 = vmatpush3.bf16.msra.mxu1 %v1054_v1  ;;  %929 = vmatprep.mubr.msk.bf16.mxu1 %vm1024_vm1, %v1023_v0 }
 0x898   :  { %927 = vmatprep.subr.bf16.mxu1 %v1023_v0 }
 0x89b   :  { %928 = vmatpush3.bf16.msra.mxu1 %v1069_v2 }
 0x89c   :  { %941 = vmatprep.subr.bf16.mxu1 %v1023_v0 }
 0x969   :  { %v382_v47 = vpop.f32.mrb[4].mxu1 }
 0x96a   :  { %v388_v48 = vadd.f32 %v837_v46, %v382_v47  ;;  %v915_v49 = vpop.f32.mrb[5].mxu1 }
 0x96b   :  { %v385_v50 = vpop.f32.mrb[6].mxu1 }
 0x96c   :  { %v839_v51 = vmul.f32 -1.442695, %v388_v48  ;;  %v916_v52 = vpop.f32.mrb[7].mxu1 }
 0x96e   :  { %983 = vpow2.f32 %v839_v51 }
 0x96f   :  { %985 = vtanh.f32 %v388_v48  ;;  %v847_v48 = vld [vmem:[%s1321_s0 + $0xa] sm:$0x3] }
 0x978   :  { %v984_v53 = vpop.eup %983 }
 0x979   :  { %v392_v54 = vadd.f32 1.0, %v984_v53  ;;  %v986_v55 = vpop.eup %985 }
 0x97b   :  { %987 = vrcp.f32 %v392_v54 }
 0x985   :  { %v988_v56 = vpop.eup %987 }
 0x986   :  { %v396_v57 = vsel %vm24_vm3, %v988_v56, %v986_v55 }
 0x987   :  { %403 = vrot.lane.b32.xlu0 %v396_v57, %s1025_s17  ;;  %v401_v61 = vmul.f32 %v399_v60, %v396_v57 }
 0x9f9   :  { %v404_v58 = vpop.permute.xlu0 %403 }
 0x9fa   :  { %v406_v59 = vmul.f32 %v404_v58, %v396_v57 }
 0x9fc   :  { %408 = vrot.lane.b32.xlu0 %v406_v59, %s1025_s17 }
 0xa6e   :  { %v409_v62 = vpop.permute.xlu0 %408 }
 0xa6f   :  { %v411_v63 = vadd.f32 %v409_v62, %v401_v61 }
 0xa71   :  { %989 = vtanh.f32 %v411_v63 }
 0xa7b   :  { %v990_v3 = vpop.eup %989 }
 0xa7c   :  { %414 = vrot.lane.b32.xlu1 %v990_v3, %s1025_s17 }
 0xa80   :  { %421 = vrot.lane.b32.xlu1 %v411_v63, %s1028_s21 }
 0xaee   :  { %v415_v4 = vpop.permute.xlu1 %414 }
 0xaef   :  { %v417_v6 = vmul.f32 %v415_v4, %v396_v57  ;;  %v610_v4 = vmul.f32 5.0, %v1107_v33 }
 0xaf1   :  { %427 = vrot.lane.b32.xlu0 %v417_v6, %s1027_s20  ;;  %vm611_vm12 = vcmp.lt.f32.partialorder %v610_v4, %v1110_v36 }
 0xaf2   :  { %v422_v7 = vpop.permute.xlu1 %421 }
 0xaf3   :  { %v424_v8 = vsel %vm419_vm10, %v422_v7, %v341_v40 }
 0xaf4   :  { %425 = vst.msk [vmem:[#allocation3] sm:$0x3] %vm15_vm0, %v424_v8 }
 0xafb   :  { %v438_v9 = vld [vmem:[#allocation3] sm:$0x3] }
 0xafc   :  { %495 = vrot.lane.b32.xlu1 %v438_v9, %s1025_s17 }
 0xb63   :  { %v428_v10 = vpop.permute.xlu0 %427 }
 0xb64   :  { %v430_v11 = vsel %vm419_vm10, %v428_v10, %v340_v44  ;;  %v432_v12 = vsel %vm419_vm10, %v428_v10, 0.0 }
 0xb65   :  { %431 = vst.msk [vmem:[#allocation2] sm:$0x3] %vm15_vm0, %v430_v11 }
 0xb66   :  { %840 = vst.msk [vmem:[%s1323_s3 + $0x6] sm:$0x3] %vm142_vm5, %v432_v12 }
 0xb67   :  { %841 = vst.msk [vmem:[%s1323_s3 + $0x8] sm:$0x3] %vm145_vm6, %v432_v12 }
 0xb6c   :  { %v437_v13 = vld [vmem:[#allocation2] sm:$0x3] }
 0xb6d   :  { %v441_v14 = vpack.c.bf16 %v437_v13, %v437_v13 }
 0xb6e   :  { %v496_v30 = vpop.permute.xlu1 %495 }
 0xb6f   :  { %922 = vmatmul.mubr.msk.bf16.vlgmr.msra.gmra.mrb[8].mxu0 %vm51_vm2, %v441_v14  ;;  %v852_v14 = vld [vmem:[%s1321_s0 + $0xc] sm:$0x3] }
 0xb70   :  { %934 = vmatpush3.bf16.msra.mxu0 %v1054_v1  ;;  %937 = vmatprep.mubr.msk.bf16.mxu0 %vm1024_vm1, %v1023_v0 }
 0xb71   :  { %935 = vmatprep.subr.bf16.mxu0 %v1023_v0 }
 0xb74   :  { %936 = vmatpush3.bf16.msra.mxu0 %v1069_v2 }
 0xc42   :  { %v479_v17 = vpop.f32.mrb[8].mxu0 }
 0xc43   :  { %v485_v18 = vadd.f32 %v842_v16, %v479_v17  ;;  %v923_v19 = vpop.f32.mrb[9].mxu0 }
 0xc44   :  { %v482_v20 = vpop.f32.mrb[10].mxu0 }
 0xc45   :  { %v844_v21 = vmul.f32 -1.442695, %v485_v18  ;;  %v924_v22 = vpop.f32.mrb[11].mxu0 }
 0xc47   :  { %991 = vpow2.f32 %v844_v21 }
 0xc48   :  { %993 = vtanh.f32 %v485_v18 }
 0xc51   :  { %v992_v23 = vpop.eup %991 }
 0xc52   :  { %v489_v24 = vadd.f32 1.0, %v992_v23  ;;  %v994_v25 = vpop.eup %993 }
 0xc54   :  { %995 = vrcp.f32 %v489_v24 }
 0xc5e   :  { %v996_v26 = vpop.eup %995 }
 0xc5f   :  { %v493_v27 = vsel %vm24_vm3, %v996_v26, %v994_v25 }
 0xc60   :  { %500 = vrot.lane.b32.xlu0 %v493_v27, %s1025_s17  ;;  %v498_v31 = vmul.f32 %v496_v30, %v493_v27 }
 0xcd2   :  { %v501_v28 = vpop.permute.xlu0 %500 }
 0xcd3   :  { %v503_v29 = vmul.f32 %v501_v28, %v493_v27 }
 0xcd5   :  { %505 = vrot.lane.b32.xlu0 %v503_v29, %s1025_s17 }
 0xd47   :  { %v506_v32 = vpop.permute.xlu0 %505 }
 0xd48   :  { %v508_v34 = vadd.f32 %v506_v32, %v498_v31 }
 0xd4a   :  { %997 = vtanh.f32 %v508_v34 }
 0xd54   :  { %v998_v35 = vpop.eup %997 }
 0xd55   :  { %511 = vrot.lane.b32.xlu1 %v998_v35, %s1025_s17 }
 0xd59   :  { %518 = vrot.lane.b32.xlu1 %v508_v34, %s1028_s21 }
 0xdc7   :  { %v512_v37 = vpop.permute.xlu1 %511 }
 0xdc8   :  { %v514_v39 = vmul.f32 %v512_v37, %v493_v27  ;;  %v705_v37 = vmul.f32 6.0, %v1107_v33 }
 0xdca   :  { %524 = vrot.lane.b32.xlu0 %v514_v39, %s1027_s20  ;;  %vm706_vm13 = vcmp.lt.f32.partialorder %v705_v37, %v1110_v36 }
 0xdcb   :  { %v519_v40 = vpop.permute.xlu1 %518 }
 0xdcc   :  { %v521_v41 = vsel %vm516_vm11, %v519_v40, %v438_v9 }
 0xdcd   :  { %522 = vst.msk [vmem:[#allocation3] sm:$0x3] %vm15_vm0, %v521_v41 }
 0xdd4   :  { %v533_v42 = vld [vmem:[#allocation3] sm:$0x3] }
 0xdd5   :  { %590 = vrot.lane.b32.xlu1 %v533_v42, %s1025_s17 }
 0xe3c   :  { %v525_v43 = vpop.permute.xlu0 %524 }
 0xe3d   :  { %v527_v44 = vsel %vm516_vm11, %v525_v43, %v437_v13  ;;  %v529_v45 = vsel %vm516_vm11, %v525_v43, 0.0 }
 0xe3e   :  { %528 = vst.msk [vmem:[#allocation2] sm:$0x3] %vm15_vm0, %v527_v44 }
 0xe3f   :  { %845 = vst.msk [vmem:[%s1323_s3 + $0x8] sm:$0x3] %vm142_vm5, %v529_v45 }
 0xe40   :  { %846 = vst.msk [vmem:[%s1323_s3 + $0x6] sm:$0x3] %vm145_vm6, %v529_v45 }
 0xe45   :  { %v532_v46 = vld [vmem:[#allocation2] sm:$0x3] }
 0xe46   :  { %v536_v47 = vpack.c.bf16 %v532_v46, %v532_v46 }
 0xe47   :  { %v591_v59 = vpop.permute.xlu1 %590 }
 0xe48   :  { %930 = vmatmul.mubr.msk.bf16.vlgmr.msra.gmra.mrb[8].mxu1 %vm51_vm2, %v536_v47  ;;  %v857_v47 = vld [vmem:[%s1321_s0 + $0xe] sm:$0x3] }
 0xe49   :  { %942 = vmatpush3.bf16.msra.mxu1 %v1054_v1  ;;  %945 = vmatprep.mubr.msk.bf16.mxu1 %vm1024_vm1, %v1023_v0 }
 0xe4a   :  { %943 = vmatprep.subr.bf16.mxu1 %v1023_v0 }
 0xe4d   :  { %944 = vmatpush3.bf16.msra.mxu1 %v1069_v2 }
 0xf1b   :  { %v574_v49 = vpop.f32.mrb[8].mxu1 }
 0xf1c   :  { %v580_v50 = vadd.f32 %v847_v48, %v574_v49  ;;  %v931_v51 = vpop.f32.mrb[9].mxu1 }
 0xf1d   :  { %v577_v52 = vpop.f32.mrb[10].mxu1 }
 0xf1e   :  { %v849_v53 = vmul.f32 -1.442695, %v580_v50  ;;  %v932_v54 = vpop.f32.mrb[11].mxu1 }
 0xf20   :  { %999 = vpow2.f32 %v849_v53 }
 0xf21   :  { %1001 = vtanh.f32 %v580_v50 }
 0xf2a   :  { %v1000_v55 = vpop.eup %999 }
 0xf2b   :  { %v584_v1 = vadd.f32 1.0, %v1000_v55  ;;  %v1002_v56 = vpop.eup %1001 }
 0xf2d   :  { %1003 = vrcp.f32 %v584_v1 }
 0xf37   :  { %v1004_v57 = vpop.eup %1003 }
 0xf38   :  { %v588_v0 = vsel %vm24_vm3, %v1004_v57, %v1002_v56 }
 0xf39   :  { %595 = vrot.lane.b32.xlu0 %v588_v0, %s1025_s17  ;;  %v593_v60 = vmul.f32 %v591_v59, %v588_v0 }
 0xfab   :  { %v596_v2 = vpop.permute.xlu0 %595 }
 0xfac   :  { %v598_v58 = vmul.f32 %v596_v2, %v588_v0 }
 0xfae   :  { %600 = vrot.lane.b32.xlu0 %v598_v58, %s1025_s17 }
0x1020   :  { %v601_v61 = vpop.permute.xlu0 %600 }
0x1021   :  { %v603_v62 = vadd.f32 %v601_v61, %v593_v60 }
0x1023   :  { %1005 = vtanh.f32 %v603_v62 }
0x102d   :  { %v1006_v63 = vpop.eup %1005 }
0x102e   :  { %606 = vrot.lane.b32.xlu1 %v1006_v63, %s1025_s17  ;;  %v800_v63 = vmul.f32 7.0, %v1107_v33 }
0x1030   :  { %vm801_vm14 = vcmp.lt.f32.partialorder %v800_v63, %v1110_v36 }
0x1032   :  { %613 = vrot.lane.b32.xlu1 %v603_v62, %s1028_s21 }
0x10a0   :  { %v607_v3 = vpop.permute.xlu1 %606 }
0x10a1   :  { %v609_v5 = vmul.f32 %v607_v3, %v588_v0 }
0x10a3   :  { %619 = vrot.lane.b32.xlu0 %v609_v5, %s1027_s20 }
0x10a4   :  { %v614_v6 = vpop.permute.xlu1 %613 }
0x10a5   :  { %v616_v7 = vsel %vm611_vm12, %v614_v6, %v533_v42 }
0x10a6   :  { %617 = vst.msk [vmem:[#allocation3] sm:$0x3] %vm15_vm0, %v616_v7 }
0x10ad   :  { %v628_v8 = vld [vmem:[#allocation3] sm:$0x3] }
0x10ae   :  { %685 = vrot.lane.b32.xlu1 %v628_v8, %s1025_s17 }
0x1115   :  { %v620_v9 = vpop.permute.xlu0 %619 }
0x1116   :  { %v622_v10 = vsel %vm611_vm12, %v620_v9, %v532_v46  ;;  %v624_v11 = vsel %vm611_vm12, %v620_v9, 0.0 }
0x1117   :  { %623 = vst.msk [vmem:[#allocation2] sm:$0x3] %vm15_vm0, %v622_v10 }
0x1118   :  { %850 = vst.msk [vmem:[%s1323_s3 + $0xa] sm:$0x3] %vm142_vm5, %v624_v11 }
0x1119   :  { %851 = vst.msk [vmem:[%s1323_s3 + $0x4] sm:$0x3] %vm145_vm6, %v624_v11 }
0x111e   :  { %v627_v12 = vld [vmem:[#allocation2] sm:$0x3] }
0x111f   :  { %v631_v13 = vpack.c.bf16 %v627_v12, %v627_v12 }
0x1120   :  { %v686_v29 = vpop.permute.xlu1 %685 }
0x1121   :  { %938 = vmatmul.mubr.msk.bf16.vlgmr.msra.gmra.mrb[12].mxu0 %vm51_vm2, %v631_v13 }
0x11f4   :  { %v669_v16 = vpop.f32.mrb[12].mxu0 }
0x11f5   :  { %v675_v17 = vadd.f32 %v852_v14, %v669_v16  ;;  %v939_v18 = vpop.f32.mrb[13].mxu0 }
0x11f6   :  { %v672_v19 = vpop.f32.mrb[14].mxu0 }
0x11f7   :  { %v854_v20 = vmul.f32 -1.442695, %v675_v17  ;;  %v940_v21 = vpop.f32.mrb[15].mxu0 }
0x11f9   :  { %1007 = vpow2.f32 %v854_v20 }
0x11fa   :  { %1009 = vtanh.f32 %v675_v17 }
0x1203   :  { %v1008_v22 = vpop.eup %1007 }
0x1204   :  { %v679_v23 = vadd.f32 1.0, %v1008_v22  ;;  %v1010_v24 = vpop.eup %1009 }
0x1206   :  { %1011 = vrcp.f32 %v679_v23 }
0x1210   :  { %v1012_v25 = vpop.eup %1011 }
0x1211   :  { %v683_v26 = vsel %vm24_vm3, %v1012_v25, %v1010_v24 }
0x1212   :  { %690 = vrot.lane.b32.xlu0 %v683_v26, %s1025_s17  ;;  %v688_v30 = vmul.f32 %v686_v29, %v683_v26 }
0x1284   :  { %v691_v27 = vpop.permute.xlu0 %690 }
0x1285   :  { %v693_v28 = vmul.f32 %v691_v27, %v683_v26 }
0x1287   :  { %695 = vrot.lane.b32.xlu0 %v693_v28, %s1025_s17 }
0x12f9   :  { %v696_v31 = vpop.permute.xlu0 %695 }
0x12fa   :  { %v698_v32 = vadd.f32 %v696_v31, %v688_v30 }
0x12fc   :  { %1013 = vtanh.f32 %v698_v32 }
0x1306   :  { %v1014_v34 = vpop.eup %1013 }
0x1307   :  { %701 = vrot.lane.b32.xlu1 %v1014_v34, %s1025_s17 }
0x130b   :  { %708 = vrot.lane.b32.xlu1 %v698_v32, %s1028_s21 }
0x1379   :  { %v702_v35 = vpop.permute.xlu1 %701 }
0x137a   :  { %v704_v38 = vmul.f32 %v702_v35, %v683_v26 }
0x137c   :  { %714 = vrot.lane.b32.xlu0 %v704_v38, %s1027_s20 }
0x137d   :  { %v709_v39 = vpop.permute.xlu1 %708 }
0x137e   :  { %v711_v40 = vsel %vm706_vm13, %v709_v39, %v628_v8 }
0x137f   :  { %712 = vst.msk [vmem:[#allocation3] sm:$0x3] %vm15_vm0, %v711_v40 }
0x1386   :  { %v723_v41 = vld [vmem:[#allocation3] sm:$0x3] }
0x1387   :  { %780 = vrot.lane.b32.xlu1 %v723_v41, %s1025_s17 }
0x13ee   :  { %v715_v42 = vpop.permute.xlu0 %714 }
0x13ef   :  { %v717_v43 = vsel %vm706_vm13, %v715_v42, %v627_v12  ;;  %v719_v44 = vsel %vm706_vm13, %v715_v42, 0.0 }
0x13f0   :  { %718 = vst.msk [vmem:[#allocation2] sm:$0x3] %vm15_vm0, %v717_v43 }
0x13f1   :  { %855 = vst.msk [vmem:[%s1323_s3 + $0xc] sm:$0x3] %vm142_vm5, %v719_v44 }
0x13f2   :  { %856 = vst.msk [vmem:[%s1323_s3 + $0x2] sm:$0x3] %vm145_vm6, %v719_v44 }
0x13f7   :  { %v722_v45 = vld [vmem:[#allocation2] sm:$0x3] }
0x13f8   :  { %v726_v46 = vpack.c.bf16 %v722_v45, %v722_v45 }
0x13f9   :  { %v781_v58 = vpop.permute.xlu1 %780 }
0x13fa   :  { %946 = vmatmul.mubr.msk.bf16.vlgmr.msra.gmra.mrb[12].mxu1 %vm51_vm2, %v726_v46 }
0x14cd   :  { %v764_v48 = vpop.f32.mrb[12].mxu1 }
0x14ce   :  { %v770_v49 = vadd.f32 %v857_v47, %v764_v48  ;;  %v947_v50 = vpop.f32.mrb[13].mxu1 }
0x14cf   :  { %v767_v51 = vpop.f32.mrb[14].mxu1 }
0x14d0   :  { %v859_v52 = vmul.f32 -1.442695, %v770_v49  ;;  %v948_v53 = vpop.f32.mrb[15].mxu1 }
0x14d2   :  { %1015 = vpow2.f32 %v859_v52 }
0x14d3   :  { %1017 = vtanh.f32 %v770_v49 }
0x14dc   :  { %v1016_v54 = vpop.eup %1015 }
0x14dd   :  { %v774_v55 = vadd.f32 1.0, %v1016_v54  ;;  %v1018_v1 = vpop.eup %1017 }
0x14df   :  { %1019 = vrcp.f32 %v774_v55 }
0x14e9   :  { %v1020_v56 = vpop.eup %1019 }
0x14ea   :  { %v778_v57 = vsel %vm24_vm3, %v1020_v56, %v1018_v1 }
0x14eb   :  { %785 = vrot.lane.b32.xlu0 %v778_v57, %s1025_s17  ;;  %v783_v59 = vmul.f32 %v781_v58, %v778_v57 }
0x155d   :  { %v786_v0 = vpop.permute.xlu0 %785 }
0x155e   :  { %v788_v2 = vmul.f32 %v786_v0, %v778_v57 }
0x1560   :  { %790 = vrot.lane.b32.xlu0 %v788_v2, %s1025_s17 }
0x15d2   :  { %v791_v60 = vpop.permute.xlu0 %790 }
0x15d3   :  { %v793_v61 = vadd.f32 %v791_v60, %v783_v59 }
0x15d5   :  { %1021 = vtanh.f32 %v793_v61  ;;  %803 = vrot.lane.b32.xlu0 %v793_v61, %s1028_s21 }
0x15df   :  { %v1022_v62 = vpop.eup %1021 }
0x15e0   :  { %796 = vrot.lane.b32.xlu1 %v1022_v62, %s1025_s17 }
0x1647   :  { %v804_v15 = vpop.permute.xlu0 %803 }
0x1648   :  { %v806_v3 = vsel %vm801_vm14, %v804_v15, %v723_v41 }
0x1649   :  { %807 = vst.msk [vmem:[#allocation3] sm:$0x3] %vm15_vm0, %v806_v3 }
0x1652   :  { %v797_v4 = vpop.permute.xlu1 %796 }
0x1653   :  { %v799_v5 = vmul.f32 %v797_v4, %v778_v57 }
0x1655   :  { %809 = vrot.lane.b32.xlu1 %v799_v5, %s1027_s20 }
0x16c7   :  { %v810_v6 = vpop.permute.xlu1 %809 }
0x16c8   :  { %v812_v7 = vsel %vm801_vm14, %v810_v6, %v722_v45  ;;  %v814_v8 = vsel %vm801_vm14, %v810_v6, 0.0 }
0x16c9   :  { %813 = vst.msk [vmem:[#allocation2] sm:$0x3] %vm15_vm0, %v812_v7 }
0x16ca   :  { %860 = vst.msk [vmem:[%s1323_s3 + $0xe] sm:$0x3] %vm142_vm5, %v814_v8 }
0x16cb   :  { %816 = vst.msk [vmem:[%s1323_s3] sm:$0x3] %vm145_vm6, %v814_v8 }

</bundles_post_ra>
